<compile_context>
chip_gen: v6e
topology: v6e:2x2x1
jax: 0.10.0
libtpu: 0.0.40
codegen_flags: <defaults>
</compile_context>

<pallas_src>
import jax
import jax.numpy as jnp
from jax.experimental import pallas as pl
from jax.experimental.pallas import tpu as pltpu

LANE = 128        # vreg lane width: hidden dim padded to a multiple of this
BATCH_PAD = 16    # batch rows padded to bf16 sublane packing (16 rows/tile)


def _round_up(x, m):
    return (x + m - 1) // m * m


# ----------------------------- Pallas kernel --------------------------------

def _make_gru_layer_kernel(T, B, Hp, ndir):
    """Fused (bi)directional GRU layer, everything lane/sublane aligned.

    Ref shapes:
      x_ref    : [T*B, Din_pad]        bf16   time-major, flattened
      w_ih_ref : [Din_pad, ndir*3*Hp]  bf16   gates r|z|n per direction
      w_hh_ref : [ndir, Hp, 3*Hp]      bf16
      b_gi_ref : [1, ndir*3*Hp]        f32    b_ih+b_hh for r,z ; b_ih for n
      b_hn_ref : [1, ndir*Hp]          f32    b_hh of the n gate (scaled by r)
      seq_ref  : [T*B, ndir*Hp]        bf16   fwd at lanes [0:Hp], bwd [Hp:2Hp]
      h_last   : [B, ndir*Hp]          f32    final hidden per direction
      gi_ref   : [T*B, ndir*3*Hp]      f32    scratch (hoisted input matmul)
    """

    def kernel(x_ref, w_ih_ref, w_hh_ref, b_gi_ref, b_hn_ref,
               seq_ref, h_last_ref, gi_ref):
        # One big MXU matmul: input projections for all steps / gates / dirs.
        gi_ref[...] = (
            jnp.dot(x_ref[...], w_ih_ref[...],
                    preferred_element_type=jnp.float32)
            + b_gi_ref[...])

        w_hh = [w_hh_ref[d] for d in range(ndir)]                 # [Hp, 3Hp] bf16
        b_hn = [b_hn_ref[:, d * Hp:(d + 1) * Hp] for d in range(ndir)]
        hs = [jnp.zeros((B, Hp), jnp.float32) for _ in range(ndir)]

        # Fully unrolled recurrence (static T); only h @ W_hh is per-step.
        for t in range(T):
            for d in range(ndir):
                tt = t if d == 0 else T - 1 - t        # backward walks reversed
                r0 = tt * B
                gi = gi_ref[r0:r0 + B, d * 3 * Hp:(d + 1) * 3 * Hp]   # [B, 3Hp]
                gh = jnp.dot(hs[d].astype(w_hh[d].dtype), w_hh[d],
                             preferred_element_type=jnp.float32)      # [B, 3Hp]
                r = jax.nn.sigmoid(gi[:, 0:Hp] + gh[:, 0:Hp])
                z = jax.nn.sigmoid(gi[:, Hp:2 * Hp] + gh[:, Hp:2 * Hp])
                n = jnp.tanh(gi[:, 2 * Hp:3 * Hp]
                             + r * (gh[:, 2 * Hp:3 * Hp] + b_hn[d]))
                h_new = (1.0 - z) * n + z * hs[d]
                hs[d] = h_new
                # lane-aligned (Hp = k*128), sublane-aligned (B = k*16) store.
                seq_ref[r0:r0 + B, d * Hp:(d + 1) * Hp] = (
                    h_new.astype(seq_ref.dtype))

        for d in range(ndir):
            h_last_ref[:, d * Hp:(d + 1) * Hp] = hs[d]

    return kernel


_VMEM = pl.BlockSpec(memory_space=pltpu.MemorySpace.VMEM)


def _gru_layer(x, p, *, T, Bp, Hp, ndir):
    """x: [T*Bp, Din_pad] bf16 -> (seq [T*Bp, ndir*Hp] bf16, h_last [Bp, ndir*Hp] f32)."""
    return pl.pallas_call(
        _make_gru_layer_kernel(T, Bp, Hp, ndir),
        out_shape=(jax.ShapeDtypeStruct((T * Bp, ndir * Hp), jnp.bfloat16),
                   jax.ShapeDtypeStruct((Bp, ndir * Hp), jnp.float32)),
        in_specs=[_VMEM] * 5,
        out_specs=(_VMEM, _VMEM),
        scratch_shapes=[pltpu.VMEM((T * Bp, ndir * 3 * Hp), jnp.float32)],
        compiler_params=pltpu.CompilerParams(
            vmem_limit_bytes=32 * 1024 * 1024),
    )(x, p['w_ih'], p['w_hh'], p['b_gi'], p['b_hn'])


# -------------------- one-time parameter preparation -------------------------

def _pad_direction(w_ih, w_hh, b_ih, b_hh, H, Hp, in_segs, din_pad):
    """Pad one direction's PyTorch-layout GRU params into the lane-aligned
    layout consumed by the kernel.  in_segs = [(src_row, dst_row, nrows)]
    maps the real input features into the padded input dimension."""
    w_ih_t = w_ih.T.astype(jnp.float32)        # [Din, 3H]
    w_hh_t = w_hh.T.astype(jnp.float32)        # [H, 3H]
    w_ih_p = jnp.zeros((din_pad, 3 * Hp), jnp.float32)
    w_hh_p = jnp.zeros((Hp, 3 * Hp), jnp.float32)
    b_gi_p = jnp.zeros((3 * Hp,), jnp.float32)
    b_hn_p = jnp.zeros((Hp,), jnp.float32)
    for g in range(3):                         # gates r | z | n
        src = slice(g * H, (g + 1) * H)
        dst = slice(g * Hp, g * Hp + H)
        for (s0, d0, n) in in_segs:
            w_ih_p = w_ih_p.at[d0:d0 + n, dst].set(w_ih_t[s0:s0 + n, src])
        w_hh_p = w_hh_p.at[0:H, dst].set(w_hh_t[:, src])
        if g < 2:      # r, z: fold b_ih + b_hh into the hoisted projection
            b_gi_p = b_gi_p.at[dst].set(b_ih[src] + b_hh[src])
        else:          # n: b_hh must stay separate (it is multiplied by r)
            b_gi_p = b_gi_p.at[dst].set(b_ih[src])
            b_hn_p = b_hn_p.at[0:H].set(b_hh[src])
    return w_ih_p, w_hh_p, b_gi_p, b_hn_p


def prepare_params(params, emb_dim, hidden_dim, n_layers, bidirectional):
    """Transpose, pad to lane multiples, fold biases, cast matmul operands to
    bf16 — done once, outside the forward pass."""
    H = hidden_dim
    Hp = _round_up(H, LANE)
    Ep = _round_up(emb_dim, LANE)
    ndir = 2 if bidirectional else 1
    dirs = ['fwd', 'bwd'][:ndir]
    prepped = []
    for layer in range(n_layers):
        if layer == 0:
            in_segs = [(0, 0, emb_dim)]
            din_pad = Ep
        else:
            in_segs = [(d * H, d * Hp, H) for d in range(ndir)]
            din_pad = ndir * Hp
        w_ih_ds, w_hh_ds, b_gi_ds, b_hn_ds = [], [], [], []
        for d in dirs:
            p = params[f'l{layer}_{d}']
            wi, wh, bg, bn = _pad_direction(p['w_ih'], p['w_hh'],
                                            p['b_ih'], p['b_hh'],
                                            H, Hp, in_segs, din_pad)
            w_ih_ds.append(wi)
            w_hh_ds.append(wh)
            b_gi_ds.append(bg)
            b_hn_ds.append(bn)
        prepped.append({
            'w_ih': jnp.concatenate(w_ih_ds, axis=1).astype(jnp.bfloat16),
            'w_hh': jnp.stack(w_hh_ds, axis=0).astype(jnp.bfloat16),
            'b_gi': jnp.concatenate(b_gi_ds)[None, :],
            'b_hn': jnp.concatenate(b_hn_ds)[None, :],
        })
    return prepped


# ------------------------------- forward -------------------------------------

def xlnet_gru_forward(embedded, prepped, out_w, out_b, *,
                      hidden_dim, n_layers, bidirectional):
    """embedded: [B, T, E] = xlnet(**text)[0].  Returns logits [B, output_dim]."""
    B, T, E = embedded.shape
    H = hidden_dim
    Hp = _round_up(H, LANE)
    Bp = _round_up(B, BATCH_PAD)
    Ep = _round_up(E, LANE)
    ndir = 2 if bidirectional else 1

    # batch_first -> time-major, pad batch/lane dims, flatten to [T*Bp, Ep].
    x = jnp.transpose(embedded, (1, 0, 2)).astype(jnp.float32)
    x = jnp.pad(x, ((0, 0), (0, Bp - B), (0, Ep - E)))
    x = x.reshape(T * Bp, Ep).astype(jnp.bfloat16)

    h_last = None
    for layer in range(n_layers):
        # TODO(synk): inter-layer GRU dropout is training-only; inference => identity.
        x, h_last = _gru_layer(x, prepped[layer], T=T, Bp=Bp, Hp=Hp, ndir=ndir)

    if bidirectional:
        # == torch.cat((hidden[-2], hidden[-1]), dim=1), stripped of padding.
        hidden = jnp.concatenate([h_last[:B, 0:H], h_last[:B, Hp:Hp + H]],
                                 axis=1)
    else:
        hidden = h_last[:B, 0:H]

    # self.dropout(hidden): identity in eval mode.
    # Final nn.Linear: output_dim is tiny -> plain JAX (a dedicated pallas_call
    # would cost more in launch + DMA than the compute; see perf review).
    return hidden @ out_w.T.astype(jnp.float32) + out_b.astype(jnp.float32)


# --------------------------- parameter setup ---------------------------------

def init_params(key, emb_dim, hidden_dim, output_dim, n_layers, bidirectional):
    params = {}
    bound = 1.0 / jnp.sqrt(hidden_dim)
    n_dirs = 2 if bidirectional else 1
    dirs = ['fwd', 'bwd'][:n_dirs]
    for layer in range(n_layers):
        d_in = emb_dim if layer == 0 else hidden_dim * n_dirs
        for d in dirs:
            key, k1, k2, k3, k4 = jax.random.split(key, 5)
            params[f'l{layer}_{d}'] = {
                'w_ih': jax.random.uniform(k1, (3 * hidden_dim, d_in),
                                           jnp.float32, -bound, bound),
                'w_hh': jax.random.uniform(k2, (3 * hidden_dim, hidden_dim),
                                           jnp.float32, -bound, bound),
                'b_ih': jax.random.uniform(k3, (3 * hidden_dim,),
                                           jnp.float32, -bound, bound),
                'b_hh': jax.random.uniform(k4, (3 * hidden_dim,),
                                           jnp.float32, -bound, bound),
            }
    key, k1, k2 = jax.random.split(key, 3)
    fan_in = hidden_dim * n_dirs
    lb = 1.0 / jnp.sqrt(fan_in)
    params['out_w'] = jax.random.uniform(k1, (output_dim, fan_in),
                                         jnp.float32, -lb, lb)
    params['out_b'] = jax.random.uniform(k2, (output_dim,),
                                         jnp.float32, -lb, lb)
    return params


# ------------------------- pure-JAX reference --------------------------------

def _gru_cell_ref(x, h, p):
    H = h.shape[-1]
    gi = x @ p['w_ih'].T + p['b_ih']
    gh = h @ p['w_hh'].T + p['b_hh']
    r = jax.nn.sigmoid(gi[:, :H] + gh[:, :H])
    z = jax.nn.sigmoid(gi[:, H:2 * H] + gh[:, H:2 * H])
    n = jnp.tanh(gi[:, 2 * H:] + r * gh[:, 2 * H:])
    return (1.0 - z) * n + z * h


def forward_ref(embedded, params, n_layers, bidirectional, hidden_dim):
    B, T, _ = embedded.shape
    x = jnp.transpose(embedded, (1, 0, 2))
    h_fwd = h_bwd = None
    for layer in range(n_layers):
        p_f = params[f'l{layer}_fwd']
        h = jnp.zeros((B, hidden_dim), jnp.float32)
        seq_f = []
        for t in range(T):
            h = _gru_cell_ref(x[t], h, p_f)
            seq_f.append(h)
        h_fwd = h
        seq_f = jnp.stack(seq_f)
        if bidirectional:
            p_b = params[f'l{layer}_bwd']
            h = jnp.zeros((B, hidden_dim), jnp.float32)
            seq_b = [None] * T
            for t in range(T - 1, -1, -1):
                h = _gru_cell_ref(x[t], h, p_b)
                seq_b[t] = h
            h_bwd = h
            seq_b = jnp.stack(seq_b)
            x = jnp.concatenate([seq_f, seq_b], axis=-1)
        else:
            x = seq_f
    hidden = jnp.concatenate([h_fwd, h_bwd], axis=-1) if bidirectional else h_fwd
    return hidden @ params['out_w'].T + params['out_b']


# --------------------------------- main ---------------------------------------

if __name__ == "__main__":
    B, T, E = 2, 8, 32           # batch, seq len, xlnet d_model (embedding_dim)
    HIDDEN, OUT = 16, 2          # hidden_dim, output_dim
    N_LAYERS, BIDIR = 2, True

    key = jax.random.PRNGKey(0)
    k_emb, k_par = jax.random.split(key)
    # Stand-in for the frozen XLNet output: embedded = xlnet(**text)[0]
    embedded = jax.random.normal(k_emb, (B, T, E), jnp.float32)
    params = init_params(k_par, E, HIDDEN, OUT, N_LAYERS, BIDIR)
    prepped = prepare_params(params, E, HIDDEN, N_LAYERS, BIDIR)

    out = xlnet_gru_forward(embedded, prepped, params['out_w'], params['out_b'],
                            hidden_dim=HIDDEN, n_layers=N_LAYERS,
                            bidirectional=BIDIR)
    out = jax.block_until_ready(out)

    ref = forward_ref(embedded, params, N_LAYERS, BIDIR, HIDDEN)
    assert out.shape == (B, OUT), out.shape
    # Matmul operands run in bf16 on the MXU (f32 accumulate / gate math), so
    # compare against the pure-f32 reference with a bf16-level tolerance.
    err = float(jnp.max(jnp.abs(out - ref)))
    assert err < 5e-2, f"max err {err}"
    print("KERNEL_OK")
</pallas_src>

<mosaic_0001>
module attributes {stable_mosaic.version = 11 : i64} {
  func.func @kernel(%arg0: memref<128x128xbf16, #tpu.memory_space<vmem>>, %arg1: memref<128x768xbf16, #tpu.memory_space<vmem>>, %arg2: memref<2x128x384xbf16, #tpu.memory_space<vmem>>, %arg3: memref<1x768xf32, #tpu.memory_space<vmem>>, %arg4: memref<1x256xf32, #tpu.memory_space<vmem>>, %arg5: memref<128x256xbf16, #tpu.memory_space<vmem>>, %arg6: memref<16x256xf32, #tpu.memory_space<vmem>>, %arg7: memref<128x768xf32, #tpu.memory_space<vmem>>) attributes {dimension_semantics = [], scalar_prefetch = 0 : i64, scratch_operands = 1 : i64, tpu.core_type = #tpu.core_type<tc>} {
    %c0 = arith.constant 0 : index
    %c0_0 = arith.constant 0 : index
    %0 = vector.load %arg0[%c0, %c0_0] : memref<128x128xbf16, #tpu.memory_space<vmem>>, vector<128x128xbf16>
    %c0_1 = arith.constant 0 : index
    %c0_2 = arith.constant 0 : index
    %1 = vector.load %arg1[%c0_1, %c0_2] : memref<128x768xbf16, #tpu.memory_space<vmem>>, vector<128x768xbf16>
    %cst = arith.constant dense<0.000000e+00> : vector<128x768xf32>
    %2 = tpu.matmul %0, %1, %cst {dimension_numbers = #tpu.dot_dimension_numbers<[1], [0], [0], [1], [0, 0, 1, 1], [], []>} : vector<128x128xbf16>, vector<128x768xbf16>, vector<128x768xf32> -> vector<128x768xf32>
    %c0_3 = arith.constant 0 : index
    %c0_4 = arith.constant 0 : index
    %3 = vector.load %arg3[%c0_3, %c0_4] : memref<1x768xf32, #tpu.memory_space<vmem>>, vector<1x768xf32>
    %4 = vector.broadcast %3 : vector<1x768xf32> to vector<128x768xf32>
    %5 = arith.addf %2, %4 : vector<128x768xf32>
    %c0_5 = arith.constant 0 : index
    %c0_6 = arith.constant 0 : index
    %6 = vector.load %arg7[%c0_5, %c0_6] : memref<128x768xf32, #tpu.memory_space<vmem>>, vector<128x768xf32>
    tpu.vector_store %arg7[%c0_5, %c0_6], %5 {strides = array<i32>} : memref<128x768xf32, #tpu.memory_space<vmem>>, vector<128x768xf32>,
    %c0_7 = arith.constant 0 : index
    %c0_8 = arith.constant 0 : index
    %c0_9 = arith.constant 0 : index
    %7 = vector.load %arg2[%c0_7, %c0_8, %c0_9] : memref<2x128x384xbf16, #tpu.memory_space<vmem>>, vector<1x128x384xbf16>
    %8 = vector.shape_cast %7 : vector<1x128x384xbf16> to vector<128x384xbf16>
    %c1 = arith.constant 1 : index
    %c0_10 = arith.constant 0 : index
    %c0_11 = arith.constant 0 : index
    %9 = vector.load %arg2[%c1, %c0_10, %c0_11] : memref<2x128x384xbf16, #tpu.memory_space<vmem>>, vector<1x128x384xbf16>
    %10 = vector.shape_cast %9 : vector<1x128x384xbf16> to vector<128x384xbf16>
    %c0_12 = arith.constant 0 : index
    %c0_13 = arith.constant 0 : index
    %11 = vector.load %arg4[%c0_12, %c0_13] : memref<1x256xf32, #tpu.memory_space<vmem>>, vector<1x128xf32>
    %c0_14 = arith.constant 0 : index
    %c128 = arith.constant 128 : index
    %12 = vector.load %arg4[%c0_14, %c128] : memref<1x256xf32, #tpu.memory_space<vmem>>, vector<1x128xf32>
    %cst_15 = arith.constant 0.000000e+00 : f32
    %13 = vector.broadcast %cst_15 : f32 to vector<16x128xf32>
    %cst_16 = arith.constant 0.000000e+00 : f32
    %14 = vector.broadcast %cst_16 : f32 to vector<16x128xf32>
    %c0_17 = arith.constant 0 : index
    %c0_18 = arith.constant 0 : index
    %15 = vector.load %arg7[%c0_17, %c0_18] : memref<128x768xf32, #tpu.memory_space<vmem>>, vector<16x384xf32>
    %16 = arith.truncf %13 : vector<16x128xf32> to vector<16x128xbf16>
    %cst_19 = arith.constant dense<0.000000e+00> : vector<16x384xf32>
    %17 = tpu.matmul %16, %8, %cst_19 {dimension_numbers = #tpu.dot_dimension_numbers<[1], [0], [0], [1], [0, 0, 1, 1], [], []>} : vector<16x128xbf16>, vector<128x384xbf16>, vector<16x384xf32> -> vector<16x384xf32>
    %18 = vector.extract_strided_slice %15 {offsets = [0, 0], sizes = [16, 128], strides = [1, 1]} : vector<16x384xf32> to vector<16x128xf32>
    %19 = vector.extract_strided_slice %17 {offsets = [0, 0], sizes = [16, 128], strides = [1, 1]} : vector<16x384xf32> to vector<16x128xf32>
    %20 = arith.addf %18, %19 : vector<16x128xf32>
    %21 = arith.negf %20 : vector<16x128xf32>
    %22 = math.exp %21 : vector<16x128xf32>
    %cst_20 = arith.constant 1.000000e+00 : f32
    %23 = vector.broadcast %cst_20 : f32 to vector<16x128xf32>
    %24 = arith.addf %23, %22 : vector<16x128xf32>
    %25 = arith.divf %23, %24 : vector<16x128xf32>
    %26 = vector.extract_strided_slice %15 {offsets = [0, 128], sizes = [16, 128], strides = [1, 1]} : vector<16x384xf32> to vector<16x128xf32>
    %27 = vector.extract_strided_slice %17 {offsets = [0, 128], sizes = [16, 128], strides = [1, 1]} : vector<16x384xf32> to vector<16x128xf32>
    %28 = arith.addf %26, %27 : vector<16x128xf32>
    %29 = arith.negf %28 : vector<16x128xf32>
    %30 = math.exp %29 : vector<16x128xf32>
    %cst_21 = arith.constant 1.000000e+00 : f32
    %31 = vector.broadcast %cst_21 : f32 to vector<16x128xf32>
    %32 = arith.addf %31, %30 : vector<16x128xf32>
    %33 = arith.divf %31, %32 : vector<16x128xf32>
    %34 = vector.extract_strided_slice %15 {offsets = [0, 256], sizes = [16, 128], strides = [1, 1]} : vector<16x384xf32> to vector<16x128xf32>
    %35 = vector.extract_strided_slice %17 {offsets = [0, 256], sizes = [16, 128], strides = [1, 1]} : vector<16x384xf32> to vector<16x128xf32>
    %36 = vector.broadcast %11 : vector<1x128xf32> to vector<16x128xf32>
    %37 = arith.addf %35, %36 : vector<16x128xf32>
    %38 = arith.mulf %25, %37 : vector<16x128xf32>
    %39 = arith.addf %34, %38 : vector<16x128xf32>
    %40 = math.tanh %39 : vector<16x128xf32>
    %cst_22 = arith.constant 1.000000e+00 : f32
    %41 = vector.broadcast %cst_22 : f32 to vector<16x128xf32>
    %42 = arith.subf %41, %33 : vector<16x128xf32>
    %43 = arith.mulf %42, %40 : vector<16x128xf32>
    %44 = arith.mulf %33, %13 : vector<16x128xf32>
    %45 = arith.addf %43, %44 : vector<16x128xf32>
    %46 = arith.truncf %45 : vector<16x128xf32> to vector<16x128xbf16>
    %c0_23 = arith.constant 0 : index
    %c0_24 = arith.constant 0 : index
    %47 = vector.load %arg5[%c0_23, %c0_24] : memref<128x256xbf16, #tpu.memory_space<vmem>>, vector<16x128xbf16>
    tpu.vector_store %arg5[%c0_23, %c0_24], %46 {strides = array<i32>} : memref<128x256xbf16, #tpu.memory_space<vmem>>, vector<16x128xbf16>,
    %c112 = arith.constant 112 : index
    %c384 = arith.constant 384 : index
    %48 = vector.load %arg7[%c112, %c384] : memref<128x768xf32, #tpu.memory_space<vmem>>, vector<16x384xf32>
    %49 = arith.truncf %14 : vector<16x128xf32> to vector<16x128xbf16>
    %cst_25 = arith.constant dense<0.000000e+00> : vector<16x384xf32>
    %50 = tpu.matmul %49, %10, %cst_25 {dimension_numbers = #tpu.dot_dimension_numbers<[1], [0], [0], [1], [0, 0, 1, 1], [], []>} : vector<16x128xbf16>, vector<128x384xbf16>, vector<16x384xf32> -> vector<16x384xf32>
    %51 = vector.extract_strided_slice %48 {offsets = [0, 0], sizes = [16, 128], strides = [1, 1]} : vector<16x384xf32> to vector<16x128xf32>
    %52 = vector.extract_strided_slice %50 {offsets = [0, 0], sizes = [16, 128], strides = [1, 1]} : vector<16x384xf32> to vector<16x128xf32>
    %53 = arith.addf %51, %52 : vector<16x128xf32>
    %54 = arith.negf %53 : vector<16x128xf32>
    %55 = math.exp %54 : vector<16x128xf32>
    %cst_26 = arith.constant 1.000000e+00 : f32
    %56 = vector.broadcast %cst_26 : f32 to vector<16x128xf32>
    %57 = arith.addf %56, %55 : vector<16x128xf32>
    %58 = arith.divf %56, %57 : vector<16x128xf32>
    %59 = vector.extract_strided_slice %48 {offsets = [0, 128], sizes = [16, 128], strides = [1, 1]} : vector<16x384xf32> to vector<16x128xf32>
    %60 = vector.extract_strided_slice %50 {offsets = [0, 128], sizes = [16, 128], strides = [1, 1]} : vector<16x384xf32> to vector<16x128xf32>
    %61 = arith.addf %59, %60 : vector<16x128xf32>
    %62 = arith.negf %61 : vector<16x128xf32>
    %63 = math.exp %62 : vector<16x128xf32>
    %cst_27 = arith.constant 1.000000e+00 : f32
    %64 = vector.broadcast %cst_27 : f32 to vector<16x128xf32>
    %65 = arith.addf %64, %63 : vector<16x128xf32>
    %66 = arith.divf %64, %65 : vector<16x128xf32>
    %67 = vector.extract_strided_slice %48 {offsets = [0, 256], sizes = [16, 128], strides = [1, 1]} : vector<16x384xf32> to vector<16x128xf32>
    %68 = vector.extract_strided_slice %50 {offsets = [0, 256], sizes = [16, 128], strides = [1, 1]} : vector<16x384xf32> to vector<16x128xf32>
    %69 = vector.broadcast %12 : vector<1x128xf32> to vector<16x128xf32>
    %70 = arith.addf %68, %69 : vector<16x128xf32>
    %71 = arith.mulf %58, %70 : vector<16x128xf32>
    %72 = arith.addf %67, %71 : vector<16x128xf32>
    %73 = math.tanh %72 : vector<16x128xf32>
    %cst_28 = arith.constant 1.000000e+00 : f32
    %74 = vector.broadcast %cst_28 : f32 to vector<16x128xf32>
    %75 = arith.subf %74, %66 : vector<16x128xf32>
    %76 = arith.mulf %75, %73 : vector<16x128xf32>
    %77 = arith.mulf %66, %14 : vector<16x128xf32>
    %78 = arith.addf %76, %77 : vector<16x128xf32>
    %79 = arith.truncf %78 : vector<16x128xf32> to vector<16x128xbf16>
    %c112_29 = arith.constant 112 : index
    %c128_30 = arith.constant 128 : index
    %80 = vector.load %arg5[%c112_29, %c128_30] : memref<128x256xbf16, #tpu.memory_space<vmem>>, vector<16x128xbf16>
    tpu.vector_store %arg5[%c112_29, %c128_30], %79 {strides = array<i32>} : memref<128x256xbf16, #tpu.memory_space<vmem>>, vector<16x128xbf16>,
    %c16 = arith.constant 16 : index
    %c0_31 = arith.constant 0 : index
    %81 = vector.load %arg7[%c16, %c0_31] : memref<128x768xf32, #tpu.memory_space<vmem>>, vector<16x384xf32>
    %82 = arith.truncf %45 : vector<16x128xf32> to vector<16x128xbf16>
    %cst_32 = arith.constant dense<0.000000e+00> : vector<16x384xf32>
    %83 = tpu.matmul %82, %8, %cst_32 {dimension_numbers = #tpu.dot_dimension_numbers<[1], [0], [0], [1], [0, 0, 1, 1], [], []>} : vector<16x128xbf16>, vector<128x384xbf16>, vector<16x384xf32> -> vector<16x384xf32>
    %84 = vector.extract_strided_slice %81 {offsets = [0, 0], sizes = [16, 128], strides = [1, 1]} : vector<16x384xf32> to vector<16x128xf32>
    %85 = vector.extract_strided_slice %83 {offsets = [0, 0], sizes = [16, 128], strides = [1, 1]} : vector<16x384xf32> to vector<16x128xf32>
    %86 = arith.addf %84, %85 : vector<16x128xf32>
    %87 = arith.negf %86 : vector<16x128xf32>
    %88 = math.exp %87 : vector<16x128xf32>
    %cst_33 = arith.constant 1.000000e+00 : f32
    %89 = vector.broadcast %cst_33 : f32 to vector<16x128xf32>
    %90 = arith.addf %89, %88 : vector<16x128xf32>
    %91 = arith.divf %89, %90 : vector<16x128xf32>
    %92 = vector.extract_strided_slice %81 {offsets = [0, 128], sizes = [16, 128], strides = [1, 1]} : vector<16x384xf32> to vector<16x128xf32>
    %93 = vector.extract_strided_slice %83 {offsets = [0, 128], sizes = [16, 128], strides = [1, 1]} : vector<16x384xf32> to vector<16x128xf32>
    %94 = arith.addf %92, %93 : vector<16x128xf32>
    %95 = arith.negf %94 : vector<16x128xf32>
    %96 = math.exp %95 : vector<16x128xf32>
    %cst_34 = arith.constant 1.000000e+00 : f32
    %97 = vector.broadcast %cst_34 : f32 to vector<16x128xf32>
    %98 = arith.addf %97, %96 : vector<16x128xf32>
    %99 = arith.divf %97, %98 : vector<16x128xf32>
    %100 = vector.extract_strided_slice %81 {offsets = [0, 256], sizes = [16, 128], strides = [1, 1]} : vector<16x384xf32> to vector<16x128xf32>
    %101 = vector.extract_strided_slice %83 {offsets = [0, 256], sizes = [16, 128], strides = [1, 1]} : vector<16x384xf32> to vector<16x128xf32>
    %102 = vector.broadcast %11 : vector<1x128xf32> to vector<16x128xf32>
    %103 = arith.addf %101, %102 : vector<16x128xf32>
    %104 = arith.mulf %91, %103 : vector<16x128xf32>
    %105 = arith.addf %100, %104 : vector<16x128xf32>
    %106 = math.tanh %105 : vector<16x128xf32>
    %cst_35 = arith.constant 1.000000e+00 : f32
    %107 = vector.broadcast %cst_35 : f32 to vector<16x128xf32>
    %108 = arith.subf %107, %99 : vector<16x128xf32>
    %109 = arith.mulf %108, %106 : vector<16x128xf32>
    %110 = arith.mulf %99, %45 : vector<16x128xf32>
    %111 = arith.addf %109, %110 : vector<16x128xf32>
    %112 = arith.truncf %111 : vector<16x128xf32> to vector<16x128xbf16>
    %c16_36 = arith.constant 16 : index
    %c0_37 = arith.constant 0 : index
    %113 = vector.load %arg5[%c16_36, %c0_37] : memref<128x256xbf16, #tpu.memory_space<vmem>>, vector<16x128xbf16>
    tpu.vector_store %arg5[%c16_36, %c0_37], %112 {strides = array<i32>} : memref<128x256xbf16, #tpu.memory_space<vmem>>, vector<16x128xbf16>,
    %c96 = arith.constant 96 : index
    %c384_38 = arith.constant 384 : index
    %114 = vector.load %arg7[%c96, %c384_38] : memref<128x768xf32, #tpu.memory_space<vmem>>, vector<16x384xf32>
    %115 = arith.truncf %78 : vector<16x128xf32> to vector<16x128xbf16>
    %cst_39 = arith.constant dense<0.000000e+00> : vector<16x384xf32>
    %116 = tpu.matmul %115, %10, %cst_39 {dimension_numbers = #tpu.dot_dimension_numbers<[1], [0], [0], [1], [0, 0, 1, 1], [], []>} : vector<16x128xbf16>, vector<128x384xbf16>, vector<16x384xf32> -> vector<16x384xf32>
    %117 = vector.extract_strided_slice %114 {offsets = [0, 0], sizes = [16, 128], strides = [1, 1]} : vector<16x384xf32> to vector<16x128xf32>
    %118 = vector.extract_strided_slice %116 {offsets = [0, 0], sizes = [16, 128], strides = [1, 1]} : vector<16x384xf32> to vector<16x128xf32>
    %119 = arith.addf %117, %118 : vector<16x128xf32>
    %120 = arith.negf %119 : vector<16x128xf32>
    %121 = math.exp %120 : vector<16x128xf32>
    %cst_40 = arith.constant 1.000000e+00 : f32
    %122 = vector.broadcast %cst_40 : f32 to vector<16x128xf32>
    %123 = arith.addf %122, %121 : vector<16x128xf32>
    %124 = arith.divf %122, %123 : vector<16x128xf32>
    %125 = vector.extract_strided_slice %114 {offsets = [0, 128], sizes = [16, 128], strides = [1, 1]} : vector<16x384xf32> to vector<16x128xf32>
    %126 = vector.extract_strided_slice %116 {offsets = [0, 128], sizes = [16, 128], strides = [1, 1]} : vector<16x384xf32> to vector<16x128xf32>
    %127 = arith.addf %125, %126 : vector<16x128xf32>
    %128 = arith.negf %127 : vector<16x128xf32>
    %129 = math.exp %128 : vector<16x128xf32>
    %cst_41 = arith.constant 1.000000e+00 : f32
    %130 = vector.broadcast %cst_41 : f32 to vector<16x128xf32>
    %131 = arith.addf %130, %129 : vector<16x128xf32>
    %132 = arith.divf %130, %131 : vector<16x128xf32>
    %133 = vector.extract_strided_slice %114 {offsets = [0, 256], sizes = [16, 128], strides = [1, 1]} : vector<16x384xf32> to vector<16x128xf32>
    %134 = vector.extract_strided_slice %116 {offsets = [0, 256], sizes = [16, 128], strides = [1, 1]} : vector<16x384xf32> to vector<16x128xf32>
    %135 = vector.broadcast %12 : vector<1x128xf32> to vector<16x128xf32>
    %136 = arith.addf %134, %135 : vector<16x128xf32>
    %137 = arith.mulf %124, %136 : vector<16x128xf32>
    %138 = arith.addf %133, %137 : vector<16x128xf32>
    %139 = math.tanh %138 : vector<16x128xf32>
    %cst_42 = arith.constant 1.000000e+00 : f32
    %140 = vector.broadcast %cst_42 : f32 to vector<16x128xf32>
    %141 = arith.subf %140, %132 : vector<16x128xf32>
    %142 = arith.mulf %141, %139 : vector<16x128xf32>
    %143 = arith.mulf %132, %78 : vector<16x128xf32>
    %144 = arith.addf %142, %143 : vector<16x128xf32>
    %145 = arith.truncf %144 : vector<16x128xf32> to vector<16x128xbf16>
    %c96_43 = arith.constant 96 : index
    %c128_44 = arith.constant 128 : index
    %146 = vector.load %arg5[%c96_43, %c128_44] : memref<128x256xbf16, #tpu.memory_space<vmem>>, vector<16x128xbf16>
    tpu.vector_store %arg5[%c96_43, %c128_44], %145 {strides = array<i32>} : memref<128x256xbf16, #tpu.memory_space<vmem>>, vector<16x128xbf16>,
    %c32 = arith.constant 32 : index
    %c0_45 = arith.constant 0 : index
    %147 = vector.load %arg7[%c32, %c0_45] : memref<128x768xf32, #tpu.memory_space<vmem>>, vector<16x384xf32>
    %148 = arith.truncf %111 : vector<16x128xf32> to vector<16x128xbf16>
    %cst_46 = arith.constant dense<0.000000e+00> : vector<16x384xf32>
    %149 = tpu.matmul %148, %8, %cst_46 {dimension_numbers = #tpu.dot_dimension_numbers<[1], [0], [0], [1], [0, 0, 1, 1], [], []>} : vector<16x128xbf16>, vector<128x384xbf16>, vector<16x384xf32> -> vector<16x384xf32>
    %150 = vector.extract_strided_slice %147 {offsets = [0, 0], sizes = [16, 128], strides = [1, 1]} : vector<16x384xf32> to vector<16x128xf32>
    %151 = vector.extract_strided_slice %149 {offsets = [0, 0], sizes = [16, 128], strides = [1, 1]} : vector<16x384xf32> to vector<16x128xf32>
    %152 = arith.addf %150, %151 : vector<16x128xf32>
    %153 = arith.negf %152 : vector<16x128xf32>
    %154 = math.exp %153 : vector<16x128xf32>
    %cst_47 = arith.constant 1.000000e+00 : f32
    %155 = vector.broadcast %cst_47 : f32 to vector<16x128xf32>
    %156 = arith.addf %155, %154 : vector<16x128xf32>
    %157 = arith.divf %155, %156 : vector<16x128xf32>
    %158 = vector.extract_strided_slice %147 {offsets = [0, 128], sizes = [16, 128], strides = [1, 1]} : vector<16x384xf32> to vector<16x128xf32>
    %159 = vector.extract_strided_slice %149 {offsets = [0, 128], sizes = [16, 128], strides = [1, 1]} : vector<16x384xf32> to vector<16x128xf32>
    %160 = arith.addf %158, %159 : vector<16x128xf32>
    %161 = arith.negf %160 : vector<16x128xf32>
    %162 = math.exp %161 : vector<16x128xf32>
    %cst_48 = arith.constant 1.000000e+00 : f32
    %163 = vector.broadcast %cst_48 : f32 to vector<16x128xf32>
    %164 = arith.addf %163, %162 : vector<16x128xf32>
    %165 = arith.divf %163, %164 : vector<16x128xf32>
    %166 = vector.extract_strided_slice %147 {offsets = [0, 256], sizes = [16, 128], strides = [1, 1]} : vector<16x384xf32> to vector<16x128xf32>
    %167 = vector.extract_strided_slice %149 {offsets = [0, 256], sizes = [16, 128], strides = [1, 1]} : vector<16x384xf32> to vector<16x128xf32>
    %168 = vector.broadcast %11 : vector<1x128xf32> to vector<16x128xf32>
    %169 = arith.addf %167, %168 : vector<16x128xf32>
    %170 = arith.mulf %157, %169 : vector<16x128xf32>
    %171 = arith.addf %166, %170 : vector<16x128xf32>
    %172 = math.tanh %171 : vector<16x128xf32>
    %cst_49 = arith.constant 1.000000e+00 : f32
    %173 = vector.broadcast %cst_49 : f32 to vector<16x128xf32>
    %174 = arith.subf %173, %165 : vector<16x128xf32>
    %175 = arith.mulf %174, %172 : vector<16x128xf32>
    %176 = arith.mulf %165, %111 : vector<16x128xf32>
    %177 = arith.addf %175, %176 : vector<16x128xf32>
    %178 = arith.truncf %177 : vector<16x128xf32> to vector<16x128xbf16>
    %c32_50 = arith.constant 32 : index
    %c0_51 = arith.constant 0 : index
    %179 = vector.load %arg5[%c32_50, %c0_51] : memref<128x256xbf16, #tpu.memory_space<vmem>>, vector<16x128xbf16>
    tpu.vector_store %arg5[%c32_50, %c0_51], %178 {strides = array<i32>} : memref<128x256xbf16, #tpu.memory_space<vmem>>, vector<16x128xbf16>,
    %c80 = arith.constant 80 : index
    %c384_52 = arith.constant 384 : index
    %180 = vector.load %arg7[%c80, %c384_52] : memref<128x768xf32, #tpu.memory_space<vmem>>, vector<16x384xf32>
    %181 = arith.truncf %144 : vector<16x128xf32> to vector<16x128xbf16>
    %cst_53 = arith.constant dense<0.000000e+00> : vector<16x384xf32>
    %182 = tpu.matmul %181, %10, %cst_53 {dimension_numbers = #tpu.dot_dimension_numbers<[1], [0], [0], [1], [0, 0, 1, 1], [], []>} : vector<16x128xbf16>, vector<128x384xbf16>, vector<16x384xf32> -> vector<16x384xf32>
    %183 = vector.extract_strided_slice %180 {offsets = [0, 0], sizes = [16, 128], strides = [1, 1]} : vector<16x384xf32> to vector<16x128xf32>
    %184 = vector.extract_strided_slice %182 {offsets = [0, 0], sizes = [16, 128], strides = [1, 1]} : vector<16x384xf32> to vector<16x128xf32>
    %185 = arith.addf %183, %184 : vector<16x128xf32>
    %186 = arith.negf %185 : vector<16x128xf32>
    %187 = math.exp %186 : vector<16x128xf32>
    %cst_54 = arith.constant 1.000000e+00 : f32
    %188 = vector.broadcast %cst_54 : f32 to vector<16x128xf32>
    %189 = arith.addf %188, %187 : vector<16x128xf32>
    %190 = arith.divf %188, %189 : vector<16x128xf32>
    %191 = vector.extract_strided_slice %180 {offsets = [0, 128], sizes = [16, 128], strides = [1, 1]} : vector<16x384xf32> to vector<16x128xf32>
    %192 = vector.extract_strided_slice %182 {offsets = [0, 128], sizes = [16, 128], strides = [1, 1]} : vector<16x384xf32> to vector<16x128xf32>
    %193 = arith.addf %191, %192 : vector<16x128xf32>
    %194 = arith.negf %193 : vector<16x128xf32>
    %195 = math.exp %194 : vector<16x128xf32>
    %cst_55 = arith.constant 1.000000e+00 : f32
    %196 = vector.broadcast %cst_55 : f32 to vector<16x128xf32>
    %197 = arith.addf %196, %195 : vector<16x128xf32>
    %198 = arith.divf %196, %197 : vector<16x128xf32>
    %199 = vector.extract_strided_slice %180 {offsets = [0, 256], sizes = [16, 128], strides = [1, 1]} : vector<16x384xf32> to vector<16x128xf32>
    %200 = vector.extract_strided_slice %182 {offsets = [0, 256], sizes = [16, 128], strides = [1, 1]} : vector<16x384xf32> to vector<16x128xf32>
    %201 = vector.broadcast %12 : vector<1x128xf32> to vector<16x128xf32>
    %202 = arith.addf %200, %201 : vector<16x128xf32>
    %203 = arith.mulf %190, %202 : vector<16x128xf32>
    %204 = arith.addf %199, %203 : vector<16x128xf32>
    %205 = math.tanh %204 : vector<16x128xf32>
    %cst_56 = arith.constant 1.000000e+00 : f32
    %206 = vector.broadcast %cst_56 : f32 to vector<16x128xf32>
    %207 = arith.subf %206, %198 : vector<16x128xf32>
    %208 = arith.mulf %207, %205 : vector<16x128xf32>
    %209 = arith.mulf %198, %144 : vector<16x128xf32>
    %210 = arith.addf %208, %209 : vector<16x128xf32>
    %211 = arith.truncf %210 : vector<16x128xf32> to vector<16x128xbf16>
    %c80_57 = arith.constant 80 : index
    %c128_58 = arith.constant 128 : index
    %212 = vector.load %arg5[%c80_57, %c128_58] : memref<128x256xbf16, #tpu.memory_space<vmem>>, vector<16x128xbf16>
    tpu.vector_store %arg5[%c80_57, %c128_58], %211 {strides = array<i32>} : memref<128x256xbf16, #tpu.memory_space<vmem>>, vector<16x128xbf16>,
    %c48 = arith.constant 48 : index
    %c0_59 = arith.constant 0 : index
    %213 = vector.load %arg7[%c48, %c0_59] : memref<128x768xf32, #tpu.memory_space<vmem>>, vector<16x384xf32>
    %214 = arith.truncf %177 : vector<16x128xf32> to vector<16x128xbf16>
    %cst_60 = arith.constant dense<0.000000e+00> : vector<16x384xf32>
    %215 = tpu.matmul %214, %8, %cst_60 {dimension_numbers = #tpu.dot_dimension_numbers<[1], [0], [0], [1], [0, 0, 1, 1], [], []>} : vector<16x128xbf16>, vector<128x384xbf16>, vector<16x384xf32> -> vector<16x384xf32>
    %216 = vector.extract_strided_slice %213 {offsets = [0, 0], sizes = [16, 128], strides = [1, 1]} : vector<16x384xf32> to vector<16x128xf32>
    %217 = vector.extract_strided_slice %215 {offsets = [0, 0], sizes = [16, 128], strides = [1, 1]} : vector<16x384xf32> to vector<16x128xf32>
    %218 = arith.addf %216, %217 : vector<16x128xf32>
    %219 = arith.negf %218 : vector<16x128xf32>
    %220 = math.exp %219 : vector<16x128xf32>
    %cst_61 = arith.constant 1.000000e+00 : f32
    %221 = vector.broadcast %cst_61 : f32 to vector<16x128xf32>
    %222 = arith.addf %221, %220 : vector<16x128xf32>
    %223 = arith.divf %221, %222 : vector<16x128xf32>
    %224 = vector.extract_strided_slice %213 {offsets = [0, 128], sizes = [16, 128], strides = [1, 1]} : vector<16x384xf32> to vector<16x128xf32>
    %225 = vector.extract_strided_slice %215 {offsets = [0, 128], sizes = [16, 128], strides = [1, 1]} : vector<16x384xf32> to vector<16x128xf32>
    %226 = arith.addf %224, %225 : vector<16x128xf32>
    %227 = arith.negf %226 : vector<16x128xf32>
    %228 = math.exp %227 : vector<16x128xf32>
    %cst_62 = arith.constant 1.000000e+00 : f32
    %229 = vector.broadcast %cst_62 : f32 to vector<16x128xf32>
    %230 = arith.addf %229, %228 : vector<16x128xf32>
    %231 = arith.divf %229, %230 : vector<16x128xf32>
    %232 = vector.extract_strided_slice %213 {offsets = [0, 256], sizes = [16, 128], strides = [1, 1]} : vector<16x384xf32> to vector<16x128xf32>
    %233 = vector.extract_strided_slice %215 {offsets = [0, 256], sizes = [16, 128], strides = [1, 1]} : vector<16x384xf32> to vector<16x128xf32>
    %234 = vector.broadcast %11 : vector<1x128xf32> to vector<16x128xf32>
    %235 = arith.addf %233, %234 : vector<16x128xf32>
    %236 = arith.mulf %223, %235 : vector<16x128xf32>
    %237 = arith.addf %232, %236 : vector<16x128xf32>
    %238 = math.tanh %237 : vector<16x128xf32>
    %cst_63 = arith.constant 1.000000e+00 : f32
    %239 = vector.broadcast %cst_63 : f32 to vector<16x128xf32>
    %240 = arith.subf %239, %231 : vector<16x128xf32>
    %241 = arith.mulf %240, %238 : vector<16x128xf32>
    %242 = arith.mulf %231, %177 : vector<16x128xf32>
    %243 = arith.addf %241, %242 : vector<16x128xf32>
    %244 = arith.truncf %243 : vector<16x128xf32> to vector<16x128xbf16>
    %c48_64 = arith.constant 48 : index
    %c0_65 = arith.constant 0 : index
    %245 = vector.load %arg5[%c48_64, %c0_65] : memref<128x256xbf16, #tpu.memory_space<vmem>>, vector<16x128xbf16>
    tpu.vector_store %arg5[%c48_64, %c0_65], %244 {strides = array<i32>} : memref<128x256xbf16, #tpu.memory_space<vmem>>, vector<16x128xbf16>,
    %c64 = arith.constant 64 : index
    %c384_66 = arith.constant 384 : index
    %246 = vector.load %arg7[%c64, %c384_66] : memref<128x768xf32, #tpu.memory_space<vmem>>, vector<16x384xf32>
    %247 = arith.truncf %210 : vector<16x128xf32> to vector<16x128xbf16>
    %cst_67 = arith.constant dense<0.000000e+00> : vector<16x384xf32>
    %248 = tpu.matmul %247, %10, %cst_67 {dimension_numbers = #tpu.dot_dimension_numbers<[1], [0], [0], [1], [0, 0, 1, 1], [], []>} : vector<16x128xbf16>, vector<128x384xbf16>, vector<16x384xf32> -> vector<16x384xf32>
    %249 = vector.extract_strided_slice %246 {offsets = [0, 0], sizes = [16, 128], strides = [1, 1]} : vector<16x384xf32> to vector<16x128xf32>
    %250 = vector.extract_strided_slice %248 {offsets = [0, 0], sizes = [16, 128], strides = [1, 1]} : vector<16x384xf32> to vector<16x128xf32>
    %251 = arith.addf %249, %250 : vector<16x128xf32>
    %252 = arith.negf %251 : vector<16x128xf32>
    %253 = math.exp %252 : vector<16x128xf32>
    %cst_68 = arith.constant 1.000000e+00 : f32
    %254 = vector.broadcast %cst_68 : f32 to vector<16x128xf32>
    %255 = arith.addf %254, %253 : vector<16x128xf32>
    %256 = arith.divf %254, %255 : vector<16x128xf32>
    %257 = vector.extract_strided_slice %246 {offsets = [0, 128], sizes = [16, 128], strides = [1, 1]} : vector<16x384xf32> to vector<16x128xf32>
    %258 = vector.extract_strided_slice %248 {offsets = [0, 128], sizes = [16, 128], strides = [1, 1]} : vector<16x384xf32> to vector<16x128xf32>
    %259 = arith.addf %257, %258 : vector<16x128xf32>
    %260 = arith.negf %259 : vector<16x128xf32>
    %261 = math.exp %260 : vector<16x128xf32>
    %cst_69 = arith.constant 1.000000e+00 : f32
    %262 = vector.broadcast %cst_69 : f32 to vector<16x128xf32>
    %263 = arith.addf %262, %261 : vector<16x128xf32>
    %264 = arith.divf %262, %263 : vector<16x128xf32>
    %265 = vector.extract_strided_slice %246 {offsets = [0, 256], sizes = [16, 128], strides = [1, 1]} : vector<16x384xf32> to vector<16x128xf32>
    %266 = vector.extract_strided_slice %248 {offsets = [0, 256], sizes = [16, 128], strides = [1, 1]} : vector<16x384xf32> to vector<16x128xf32>
    %267 = vector.broadcast %12 : vector<1x128xf32> to vector<16x128xf32>
    %268 = arith.addf %266, %267 : vector<16x128xf32>
    %269 = arith.mulf %256, %268 : vector<16x128xf32>
    %270 = arith.addf %265, %269 : vector<16x128xf32>
    %271 = math.tanh %270 : vector<16x128xf32>
    %cst_70 = arith.constant 1.000000e+00 : f32
    %272 = vector.broadcast %cst_70 : f32 to vector<16x128xf32>
    %273 = arith.subf %272, %264 : vector<16x128xf32>
    %274 = arith.mulf %273, %271 : vector<16x128xf32>
    %275 = arith.mulf %264, %210 : vector<16x128xf32>
    %276 = arith.addf %274, %275 : vector<16x128xf32>
    %277 = arith.truncf %276 : vector<16x128xf32> to vector<16x128xbf16>
    %c64_71 = arith.constant 64 : index
    %c128_72 = arith.constant 128 : index
    %278 = vector.load %arg5[%c64_71, %c128_72] : memref<128x256xbf16, #tpu.memory_space<vmem>>, vector<16x128xbf16>
    tpu.vector_store %arg5[%c64_71, %c128_72], %277 {strides = array<i32>} : memref<128x256xbf16, #tpu.memory_space<vmem>>, vector<16x128xbf16>,
    %c64_73 = arith.constant 64 : index
    %c0_74 = arith.constant 0 : index
    %279 = vector.load %arg7[%c64_73, %c0_74] : memref<128x768xf32, #tpu.memory_space<vmem>>, vector<16x384xf32>
    %280 = arith.truncf %243 : vector<16x128xf32> to vector<16x128xbf16>
    %cst_75 = arith.constant dense<0.000000e+00> : vector<16x384xf32>
    %281 = tpu.matmul %280, %8, %cst_75 {dimension_numbers = #tpu.dot_dimension_numbers<[1], [0], [0], [1], [0, 0, 1, 1], [], []>} : vector<16x128xbf16>, vector<128x384xbf16>, vector<16x384xf32> -> vector<16x384xf32>
    %282 = vector.extract_strided_slice %279 {offsets = [0, 0], sizes = [16, 128], strides = [1, 1]} : vector<16x384xf32> to vector<16x128xf32>
    %283 = vector.extract_strided_slice %281 {offsets = [0, 0], sizes = [16, 128], strides = [1, 1]} : vector<16x384xf32> to vector<16x128xf32>
    %284 = arith.addf %282, %283 : vector<16x128xf32>
    %285 = arith.negf %284 : vector<16x128xf32>
    %286 = math.exp %285 : vector<16x128xf32>
    %cst_76 = arith.constant 1.000000e+00 : f32
    %287 = vector.broadcast %cst_76 : f32 to vector<16x128xf32>
    %288 = arith.addf %287, %286 : vector<16x128xf32>
    %289 = arith.divf %287, %288 : vector<16x128xf32>
    %290 = vector.extract_strided_slice %279 {offsets = [0, 128], sizes = [16, 128], strides = [1, 1]} : vector<16x384xf32> to vector<16x128xf32>
    %291 = vector.extract_strided_slice %281 {offsets = [0, 128], sizes = [16, 128], strides = [1, 1]} : vector<16x384xf32> to vector<16x128xf32>
    %292 = arith.addf %290, %291 : vector<16x128xf32>
    %293 = arith.negf %292 : vector<16x128xf32>
    %294 = math.exp %293 : vector<16x128xf32>
    %cst_77 = arith.constant 1.000000e+00 : f32
    %295 = vector.broadcast %cst_77 : f32 to vector<16x128xf32>
    %296 = arith.addf %295, %294 : vector<16x128xf32>
    %297 = arith.divf %295, %296 : vector<16x128xf32>
    %298 = vector.extract_strided_slice %279 {offsets = [0, 256], sizes = [16, 128], strides = [1, 1]} : vector<16x384xf32> to vector<16x128xf32>
    %299 = vector.extract_strided_slice %281 {offsets = [0, 256], sizes = [16, 128], strides = [1, 1]} : vector<16x384xf32> to vector<16x128xf32>
    %300 = vector.broadcast %11 : vector<1x128xf32> to vector<16x128xf32>
    %301 = arith.addf %299, %300 : vector<16x128xf32>
    %302 = arith.mulf %289, %301 : vector<16x128xf32>
    %303 = arith.addf %298, %302 : vector<16x128xf32>
    %304 = math.tanh %303 : vector<16x128xf32>
    %cst_78 = arith.constant 1.000000e+00 : f32
    %305 = vector.broadcast %cst_78 : f32 to vector<16x128xf32>
    %306 = arith.subf %305, %297 : vector<16x128xf32>
    %307 = arith.mulf %306, %304 : vector<16x128xf32>
    %308 = arith.mulf %297, %243 : vector<16x128xf32>
    %309 = arith.addf %307, %308 : vector<16x128xf32>
    %310 = arith.truncf %309 : vector<16x128xf32> to vector<16x128xbf16>
    %c64_79 = arith.constant 64 : index
    %c0_80 = arith.constant 0 : index
    %311 = vector.load %arg5[%c64_79, %c0_80] : memref<128x256xbf16, #tpu.memory_space<vmem>>, vector<16x128xbf16>
    tpu.vector_store %arg5[%c64_79, %c0_80], %310 {strides = array<i32>} : memref<128x256xbf16, #tpu.memory_space<vmem>>, vector<16x128xbf16>,
    %c48_81 = arith.constant 48 : index
    %c384_82 = arith.constant 384 : index
    %312 = vector.load %arg7[%c48_81, %c384_82] : memref<128x768xf32, #tpu.memory_space<vmem>>, vector<16x384xf32>
    %313 = arith.truncf %276 : vector<16x128xf32> to vector<16x128xbf16>
    %cst_83 = arith.constant dense<0.000000e+00> : vector<16x384xf32>
    %314 = tpu.matmul %313, %10, %cst_83 {dimension_numbers = #tpu.dot_dimension_numbers<[1], [0], [0], [1], [0, 0, 1, 1], [], []>} : vector<16x128xbf16>, vector<128x384xbf16>, vector<16x384xf32> -> vector<16x384xf32>
    %315 = vector.extract_strided_slice %312 {offsets = [0, 0], sizes = [16, 128], strides = [1, 1]} : vector<16x384xf32> to vector<16x128xf32>
    %316 = vector.extract_strided_slice %314 {offsets = [0, 0], sizes = [16, 128], strides = [1, 1]} : vector<16x384xf32> to vector<16x128xf32>
    %317 = arith.addf %315, %316 : vector<16x128xf32>
    %318 = arith.negf %317 : vector<16x128xf32>
    %319 = math.exp %318 : vector<16x128xf32>
    %cst_84 = arith.constant 1.000000e+00 : f32
    %320 = vector.broadcast %cst_84 : f32 to vector<16x128xf32>
    %321 = arith.addf %320, %319 : vector<16x128xf32>
    %322 = arith.divf %320, %321 : vector<16x128xf32>
    %323 = vector.extract_strided_slice %312 {offsets = [0, 128], sizes = [16, 128], strides = [1, 1]} : vector<16x384xf32> to vector<16x128xf32>
    %324 = vector.extract_strided_slice %314 {offsets = [0, 128], sizes = [16, 128], strides = [1, 1]} : vector<16x384xf32> to vector<16x128xf32>
    %325 = arith.addf %323, %324 : vector<16x128xf32>
    %326 = arith.negf %325 : vector<16x128xf32>
    %327 = math.exp %326 : vector<16x128xf32>
    %cst_85 = arith.constant 1.000000e+00 : f32
    %328 = vector.broadcast %cst_85 : f32 to vector<16x128xf32>
    %329 = arith.addf %328, %327 : vector<16x128xf32>
    %330 = arith.divf %328, %329 : vector<16x128xf32>
    %331 = vector.extract_strided_slice %312 {offsets = [0, 256], sizes = [16, 128], strides = [1, 1]} : vector<16x384xf32> to vector<16x128xf32>
    %332 = vector.extract_strided_slice %314 {offsets = [0, 256], sizes = [16, 128], strides = [1, 1]} : vector<16x384xf32> to vector<16x128xf32>
    %333 = vector.broadcast %12 : vector<1x128xf32> to vector<16x128xf32>
    %334 = arith.addf %332, %333 : vector<16x128xf32>
    %335 = arith.mulf %322, %334 : vector<16x128xf32>
    %336 = arith.addf %331, %335 : vector<16x128xf32>
    %337 = math.tanh %336 : vector<16x128xf32>
    %cst_86 = arith.constant 1.000000e+00 : f32
    %338 = vector.broadcast %cst_86 : f32 to vector<16x128xf32>
    %339 = arith.subf %338, %330 : vector<16x128xf32>
    %340 = arith.mulf %339, %337 : vector<16x128xf32>
    %341 = arith.mulf %330, %276 : vector<16x128xf32>
    %342 = arith.addf %340, %341 : vector<16x128xf32>
    %343 = arith.truncf %342 : vector<16x128xf32> to vector<16x128xbf16>
    %c48_87 = arith.constant 48 : index
    %c128_88 = arith.constant 128 : index
    %344 = vector.load %arg5[%c48_87, %c128_88] : memref<128x256xbf16, #tpu.memory_space<vmem>>, vector<16x128xbf16>
    tpu.vector_store %arg5[%c48_87, %c128_88], %343 {strides = array<i32>} : memref<128x256xbf16, #tpu.memory_space<vmem>>, vector<16x128xbf16>,
    %c80_89 = arith.constant 80 : index
    %c0_90 = arith.constant 0 : index
    %345 = vector.load %arg7[%c80_89, %c0_90] : memref<128x768xf32, #tpu.memory_space<vmem>>, vector<16x384xf32>
    %346 = arith.truncf %309 : vector<16x128xf32> to vector<16x128xbf16>
    %cst_91 = arith.constant dense<0.000000e+00> : vector<16x384xf32>
    %347 = tpu.matmul %346, %8, %cst_91 {dimension_numbers = #tpu.dot_dimension_numbers<[1], [0], [0], [1], [0, 0, 1, 1], [], []>} : vector<16x128xbf16>, vector<128x384xbf16>, vector<16x384xf32> -> vector<16x384xf32>
    %348 = vector.extract_strided_slice %345 {offsets = [0, 0], sizes = [16, 128], strides = [1, 1]} : vector<16x384xf32> to vector<16x128xf32>
    %349 = vector.extract_strided_slice %347 {offsets = [0, 0], sizes = [16, 128], strides = [1, 1]} : vector<16x384xf32> to vector<16x128xf32>
    %350 = arith.addf %348, %349 : vector<16x128xf32>
    %351 = arith.negf %350 : vector<16x128xf32>
    %352 = math.exp %351 : vector<16x128xf32>
    %cst_92 = arith.constant 1.000000e+00 : f32
    %353 = vector.broadcast %cst_92 : f32 to vector<16x128xf32>
    %354 = arith.addf %353, %352 : vector<16x128xf32>
    %355 = arith.divf %353, %354 : vector<16x128xf32>
    %356 = vector.extract_strided_slice %345 {offsets = [0, 128], sizes = [16, 128], strides = [1, 1]} : vector<16x384xf32> to vector<16x128xf32>
    %357 = vector.extract_strided_slice %347 {offsets = [0, 128], sizes = [16, 128], strides = [1, 1]} : vector<16x384xf32> to vector<16x128xf32>
    %358 = arith.addf %356, %357 : vector<16x128xf32>
    %359 = arith.negf %358 : vector<16x128xf32>
    %360 = math.exp %359 : vector<16x128xf32>
    %cst_93 = arith.constant 1.000000e+00 : f32
    %361 = vector.broadcast %cst_93 : f32 to vector<16x128xf32>
    %362 = arith.addf %361, %360 : vector<16x128xf32>
    %363 = arith.divf %361, %362 : vector<16x128xf32>
    %364 = vector.extract_strided_slice %345 {offsets = [0, 256], sizes = [16, 128], strides = [1, 1]} : vector<16x384xf32> to vector<16x128xf32>
    %365 = vector.extract_strided_slice %347 {offsets = [0, 256], sizes = [16, 128], strides = [1, 1]} : vector<16x384xf32> to vector<16x128xf32>
    %366 = vector.broadcast %11 : vector<1x128xf32> to vector<16x128xf32>
    %367 = arith.addf %365, %366 : vector<16x128xf32>
    %368 = arith.mulf %355, %367 : vector<16x128xf32>
    %369 = arith.addf %364, %368 : vector<16x128xf32>
    %370 = math.tanh %369 : vector<16x128xf32>
    %cst_94 = arith.constant 1.000000e+00 : f32
    %371 = vector.broadcast %cst_94 : f32 to vector<16x128xf32>
    %372 = arith.subf %371, %363 : vector<16x128xf32>
    %373 = arith.mulf %372, %370 : vector<16x128xf32>
    %374 = arith.mulf %363, %309 : vector<16x128xf32>
    %375 = arith.addf %373, %374 : vector<16x128xf32>
    %376 = arith.truncf %375 : vector<16x128xf32> to vector<16x128xbf16>
    %c80_95 = arith.constant 80 : index
    %c0_96 = arith.constant 0 : index
    %377 = vector.load %arg5[%c80_95, %c0_96] : memref<128x256xbf16, #tpu.memory_space<vmem>>, vector<16x128xbf16>
    tpu.vector_store %arg5[%c80_95, %c0_96], %376 {strides = array<i32>} : memref<128x256xbf16, #tpu.memory_space<vmem>>, vector<16x128xbf16>,
    %c32_97 = arith.constant 32 : index
    %c384_98 = arith.constant 384 : index
    %378 = vector.load %arg7[%c32_97, %c384_98] : memref<128x768xf32, #tpu.memory_space<vmem>>, vector<16x384xf32>
    %379 = arith.truncf %342 : vector<16x128xf32> to vector<16x128xbf16>
    %cst_99 = arith.constant dense<0.000000e+00> : vector<16x384xf32>
    %380 = tpu.matmul %379, %10, %cst_99 {dimension_numbers = #tpu.dot_dimension_numbers<[1], [0], [0], [1], [0, 0, 1, 1], [], []>} : vector<16x128xbf16>, vector<128x384xbf16>, vector<16x384xf32> -> vector<16x384xf32>
    %381 = vector.extract_strided_slice %378 {offsets = [0, 0], sizes = [16, 128], strides = [1, 1]} : vector<16x384xf32> to vector<16x128xf32>
    %382 = vector.extract_strided_slice %380 {offsets = [0, 0], sizes = [16, 128], strides = [1, 1]} : vector<16x384xf32> to vector<16x128xf32>
    %383 = arith.addf %381, %382 : vector<16x128xf32>
    %384 = arith.negf %383 : vector<16x128xf32>
    %385 = math.exp %384 : vector<16x128xf32>
    %cst_100 = arith.constant 1.000000e+00 : f32
    %386 = vector.broadcast %cst_100 : f32 to vector<16x128xf32>
    %387 = arith.addf %386, %385 : vector<16x128xf32>
    %388 = arith.divf %386, %387 : vector<16x128xf32>
    %389 = vector.extract_strided_slice %378 {offsets = [0, 128], sizes = [16, 128], strides = [1, 1]} : vector<16x384xf32> to vector<16x128xf32>
    %390 = vector.extract_strided_slice %380 {offsets = [0, 128], sizes = [16, 128], strides = [1, 1]} : vector<16x384xf32> to vector<16x128xf32>
    %391 = arith.addf %389, %390 : vector<16x128xf32>
    %392 = arith.negf %391 : vector<16x128xf32>
    %393 = math.exp %392 : vector<16x128xf32>
    %cst_101 = arith.constant 1.000000e+00 : f32
    %394 = vector.broadcast %cst_101 : f32 to vector<16x128xf32>
    %395 = arith.addf %394, %393 : vector<16x128xf32>
    %396 = arith.divf %394, %395 : vector<16x128xf32>
    %397 = vector.extract_strided_slice %378 {offsets = [0, 256], sizes = [16, 128], strides = [1, 1]} : vector<16x384xf32> to vector<16x128xf32>
    %398 = vector.extract_strided_slice %380 {offsets = [0, 256], sizes = [16, 128], strides = [1, 1]} : vector<16x384xf32> to vector<16x128xf32>
    %399 = vector.broadcast %12 : vector<1x128xf32> to vector<16x128xf32>
    %400 = arith.addf %398, %399 : vector<16x128xf32>
    %401 = arith.mulf %388, %400 : vector<16x128xf32>
    %402 = arith.addf %397, %401 : vector<16x128xf32>
    %403 = math.tanh %402 : vector<16x128xf32>
    %cst_102 = arith.constant 1.000000e+00 : f32
    %404 = vector.broadcast %cst_102 : f32 to vector<16x128xf32>
    %405 = arith.subf %404, %396 : vector<16x128xf32>
    %406 = arith.mulf %405, %403 : vector<16x128xf32>
    %407 = arith.mulf %396, %342 : vector<16x128xf32>
    %408 = arith.addf %406, %407 : vector<16x128xf32>
    %409 = arith.truncf %408 : vector<16x128xf32> to vector<16x128xbf16>
    %c32_103 = arith.constant 32 : index
    %c128_104 = arith.constant 128 : index
    %410 = vector.load %arg5[%c32_103, %c128_104] : memref<128x256xbf16, #tpu.memory_space<vmem>>, vector<16x128xbf16>
    tpu.vector_store %arg5[%c32_103, %c128_104], %409 {strides = array<i32>} : memref<128x256xbf16, #tpu.memory_space<vmem>>, vector<16x128xbf16>,
    %c96_105 = arith.constant 96 : index
    %c0_106 = arith.constant 0 : index
    %411 = vector.load %arg7[%c96_105, %c0_106] : memref<128x768xf32, #tpu.memory_space<vmem>>, vector<16x384xf32>
    %412 = arith.truncf %375 : vector<16x128xf32> to vector<16x128xbf16>
    %cst_107 = arith.constant dense<0.000000e+00> : vector<16x384xf32>
    %413 = tpu.matmul %412, %8, %cst_107 {dimension_numbers = #tpu.dot_dimension_numbers<[1], [0], [0], [1], [0, 0, 1, 1], [], []>} : vector<16x128xbf16>, vector<128x384xbf16>, vector<16x384xf32> -> vector<16x384xf32>
    %414 = vector.extract_strided_slice %411 {offsets = [0, 0], sizes = [16, 128], strides = [1, 1]} : vector<16x384xf32> to vector<16x128xf32>
    %415 = vector.extract_strided_slice %413 {offsets = [0, 0], sizes = [16, 128], strides = [1, 1]} : vector<16x384xf32> to vector<16x128xf32>
    %416 = arith.addf %414, %415 : vector<16x128xf32>
    %417 = arith.negf %416 : vector<16x128xf32>
    %418 = math.exp %417 : vector<16x128xf32>
    %cst_108 = arith.constant 1.000000e+00 : f32
    %419 = vector.broadcast %cst_108 : f32 to vector<16x128xf32>
    %420 = arith.addf %419, %418 : vector<16x128xf32>
    %421 = arith.divf %419, %420 : vector<16x128xf32>
    %422 = vector.extract_strided_slice %411 {offsets = [0, 128], sizes = [16, 128], strides = [1, 1]} : vector<16x384xf32> to vector<16x128xf32>
    %423 = vector.extract_strided_slice %413 {offsets = [0, 128], sizes = [16, 128], strides = [1, 1]} : vector<16x384xf32> to vector<16x128xf32>
    %424 = arith.addf %422, %423 : vector<16x128xf32>
    %425 = arith.negf %424 : vector<16x128xf32>
    %426 = math.exp %425 : vector<16x128xf32>
    %cst_109 = arith.constant 1.000000e+00 : f32
    %427 = vector.broadcast %cst_109 : f32 to vector<16x128xf32>
    %428 = arith.addf %427, %426 : vector<16x128xf32>
    %429 = arith.divf %427, %428 : vector<16x128xf32>
    %430 = vector.extract_strided_slice %411 {offsets = [0, 256], sizes = [16, 128], strides = [1, 1]} : vector<16x384xf32> to vector<16x128xf32>
    %431 = vector.extract_strided_slice %413 {offsets = [0, 256], sizes = [16, 128], strides = [1, 1]} : vector<16x384xf32> to vector<16x128xf32>
    %432 = vector.broadcast %11 : vector<1x128xf32> to vector<16x128xf32>
    %433 = arith.addf %431, %432 : vector<16x128xf32>
    %434 = arith.mulf %421, %433 : vector<16x128xf32>
    %435 = arith.addf %430, %434 : vector<16x128xf32>
    %436 = math.tanh %435 : vector<16x128xf32>
    %cst_110 = arith.constant 1.000000e+00 : f32
    %437 = vector.broadcast %cst_110 : f32 to vector<16x128xf32>
    %438 = arith.subf %437, %429 : vector<16x128xf32>
    %439 = arith.mulf %438, %436 : vector<16x128xf32>
    %440 = arith.mulf %429, %375 : vector<16x128xf32>
    %441 = arith.addf %439, %440 : vector<16x128xf32>
    %442 = arith.truncf %441 : vector<16x128xf32> to vector<16x128xbf16>
    %c96_111 = arith.constant 96 : index
    %c0_112 = arith.constant 0 : index
    %443 = vector.load %arg5[%c96_111, %c0_112] : memref<128x256xbf16, #tpu.memory_space<vmem>>, vector<16x128xbf16>
    tpu.vector_store %arg5[%c96_111, %c0_112], %442 {strides = array<i32>} : memref<128x256xbf16, #tpu.memory_space<vmem>>, vector<16x128xbf16>,
    %c16_113 = arith.constant 16 : index
    %c384_114 = arith.constant 384 : index
    %444 = vector.load %arg7[%c16_113, %c384_114] : memref<128x768xf32, #tpu.memory_space<vmem>>, vector<16x384xf32>
    %445 = arith.truncf %408 : vector<16x128xf32> to vector<16x128xbf16>
    %cst_115 = arith.constant dense<0.000000e+00> : vector<16x384xf32>
    %446 = tpu.matmul %445, %10, %cst_115 {dimension_numbers = #tpu.dot_dimension_numbers<[1], [0], [0], [1], [0, 0, 1, 1], [], []>} : vector<16x128xbf16>, vector<128x384xbf16>, vector<16x384xf32> -> vector<16x384xf32>
    %447 = vector.extract_strided_slice %444 {offsets = [0, 0], sizes = [16, 128], strides = [1, 1]} : vector<16x384xf32> to vector<16x128xf32>
    %448 = vector.extract_strided_slice %446 {offsets = [0, 0], sizes = [16, 128], strides = [1, 1]} : vector<16x384xf32> to vector<16x128xf32>
    %449 = arith.addf %447, %448 : vector<16x128xf32>
    %450 = arith.negf %449 : vector<16x128xf32>
    %451 = math.exp %450 : vector<16x128xf32>
    %cst_116 = arith.constant 1.000000e+00 : f32
    %452 = vector.broadcast %cst_116 : f32 to vector<16x128xf32>
    %453 = arith.addf %452, %451 : vector<16x128xf32>
    %454 = arith.divf %452, %453 : vector<16x128xf32>
    %455 = vector.extract_strided_slice %444 {offsets = [0, 128], sizes = [16, 128], strides = [1, 1]} : vector<16x384xf32> to vector<16x128xf32>
    %456 = vector.extract_strided_slice %446 {offsets = [0, 128], sizes = [16, 128], strides = [1, 1]} : vector<16x384xf32> to vector<16x128xf32>
    %457 = arith.addf %455, %456 : vector<16x128xf32>
    %458 = arith.negf %457 : vector<16x128xf32>
    %459 = math.exp %458 : vector<16x128xf32>
    %cst_117 = arith.constant 1.000000e+00 : f32
    %460 = vector.broadcast %cst_117 : f32 to vector<16x128xf32>
    %461 = arith.addf %460, %459 : vector<16x128xf32>
    %462 = arith.divf %460, %461 : vector<16x128xf32>
    %463 = vector.extract_strided_slice %444 {offsets = [0, 256], sizes = [16, 128], strides = [1, 1]} : vector<16x384xf32> to vector<16x128xf32>
    %464 = vector.extract_strided_slice %446 {offsets = [0, 256], sizes = [16, 128], strides = [1, 1]} : vector<16x384xf32> to vector<16x128xf32>
    %465 = vector.broadcast %12 : vector<1x128xf32> to vector<16x128xf32>
    %466 = arith.addf %464, %465 : vector<16x128xf32>
    %467 = arith.mulf %454, %466 : vector<16x128xf32>
    %468 = arith.addf %463, %467 : vector<16x128xf32>
    %469 = math.tanh %468 : vector<16x128xf32>
    %cst_118 = arith.constant 1.000000e+00 : f32
    %470 = vector.broadcast %cst_118 : f32 to vector<16x128xf32>
    %471 = arith.subf %470, %462 : vector<16x128xf32>
    %472 = arith.mulf %471, %469 : vector<16x128xf32>
    %473 = arith.mulf %462, %408 : vector<16x128xf32>
    %474 = arith.addf %472, %473 : vector<16x128xf32>
    %475 = arith.truncf %474 : vector<16x128xf32> to vector<16x128xbf16>
    %c16_119 = arith.constant 16 : index
    %c128_120 = arith.constant 128 : index
    %476 = vector.load %arg5[%c16_119, %c128_120] : memref<128x256xbf16, #tpu.memory_space<vmem>>, vector<16x128xbf16>
    tpu.vector_store %arg5[%c16_119, %c128_120], %475 {strides = array<i32>} : memref<128x256xbf16, #tpu.memory_space<vmem>>, vector<16x128xbf16>,
    %c112_121 = arith.constant 112 : index
    %c0_122 = arith.constant 0 : index
    %477 = vector.load %arg7[%c112_121, %c0_122] : memref<128x768xf32, #tpu.memory_space<vmem>>, vector<16x384xf32>
    %478 = arith.truncf %441 : vector<16x128xf32> to vector<16x128xbf16>
    %cst_123 = arith.constant dense<0.000000e+00> : vector<16x384xf32>
    %479 = tpu.matmul %478, %8, %cst_123 {dimension_numbers = #tpu.dot_dimension_numbers<[1], [0], [0], [1], [0, 0, 1, 1], [], []>} : vector<16x128xbf16>, vector<128x384xbf16>, vector<16x384xf32> -> vector<16x384xf32>
    %480 = vector.extract_strided_slice %477 {offsets = [0, 0], sizes = [16, 128], strides = [1, 1]} : vector<16x384xf32> to vector<16x128xf32>
    %481 = vector.extract_strided_slice %479 {offsets = [0, 0], sizes = [16, 128], strides = [1, 1]} : vector<16x384xf32> to vector<16x128xf32>
    %482 = arith.addf %480, %481 : vector<16x128xf32>
    %483 = arith.negf %482 : vector<16x128xf32>
    %484 = math.exp %483 : vector<16x128xf32>
    %cst_124 = arith.constant 1.000000e+00 : f32
    %485 = vector.broadcast %cst_124 : f32 to vector<16x128xf32>
    %486 = arith.addf %485, %484 : vector<16x128xf32>
    %487 = arith.divf %485, %486 : vector<16x128xf32>
    %488 = vector.extract_strided_slice %477 {offsets = [0, 128], sizes = [16, 128], strides = [1, 1]} : vector<16x384xf32> to vector<16x128xf32>
    %489 = vector.extract_strided_slice %479 {offsets = [0, 128], sizes = [16, 128], strides = [1, 1]} : vector<16x384xf32> to vector<16x128xf32>
    %490 = arith.addf %488, %489 : vector<16x128xf32>
    %491 = arith.negf %490 : vector<16x128xf32>
    %492 = math.exp %491 : vector<16x128xf32>
    %cst_125 = arith.constant 1.000000e+00 : f32
    %493 = vector.broadcast %cst_125 : f32 to vector<16x128xf32>
    %494 = arith.addf %493, %492 : vector<16x128xf32>
    %495 = arith.divf %493, %494 : vector<16x128xf32>
    %496 = vector.extract_strided_slice %477 {offsets = [0, 256], sizes = [16, 128], strides = [1, 1]} : vector<16x384xf32> to vector<16x128xf32>
    %497 = vector.extract_strided_slice %479 {offsets = [0, 256], sizes = [16, 128], strides = [1, 1]} : vector<16x384xf32> to vector<16x128xf32>
    %498 = vector.broadcast %11 : vector<1x128xf32> to vector<16x128xf32>
    %499 = arith.addf %497, %498 : vector<16x128xf32>
    %500 = arith.mulf %487, %499 : vector<16x128xf32>
    %501 = arith.addf %496, %500 : vector<16x128xf32>
    %502 = math.tanh %501 : vector<16x128xf32>
    %cst_126 = arith.constant 1.000000e+00 : f32
    %503 = vector.broadcast %cst_126 : f32 to vector<16x128xf32>
    %504 = arith.subf %503, %495 : vector<16x128xf32>
    %505 = arith.mulf %504, %502 : vector<16x128xf32>
    %506 = arith.mulf %495, %441 : vector<16x128xf32>
    %507 = arith.addf %505, %506 : vector<16x128xf32>
    %508 = arith.truncf %507 : vector<16x128xf32> to vector<16x128xbf16>
    %c112_127 = arith.constant 112 : index
    %c0_128 = arith.constant 0 : index
    %509 = vector.load %arg5[%c112_127, %c0_128] : memref<128x256xbf16, #tpu.memory_space<vmem>>, vector<16x128xbf16>
    tpu.vector_store %arg5[%c112_127, %c0_128], %508 {strides = array<i32>} : memref<128x256xbf16, #tpu.memory_space<vmem>>, vector<16x128xbf16>,
    %c0_129 = arith.constant 0 : index
    %c384_130 = arith.constant 384 : index
    %510 = vector.load %arg7[%c0_129, %c384_130] : memref<128x768xf32, #tpu.memory_space<vmem>>, vector<16x384xf32>
    %511 = arith.truncf %474 : vector<16x128xf32> to vector<16x128xbf16>
    %cst_131 = arith.constant dense<0.000000e+00> : vector<16x384xf32>
    %512 = tpu.matmul %511, %10, %cst_131 {dimension_numbers = #tpu.dot_dimension_numbers<[1], [0], [0], [1], [0, 0, 1, 1], [], []>} : vector<16x128xbf16>, vector<128x384xbf16>, vector<16x384xf32> -> vector<16x384xf32>
    %513 = vector.extract_strided_slice %510 {offsets = [0, 0], sizes = [16, 128], strides = [1, 1]} : vector<16x384xf32> to vector<16x128xf32>
    %514 = vector.extract_strided_slice %512 {offsets = [0, 0], sizes = [16, 128], strides = [1, 1]} : vector<16x384xf32> to vector<16x128xf32>
    %515 = arith.addf %513, %514 : vector<16x128xf32>
    %516 = arith.negf %515 : vector<16x128xf32>
    %517 = math.exp %516 : vector<16x128xf32>
    %cst_132 = arith.constant 1.000000e+00 : f32
    %518 = vector.broadcast %cst_132 : f32 to vector<16x128xf32>
    %519 = arith.addf %518, %517 : vector<16x128xf32>
    %520 = arith.divf %518, %519 : vector<16x128xf32>
    %521 = vector.extract_strided_slice %510 {offsets = [0, 128], sizes = [16, 128], strides = [1, 1]} : vector<16x384xf32> to vector<16x128xf32>
    %522 = vector.extract_strided_slice %512 {offsets = [0, 128], sizes = [16, 128], strides = [1, 1]} : vector<16x384xf32> to vector<16x128xf32>
    %523 = arith.addf %521, %522 : vector<16x128xf32>
    %524 = arith.negf %523 : vector<16x128xf32>
    %525 = math.exp %524 : vector<16x128xf32>
    %cst_133 = arith.constant 1.000000e+00 : f32
    %526 = vector.broadcast %cst_133 : f32 to vector<16x128xf32>
    %527 = arith.addf %526, %525 : vector<16x128xf32>
    %528 = arith.divf %526, %527 : vector<16x128xf32>
    %529 = vector.extract_strided_slice %510 {offsets = [0, 256], sizes = [16, 128], strides = [1, 1]} : vector<16x384xf32> to vector<16x128xf32>
    %530 = vector.extract_strided_slice %512 {offsets = [0, 256], sizes = [16, 128], strides = [1, 1]} : vector<16x384xf32> to vector<16x128xf32>
    %531 = vector.broadcast %12 : vector<1x128xf32> to vector<16x128xf32>
    %532 = arith.addf %530, %531 : vector<16x128xf32>
    %533 = arith.mulf %520, %532 : vector<16x128xf32>
    %534 = arith.addf %529, %533 : vector<16x128xf32>
    %535 = math.tanh %534 : vector<16x128xf32>
    %cst_134 = arith.constant 1.000000e+00 : f32
    %536 = vector.broadcast %cst_134 : f32 to vector<16x128xf32>
    %537 = arith.subf %536, %528 : vector<16x128xf32>
    %538 = arith.mulf %537, %535 : vector<16x128xf32>
    %539 = arith.mulf %528, %474 : vector<16x128xf32>
    %540 = arith.addf %538, %539 : vector<16x128xf32>
    %541 = arith.truncf %540 : vector<16x128xf32> to vector<16x128xbf16>
    %c0_135 = arith.constant 0 : index
    %c128_136 = arith.constant 128 : index
    %542 = vector.load %arg5[%c0_135, %c128_136] : memref<128x256xbf16, #tpu.memory_space<vmem>>, vector<16x128xbf16>
    tpu.vector_store %arg5[%c0_135, %c128_136], %541 {strides = array<i32>} : memref<128x256xbf16, #tpu.memory_space<vmem>>, vector<16x128xbf16>,
    %c0_137 = arith.constant 0 : index
    %c0_138 = arith.constant 0 : index
    %543 = vector.load %arg6[%c0_137, %c0_138] : memref<16x256xf32, #tpu.memory_space<vmem>>, vector<16x128xf32>
    tpu.vector_store %arg6[%c0_137, %c0_138], %507 {strides = array<i32>} : memref<16x256xf32, #tpu.memory_space<vmem>>, vector<16x128xf32>,
    %c0_139 = arith.constant 0 : index
    %c128_140 = arith.constant 128 : index
    %544 = vector.load %arg6[%c0_139, %c128_140] : memref<16x256xf32, #tpu.memory_space<vmem>>, vector<16x128xf32>
    tpu.vector_store %arg6[%c0_139, %c128_140], %540 {strides = array<i32>} : memref<16x256xf32, #tpu.memory_space<vmem>>, vector<16x128xf32>,
    return
  }
}

</mosaic_0001>

<bundles_post_ra>
// kernel: tpu_custom_call.1
= control target key start
LH: loop header
LB: loop body
LE: loop exit
PB: predicated region body
PF: predicated region fallthrough
CT: control target
= control target key end

     0   :  { %12 = vsyncpa [#allocation4], 0  ;;  %s6628_s0 = inlined_call_operand.hbm [shape: bf16[128,128], index: 0, kind: input, shape index: {}]   ;;  %s6629_s1 = inlined_call_operand.hbm [shape: bf16[128,768], index: 1, kind: input, shape index: {}]   ;;  %s6630_s2 = inlined_call_operand.hbm [shape: bf16[2,128,384], index: 2, kind: input, shape index: {}]   ;;  %s6631_s3 = inlined_call_operand.hbm [shape: f32[1,768], index: 3, kind: input, shape index: {}]   ;;  %s6632_s4 = inlined_call_operand.vmem [shape: f32[1,256], index: 4, kind: input, shape index: {}]   ;;  %s6633_s5 = inlined_call_operand.hbm [shape: bf16[128,256], index: 5, kind: output, shape index: {0}]   ;;  %s6634_s6 = inlined_call_operand.hbm [shape: f32[16,256], index: 6, kind: output, shape index: {1}]  }
   0x1   :  { %13 = vsyncpa [#allocation7], 0 }
   0x2   :  { %14 = vsyncpa [#allocation10], 0 }
   0x3   :  { %15 = vsyncpa [#allocation5], 0 }
   0x4   :  { %16 = vsyncpa [#allocation13], 0  ;;  %s4986_s21 = smov [#allocation6]  }
   0x5   :  { %s34_s22 = sshll.u32 %s4986_s21, 4  ;;  %s35_s22 = int_to_ptr.vmem [resolvable:$true] %s34_s22 }
   0x6   :  { %s4864_s23 = scalar_lea.vmem %s35_s22, 6144  ;;  %p4869_p1 = scmp.lt.s32.totalorder %s35_s22, %s35_s22 }
   0x7   :  { %p4865_p0 = scmp.ne.s32.totalorder %s35_s22, %s4864_s23  ;;  %p4870_p2 = scmp.lt.s32.totalorder %s4864_s23, %s4864_s23 }
   0x9   :  { %p4871_p3 = por %p4870_p2, %p4869_p1 }
   0xb   :  { %p4872_p4 = pnand %p4871_p3, %p4865_p0 }
   0xd   :  { %4875 = shalt.err (!%p4872_p4)
}
   0xe   :  { %s4987_s24 = smov 384   ;;  %s4988_s25 = smov 24  }
   0xf   :  { %40 = dma.hbm_to_vmem [thread:$0]  %s6629_s1, 6144, %s35_s22, [#allocation7], %s4987_s24, %s4987_s24, %s4988_s25  }
  0x10   :  { %s4989_s28 = smov [#allocation3]  }
  0x11   :  { %s22_s29 = sshll.u32 %s4989_s28, 4  ;;  %s23_s29 = int_to_ptr.vmem [resolvable:$true] %s22_s29 }
  0x12   :  { %s4884_s30 = scalar_lea.vmem %s23_s29, 1024  ;;  %p4889_p6 = scmp.lt.s32.totalorder %s23_s29, %s23_s29 }
  0x13   :  { %p4885_p5 = scmp.ne.s32.totalorder %s23_s29, %s4884_s30  ;;  %p4890_p7 = scmp.lt.s32.totalorder %s4884_s30, %s4884_s30 }
  0x15   :  { %p4891_p8 = por %p4890_p7, %p4889_p6 }
  0x17   :  { %p4892_p9 = pnand %p4891_p8, %p4885_p5 }
  0x19   :  { %4895 = shalt.err (!%p4892_p9)
}
  0x1a   :  { %s4990_s7 = smov 64   ;;  %s4991_s8 = smov 4  }
  0x1b   :  { %28 = dma.hbm_to_vmem [thread:$0]  %s6628_s0, 1024, %s23_s29, [#allocation4], %s4990_s7, %s4990_s7, %s4991_s8  }
  0x1c   :  { %s4992_s11 = smov [#allocation8]  }
  0x1d   :  { %s46_s12 = sshll.u32 %s4992_s11, 4  ;;  %s47_s12 = int_to_ptr.vmem [resolvable:$true] %s46_s12 }
  0x1e   :  { %s4904_s1 = scalar_lea.vmem %s47_s12, 6144  ;;  %p4909_p11 = scmp.lt.s32.totalorder %s47_s12, %s47_s12 }
  0x1f   :  { %p4905_p10 = scmp.ne.s32.totalorder %s47_s12, %s4904_s1  ;;  %p4910_p12 = scmp.lt.s32.totalorder %s4904_s1, %s4904_s1 }
  0x21   :  { %p4911_p13 = por %p4910_p12, %p4909_p11 }
  0x23   :  { %p4912_p0 = pnand %p4911_p13, %p4905_p10 }
  0x25   :  { %4915 = shalt.err (!%p4912_p0)
}
  0x26   :  { %s4993_s13 = smov 192   ;;  %s4994_s14 = smov 12  }
  0x27   :  { %52 = dma.hbm_to_vmem [thread:$0]  %s6630_s2, 6144, %s47_s12, [#allocation7], %s4993_s13, %s4993_s13, %s4994_s14  }
  0x28   :  { %s4995_s17 = smov [#allocation9]  }
  0x29   :  { %s59_s18 = sshll.u32 %s4995_s17, 4  ;;  %s60_s18 = int_to_ptr.vmem [resolvable:$true] %s59_s18 }
  0x2a   :  { %s4924_s0 = scalar_lea.vmem %s60_s18, 96  ;;  %p4929_p2 = scmp.lt.s32.totalorder %s60_s18, %s60_s18 }
  0x2b   :  { %p4925_p1 = scmp.ne.s32.totalorder %s60_s18, %s4924_s0  ;;  %p4930_p3 = scmp.lt.s32.totalorder %s4924_s0, %s4924_s0 }
  0x2d   :  { %p4931_p4 = por %p4930_p3, %p4929_p2 }
  0x2f   :  { %p4932_p5 = pnand %p4931_p4, %p4925_p1 }
  0x31   :  { %4935 = shalt.err (!%p4932_p5)
}
  0x32   :  { %62 = dma.hbm_to_vmem [thread:$0]  %s6631_s3, 96, %s60_s18, [#allocation10]  }
  0x33   :  { %4976 = dma.done.wait [#allocation4], 1024  }
  0x34   :  { %4977 = vsyncadd [#allocation4], 4294966272 }
  0x35   :  { %4978 = dma.done.wait [#allocation7], 12288  }
  0x36   :  { %4979 = vsyncadd [#allocation7], 4294955008 }
  0x37   :  { %4980 = dma.done.wait [#allocation10], 96  }
  0x38   :  { %4981 = vsyncadd [#allocation10], 4294967200  ;;  %v6635_v0 = vmov 0   ;;  %v4292_v1 = vld [vmem:[#allocation6 + $0x154] ss:$24 sps:$4 sm:$0xff]   ;;  %v5054_v34 = vld [vmem:[#allocation3] sm:$0xff]  }
  0x39   :  { %494 = vmatprep.mubr.bf16.mxu0 %v6635_v0  ;;  %607 = vmatprep.mubr.bf16.mxu1 %v6635_v0  ;;  %v4294_v2 = vld [vmem:[#allocation6 + $0x15c] ss:$24 sps:$4 sm:$0xff]   ;;  %v4296_v3 = vld [vmem:[#allocation6 + $0x150] ss:$24 sps:$4 sm:$0xff]   ;;  %v4300_v6 = vld [vmem:[#allocation6 + $0x12c] ss:$24 sps:$4 sm:$0xff]  }
  0x3a   :  { %462 = vmatprep.subr.bf16.mxu0 %v4292_v1  ;;  %v4297_v4 = vld [vmem:[#allocation6 + $0x158] ss:$24 sps:$4 sm:$0xff]   ;;  %575 = vmatprep.subr.bf16.mxu1 %v4294_v2  ;;  %v4298_v5 = vld [vmem:[#allocation6 + $0x124] ss:$24 sps:$4 sm:$0xff]   ;;  %v4303_v8 = vld [vmem:[#allocation6 + $0x128] ss:$24 sps:$4 sm:$0xff]  }
  0x3b   :  { %463 = vmatpush1.bf16.msra.mxu0 %v4296_v3  ;;  %576 = vmatpush1.bf16.msra.mxu1 %v4297_v4  ;;  %v4302_v7 = vld [vmem:[#allocation6 + $0x120] ss:$24 sps:$4 sm:$0xff]   ;;  %v4304_v9 = vld [vmem:[#allocation6 + $0xf4] ss:$24 sps:$4 sm:$0xff]   ;;  %v4308_v11 = vld [vmem:[#allocation6 + $0xf0] ss:$24 sps:$4 sm:$0xff]  }
  0x3c   :  { %464 = vmatprep.subr.bf16.mxu0 %v4298_v5  ;;  %577 = vmatprep.subr.bf16.mxu1 %v4300_v6  ;;  %v4306_v10 = vld [vmem:[#allocation6 + $0xfc] ss:$24 sps:$4 sm:$0xff]   ;;  %v4309_v12 = vld [vmem:[#allocation6 + $0xf8] ss:$24 sps:$4 sm:$0xff]   ;;  %v4312_v14 = vld [vmem:[#allocation6 + $0xcc] ss:$24 sps:$4 sm:$0xff]  }
  0x3d   :  { %v4310_v13 = vld [vmem:[#allocation6 + $0xc4] ss:$24 sps:$4 sm:$0xff]   ;;  %v4314_v15 = vld [vmem:[#allocation6 + $0xc0] ss:$24 sps:$4 sm:$0xff]   ;;  %v4316_v17 = vld [vmem:[#allocation6 + $0x94] ss:$24 sps:$4 sm:$0xff]  }
  0x3e   :  { %v4315_v16 = vld [vmem:[#allocation6 + $0xc8] ss:$24 sps:$4 sm:$0xff]   ;;  %v4318_v18 = vld [vmem:[#allocation6 + $0x9c] ss:$24 sps:$4 sm:$0xff]   ;;  %v4321_v20 = vld [vmem:[#allocation6 + $0x98] ss:$24 sps:$4 sm:$0xff]  }
  0x3f   :  { %465 = vmatpush1.bf16.msra.mxu0 %v4302_v7  ;;  %578 = vmatpush1.bf16.msra.mxu1 %v4303_v8  ;;  %v4320_v19 = vld [vmem:[#allocation6 + $0x90] ss:$24 sps:$4 sm:$0xff]   ;;  %v4322_v21 = vld [vmem:[#allocation6 + $0x64] ss:$24 sps:$4 sm:$0xff]   ;;  %v4326_v23 = vld [vmem:[#allocation6 + $0x60] ss:$24 sps:$4 sm:$0xff]  }
  0x40   :  { %466 = vmatprep.subr.bf16.mxu0 %v4304_v9  ;;  %579 = vmatprep.subr.bf16.mxu1 %v4306_v10  ;;  %v4324_v22 = vld [vmem:[#allocation6 + $0x6c] ss:$24 sps:$4 sm:$0xff]   ;;  %v4327_v24 = vld [vmem:[#allocation6 + $0x68] ss:$24 sps:$4 sm:$0xff]   ;;  %v4330_v26 = vld [vmem:[#allocation6 + $0x3c] ss:$24 sps:$4 sm:$0xff]  }
  0x41   :  { %v4328_v25 = vld [vmem:[#allocation6 + $0x34] ss:$24 sps:$4 sm:$0xff]   ;;  %v4332_v27 = vld [vmem:[#allocation6 + $0x30] ss:$24 sps:$4 sm:$0xff]   ;;  %v4334_v29 = vld [vmem:[#allocation6 + $0x4] ss:$24 sps:$4 sm:$0xff]  }
  0x42   :  { %v4333_v28 = vld [vmem:[#allocation6 + $0x38] ss:$24 sps:$4 sm:$0xff]   ;;  %v4336_v30 = vld [vmem:[#allocation6 + $0xc] ss:$24 sps:$4 sm:$0xff]   ;;  %v4339_v32 = vld [vmem:[#allocation6 + $0x8] ss:$24 sps:$4 sm:$0xff]  }
  0x43   :  { %467 = vmatpush1.bf16.msra.mxu0 %v4308_v11  ;;  %580 = vmatpush1.bf16.msra.mxu1 %v4309_v12  ;;  %v4338_v31 = vld [vmem:[#allocation6] ss:$24 sps:$4 sm:$0xff]   ;;  %v4343_v33 = vld [vmem:[#allocation6 + $0x164] ss:$24 sps:$4 sm:$0xff]   ;;  %v4347_v36 = vld [vmem:[#allocation6 + $0x134] ss:$24 sps:$4 sm:$0xff]  }
  0x44   :  { %468 = vmatprep.subr.bf16.mxu0 %v4310_v13  ;;  %581 = vmatprep.subr.bf16.mxu1 %v4312_v14  ;;  %v4341_v35 = vld [vmem:[#allocation6 + $0x160] ss:$24 sps:$4 sm:$0xff]   ;;  %v4345_v38 = vld [vmem:[#allocation6 + $0x130] ss:$24 sps:$4 sm:$0xff]   ;;  %v4351_v41 = vld [vmem:[#allocation6 + $0x104] ss:$24 sps:$4 sm:$0xff]  }
  0x45   :  { %v5056_v37 = vld [vmem:[#allocation8 + $0xac] ss:$12 sps:$4 sm:$0xff]   ;;  %v5060_v39 = vld [vmem:[#allocation8 + $0xa8] ss:$12 sps:$4 sm:$0xff]   ;;  %v5071_v44 = vld [vmem:[#allocation8 + $0x90] ss:$12 sps:$4 sm:$0xff]  }
  0x46   :  { %v5063_v40 = vld [vmem:[#allocation8 + $0x94] ss:$12 sps:$4 sm:$0xff]   ;;  %v5067_v42 = vld [vmem:[#allocation3 + $0x8] sm:$0xff]   ;;  %v4359_v48 = vld [vmem:[#allocation6 + $0xa4] ss:$24 sps:$4 sm:$0xff]   ;;  %v6637_v8 = vmov 0.0  }
  0x47   :  { %469 = vmatpush1.bf16.msra.mxu0 %v4314_v15  ;;  %582 = vmatpush1.bf16.msra.mxu1 %v4315_v16  ;;  %v4349_v43 = vld [vmem:[#allocation6 + $0x100] ss:$24 sps:$4 sm:$0xff]   ;;  %v4355_v45 = vld [vmem:[#allocation6 + $0xd4] ss:$24 sps:$4 sm:$0xff]   ;;  %v5073_v46 = vld [vmem:[#allocation8 + $0x7c] ss:$12 sps:$4 sm:$0xff]  }
  0x48   :  { %470 = vmatprep.subr.bf16.mxu0 %v4316_v17  ;;  %583 = vmatprep.subr.bf16.mxu1 %v4318_v18  ;;  %v4353_v47 = vld [vmem:[#allocation6 + $0xd0] ss:$24 sps:$4 sm:$0xff]   ;;  %v5080_v49 = vld [vmem:[#allocation8 + $0x78] ss:$12 sps:$4 sm:$0xff]   ;;  %v5088_v53 = vld [vmem:[#allocation8 + $0x60] ss:$12 sps:$4 sm:$0xff]  }
  0x49   :  { %v5083_v50 = vld [vmem:[#allocation8 + $0x64] ss:$12 sps:$4 sm:$0xff]   ;;  %v4357_v52 = vld [vmem:[#allocation6 + $0xa0] ss:$24 sps:$4 sm:$0xff]   ;;  %v4369_v54 = vld [vmem:[#allocation6 + $0x74] ss:$24 sps:$4 sm:$0xff]  }
  0x4a   :  { %v5085_v51 = vld [vmem:[#allocation3 + $0x10] sm:$0xff]   ;;  %v5091_v55 = vld [vmem:[#allocation8 + $0x4c] ss:$12 sps:$4 sm:$0xff]   ;;  %v4379_v57 = vld [vmem:[#allocation6 + $0x44] ss:$24 sps:$4 sm:$0xff]   ;;  %vm4998_vm0 = vmmov 0  }
  0x4b   :  { %471 = vmatpush1.bf16.msra.mxu0 %v4320_v19  ;;  %584 = vmatpush1.bf16.msra.mxu1 %v4321_v20  ;;  %v4367_v56 = vld [vmem:[#allocation6 + $0x70] ss:$24 sps:$4 sm:$0xff]   ;;  %v5097_v58 = vld [vmem:[#allocation3 + $0x18] sm:$0xff]   ;;  %v5103_v60 = vld [vmem:[#allocation8 + $0x34] ss:$12 sps:$4 sm:$0xff]   ;;  %s5000_s8 = smov [#allocation11]  }
  0x4c   :  { %472 = vmatprep.subr.bf16.mxu0 %v4322_v21  ;;  %585 = vmatprep.subr.bf16.mxu1 %v4324_v22  ;;  %v5100_v59 = vld [vmem:[#allocation8 + $0x48] ss:$12 sps:$4 sm:$0xff]   ;;  %v4377_v61 = vld [vmem:[#allocation6 + $0x40] ss:$24 sps:$4 sm:$0xff]   ;;  %v5105_v62 = vld [vmem:[#allocation8 + $0x30] ss:$12 sps:$4 sm:$0xff]  }
  0x4d   :  { %v4389_v63 = vld [vmem:[#allocation6 + $0x14] ss:$24 sps:$4 sm:$0xff]   ;;  %v5109_v1 = vld [vmem:[#allocation8 + $0x1c] ss:$12 sps:$4 sm:$0xff]   ;;  %v5116_v3 = vld [vmem:[#allocation8 + $0x18] ss:$12 sps:$4 sm:$0xff]  }
  0x4e   :  { %v4387_v2 = vld [vmem:[#allocation6 + $0x10] ss:$24 sps:$4 sm:$0xff]   ;;  %v5121_v5 = vld [vmem:[#allocation8 + $0x16c] ss:$12 sps:$4 sm:$0xff]   ;;  %v5123_v6 = vld [vmem:[#allocation3 + $0x20] sm:$0xff]   ;;  %s3545_s9 = sshll.u32 %s5000_s8, 4  ;;  %s3546_s9 = int_to_ptr.vmem [resolvable:$true] %s3545_s9 }
  0x4f   :  { %473 = vmatpush1.bf16.msra.mxu0 %v4326_v23  ;;  %586 = vmatpush1.bf16.msra.mxu1 %v4327_v24  ;;  %v5119_v4 = vld [vmem:[#allocation8 + $0x4] ss:$12 sps:$4 sm:$0xff]   ;;  %v5126_v7 = vld [vmem:[#allocation8] ss:$12 sps:$4 sm:$0xff]   ;;  %v5148_v11 = vld [vmem:[#allocation3 + $0x38] sm:$0xff]  }
  0x50   :  { %474 = vmatprep.subr.bf16.mxu0 %v4328_v25  ;;  %587 = vmatprep.subr.bf16.mxu1 %v4330_v26  ;;  %v5136_v9 = vld [vmem:[#allocation3 + $0x28] sm:$0xff]   ;;  %v5142_v10 = vld [vmem:[#allocation3 + $0x30] sm:$0xff]   ;;  %v5164_v15 = vld [vmem:[#allocation8 + $0x98] ss:$12 sps:$4 sm:$0xff]  }
  0x51   :  { %v5154_v12 = vld [vmem:[#allocation8 + $0xb0] ss:$12 sps:$4 sm:$0xff]   ;;  %v5156_v13 = vld [vmem:[#allocation8 + $0x168] ss:$12 sps:$4 sm:$0xff]   ;;  %v5176_v18 = vld [vmem:[#allocation8 + $0x80] ss:$12 sps:$4 sm:$0xff]  }
  0x52   :  { %v5158_v14 = vld [vmem:[#allocation8 + $0x154] ss:$12 sps:$4 sm:$0xff]   ;;  %v5166_v16 = vld [vmem:[#allocation8 + $0x150] ss:$12 sps:$4 sm:$0xff]   ;;  %v5181_v19 = vld [vmem:[#allocation8 + $0x138] ss:$12 sps:$4 sm:$0xff]  }
  0x53   :  { %475 = vmatpush1.bf16.msra.mxu0 %v4332_v27  ;;  %588 = vmatpush1.bf16.msra.mxu1 %v4333_v28  ;;  %v5170_v17 = vld [vmem:[#allocation8 + $0x13c] ss:$12 sps:$4 sm:$0xff]   ;;  %v5183_v20 = vld [vmem:[#allocation8 + $0x124] ss:$12 sps:$4 sm:$0xff]   ;;  %v5192_v22 = vld [vmem:[#allocation8 + $0x120] ss:$12 sps:$4 sm:$0xff]  }
  0x54   :  { %476 = vmatprep.subr.bf16.mxu0 %v4334_v29  ;;  %589 = vmatprep.subr.bf16.mxu1 %v4336_v30  ;;  %v5187_v21 = vld [vmem:[#allocation8 + $0x68] ss:$12 sps:$4 sm:$0xff]   ;;  %v5195_v23 = vld [vmem:[#allocation8 + $0x10c] ss:$12 sps:$4 sm:$0xff]   ;;  %v5198_v24 = vld [vmem:[#allocation8 + $0x50] ss:$12 sps:$4 sm:$0xff]  }
  0x55   :  { %v5202_v25 = vld [vmem:[#allocation8 + $0x108] ss:$12 sps:$4 sm:$0xff]   ;;  %v5209_v27 = vld [vmem:[#allocation8 + $0x38] ss:$12 sps:$4 sm:$0xff]   ;;  %v5214_v28 = vld [vmem:[#allocation8 + $0xf0] ss:$12 sps:$4 sm:$0xff]  }
  0x56   :  { %v5205_v26 = vld [vmem:[#allocation8 + $0xf4] ss:$12 sps:$4 sm:$0xff]   ;;  %v5217_v29 = vld [vmem:[#allocation8 + $0xdc] ss:$12 sps:$4 sm:$0xff]  }
  0x57   :  { %477 = vmatpush1.bf16.msra.mxu0 %v4338_v31  ;;  %590 = vmatpush1.bf16.msra.mxu1 %v4339_v32  ;;  %v5220_v30 = vld [vmem:[#allocation8 + $0x20] ss:$12 sps:$4 sm:$0xff]   ;;  %v5224_v31 = vld [vmem:[#allocation8 + $0xd8] ss:$12 sps:$4 sm:$0xff]  }
  0x58   :  { %688 = vmatprep.subr.bf16.mxu0 %v4343_v33  ;;  %1098 = vmatprep.subr.bf16.mxu1 %v5056_v37  ;;  %v5227_v32 = vld [vmem:[#allocation8 + $0xc4] ss:$12 sps:$4 sm:$0xff]   ;;  %v5231_v33 = vld [vmem:[#allocation8 + $0x8] ss:$12 sps:$4 sm:$0xff]  }
  0x5a   :  { %495 = vmatmul.mubr.bf16.vlgmr.msra.gmra.mxu0 %v5054_v34  ;;  %608 = vmatmul.mubr.bf16.vlgmr.msra.gmra.mxu1 %v5054_v34 }
  0x5b   :  { %689 = vmatpush1.bf16.msra.mxu0 %v4341_v35  ;;  %504 = vmatprep.mubr.bf16.mxu0 %v6635_v0  ;;  %v5240_v35 = vld [vmem:[#allocation8 + $0x170] ss:$12 sps:$4 sm:$0xff]  }
  0x5c   :  { %617 = vmatprep.mubr.bf16.mxu1 %v6635_v0  ;;  %690 = vmatprep.subr.bf16.mxu0 %v4347_v36  ;;  %v5249_v36 = vld [vmem:[#allocation8 + $0x158] ss:$12 sps:$4 sm:$0xff]  }
  0x5d   :  { %1099 = vmatpush1.bf16.msra.mxu1 %v5060_v39 }
  0x5e   :  { %1100 = vmatprep.subr.bf16.mxu1 %v5063_v40 }
  0x5f   :  { %691 = vmatpush1.bf16.msra.mxu0 %v4345_v38  ;;  %v5255_v38 = vld [vmem:[#allocation8 + $0x140] ss:$12 sps:$4 sm:$0xff]  }
  0x60   :  { %692 = vmatprep.subr.bf16.mxu0 %v4351_v41  ;;  %v5265_v41 = vld [vmem:[#allocation8 + $0x110] ss:$12 sps:$4 sm:$0xff]  }
  0x61   :  { %1101 = vmatpush1.bf16.msra.mxu1 %v5071_v44 }
  0x62   :  { %505 = vmatmul.mubr.bf16.gmra.mxu0 %v5067_v42  ;;  %618 = vmatmul.mubr.bf16.gmra.mxu1 %v5067_v42 }
  0x63   :  { %514 = vmatprep.mubr.bf16.mxu0 %v6635_v0  ;;  %627 = vmatprep.mubr.bf16.mxu1 %v6635_v0 }
  0x64   :  { %693 = vmatpush1.bf16.msra.mxu0 %v4349_v43  ;;  %1102 = vmatprep.subr.bf16.mxu1 %v5073_v46  ;;  %v5275_v43 = vld [vmem:[#allocation8 + $0xe0] ss:$12 sps:$4 sm:$0xff]  }
  0x65   :  { %694 = vmatprep.subr.bf16.mxu0 %v4355_v45  ;;  %1103 = vmatpush1.bf16.msra.mxu1 %v5080_v49  ;;  %v5281_v45 = vld [vmem:[#allocation8 + $0xc8] ss:$12 sps:$4 sm:$0xff]  }
  0x66   :  { %1104 = vmatprep.subr.bf16.mxu1 %v5083_v50 }
  0x68   :  { %695 = vmatpush1.bf16.msra.mxu0 %v4353_v47 }
  0x69   :  { %696 = vmatprep.subr.bf16.mxu0 %v4359_v48  ;;  %1105 = vmatpush1.bf16.msra.mxu1 %v5088_v53 }
  0x6a   :  { %515 = vmatmul.mubr.bf16.gmra.mxu0 %v5085_v51  ;;  %628 = vmatmul.mubr.bf16.gmra.mxu1 %v5085_v51 }
  0x6b   :  { %524 = vmatprep.mubr.bf16.mxu0 %v6635_v0  ;;  %637 = vmatprep.mubr.bf16.mxu1 %v6635_v0 }
  0x6c   :  { %697 = vmatpush1.bf16.msra.mxu0 %v4357_v52  ;;  %1106 = vmatprep.subr.bf16.mxu1 %v5091_v55 }
  0x6d   :  { %698 = vmatprep.subr.bf16.mxu0 %v4369_v54  ;;  %1107 = vmatpush1.bf16.msra.mxu1 %v5100_v59 }
  0x6e   :  { %1108 = vmatprep.subr.bf16.mxu1 %v5103_v60 }
  0x70   :  { %699 = vmatpush1.bf16.msra.mxu0 %v4367_v56 }
  0x71   :  { %700 = vmatprep.subr.bf16.mxu0 %v4379_v57  ;;  %1109 = vmatpush1.bf16.msra.mxu1 %v5105_v62 }
  0x72   :  { %525 = vmatmul.mubr.bf16.gmra.mxu0 %v5097_v58  ;;  %638 = vmatmul.mubr.bf16.gmra.mxu1 %v5097_v58 }
  0x73   :  { %534 = vmatprep.mubr.bf16.mxu0 %v6635_v0  ;;  %647 = vmatprep.mubr.bf16.mxu1 %v6635_v0 }
  0x74   :  { %701 = vmatpush1.bf16.msra.mxu0 %v4377_v61  ;;  %1110 = vmatprep.subr.bf16.mxu1 %v5109_v1 }
  0x75   :  { %702 = vmatprep.subr.bf16.mxu0 %v4389_v63  ;;  %1111 = vmatpush1.bf16.msra.mxu1 %v5116_v3 }
  0x76   :  { %1112 = vmatprep.subr.bf16.mxu1 %v5119_v4 }
  0x78   :  { %703 = vmatpush1.bf16.msra.mxu0 %v4387_v2 }
  0x79   :  { %1376 = vmatprep.subr.bf16.mxu0 %v5121_v5  ;;  %1113 = vmatpush1.bf16.msra.mxu1 %v5126_v7 }
  0x7a   :  { %535 = vmatmul.mubr.bf16.gmra.mxu0 %v5123_v6  ;;  %648 = vmatmul.mubr.bf16.gmra.mxu1 %v5123_v6 }
  0x7b   :  { %544 = vmatprep.mubr.bf16.mxu0 %v6635_v0  ;;  %657 = vmatprep.mubr.bf16.mxu1 %v6635_v0 }
  0x7c   :  { %3953 = vmatprep.subr.bf16.mxu1 %v6637_v8 }
  0x82   :  { %545 = vmatmul.mubr.bf16.gmra.mxu0 %v5136_v9  ;;  %658 = vmatmul.mubr.bf16.gmra.mxu1 %v5136_v9 }
  0x83   :  { %554 = vmatprep.mubr.bf16.mxu0 %v6635_v0  ;;  %667 = vmatprep.mubr.bf16.mxu1 %v6635_v0 }
  0x8a   :  { %555 = vmatmul.mubr.bf16.gmra.mxu0 %v5142_v10  ;;  %668 = vmatmul.mubr.bf16.gmra.mxu1 %v5142_v10 }
  0x8b   :  { %564 = vmatprep.mubr.bf16.mxu0 %v6635_v0  ;;  %677 = vmatprep.mubr.bf16.mxu1 %v6635_v0 }
  0x92   :  { %565 = vmatmul.mubr.bf16.gmra.mxu0 %v5148_v11  ;;  %678 = vmatmul.mubr.bf16.gmra.mxu1 %v5148_v11 }
  0x93   :  { %720 = vmatprep.mubr.bf16.mxu0 %v6635_v0  ;;  %1130 = vmatprep.mubr.bf16.mxu1 %v6635_v0 }
  0x9a   :  { %721 = vmatmul.mubr.bf16.vlgmr.msra.gmra.mxu0 %v5054_v34  ;;  %1131 = vmatmul.mubr.bf16.vlgmr.msra.gmra.mxu1 %v6635_v0  ;;  %v5236_v34 = vld [vmem:[#allocation8 + $0xc0] ss:$12 sps:$4 sm:$0xff]  }
  0x9b   :  { %3954 = vmatpush3.bf16.msra.mxu1 %v5154_v12  ;;  %1377 = vmatpush1.bf16.msra.mxu0 %v5156_v13 }
  0x9c   :  { %3955 = vmatprep.subr.bf16.mxu1 %v6637_v8  ;;  %730 = vmatprep.mubr.bf16.mxu0 %v6635_v0 }
  0x9d   :  { %1378 = vmatprep.subr.bf16.mxu0 %v5158_v14  ;;  %3969 = vmatprep.mubr.msk.bf16.mxu1 %vm4998_vm0, %v6637_v8 }
  0x9f   :  { %3956 = vmatpush3.bf16.msra.mxu1 %v5164_v15  ;;  %1379 = vmatpush1.bf16.msra.mxu0 %v5166_v16 }
  0xa0   :  { %3957 = vmatprep.subr.bf16.mxu1 %v6637_v8  ;;  %1380 = vmatprep.subr.bf16.mxu0 %v5170_v17 }
  0xa2   :  { %731 = vmatmul.mubr.bf16.gmra.mxu0 %v5067_v42  ;;  %v5271_v42 = vld [vmem:[#allocation8 + $0xf8] ss:$12 sps:$4 sm:$0xff]  }
  0xa3   :  { %3958 = vmatpush3.bf16.msra.mxu1 %v5176_v18  ;;  %740 = vmatprep.mubr.bf16.mxu0 %v6635_v0 }
  0xa4   :  { %3959 = vmatprep.subr.bf16.mxu1 %v6637_v8  ;;  %1381 = vmatpush1.bf16.msra.mxu0 %v5181_v19 }
  0xa5   :  { %1382 = vmatprep.subr.bf16.mxu0 %v5183_v20 }
  0xa7   :  { %3960 = vmatpush3.bf16.msra.mxu1 %v5187_v21 }
  0xa8   :  { %3961 = vmatprep.subr.bf16.mxu1 %v6637_v8  ;;  %1383 = vmatpush1.bf16.msra.mxu0 %v5192_v22 }
  0xa9   :  { %1384 = vmatprep.subr.bf16.mxu0 %v5195_v23 }
  0xaa   :  { %741 = vmatmul.mubr.bf16.gmra.mxu0 %v5085_v51 }
  0xab   :  { %3962 = vmatpush3.bf16.msra.mxu1 %v5198_v24  ;;  %750 = vmatprep.mubr.bf16.mxu0 %v6635_v0 }
  0xac   :  { %3963 = vmatprep.subr.bf16.mxu1 %v6637_v8  ;;  %1385 = vmatpush1.bf16.msra.mxu0 %v5202_v25 }
  0xad   :  { %1386 = vmatprep.subr.bf16.mxu0 %v5205_v26 }
  0xaf   :  { %3964 = vmatpush3.bf16.msra.mxu1 %v5209_v27 }
  0xb0   :  { %3965 = vmatprep.subr.bf16.mxu1 %v6637_v8  ;;  %1387 = vmatpush1.bf16.msra.mxu0 %v5214_v28 }
  0xb1   :  { %1388 = vmatprep.subr.bf16.mxu0 %v5217_v29 }
  0xb2   :  { %751 = vmatmul.mubr.bf16.gmra.mxu0 %v5097_v58 }
  0xb3   :  { %3966 = vmatpush3.bf16.msra.mxu1 %v5220_v30  ;;  %760 = vmatprep.mubr.bf16.mxu0 %v6635_v0 }
  0xb4   :  { %3967 = vmatprep.subr.bf16.mxu1 %v6637_v8  ;;  %1389 = vmatpush1.bf16.msra.mxu0 %v5224_v31 }
  0xb5   :  { %1390 = vmatprep.subr.bf16.mxu0 %v5227_v32 }
  0xb7   :  { %3968 = vmatpush3.bf16.msra.mxu1 %v5231_v33 }
  0xb8   :  { %1391 = vmatpush1.bf16.msra.mxu0 %v5236_v34  ;;  %3973 = vmatprep.subr.bf16.mxu1 %v6637_v8 }
  0xb9   :  { %1526 = vmatprep.subr.bf16.mxu0 %v5056_v37  ;;  %v5261_v37 = vld [vmem:[#allocation8 + $0x128] ss:$12 sps:$4 sm:$0xff]  }
  0xba   :  { %761 = vmatmul.mubr.bf16.gmra.mxu0 %v5123_v6  ;;  %3970 = vmatmul.mubr.bf16.vlgmr.msra.gmra.mxu1 %v6635_v0 }
  0xbb   :  { %770 = vmatprep.mubr.bf16.mxu0 %v6635_v0  ;;  %3974 = vmatpush3.bf16.msra.mxu1 %v5240_v35 }
  0xbc   :  { %3975 = vmatprep.subr.bf16.mxu1 %v6637_v8  ;;  %3989 = vmatprep.mubr.msk.bf16.mxu1 %vm4998_vm0, %v6637_v8 }
  0xbf   :  { %3976 = vmatpush3.bf16.msra.mxu1 %v5249_v36 }
  0xc0   :  { %3977 = vmatprep.subr.bf16.mxu1 %v6637_v8 }
  0xc2   :  { %771 = vmatmul.mubr.bf16.gmra.mxu0 %v5136_v9 }
  0xc3   :  { %780 = vmatprep.mubr.bf16.mxu0 %v6635_v0  ;;  %3978 = vmatpush3.bf16.msra.mxu1 %v5255_v38 }
  0xc4   :  { %3979 = vmatprep.subr.bf16.mxu1 %v6637_v8 }
  0xc7   :  { %3980 = vmatpush3.bf16.msra.mxu1 %v5261_v37 }
  0xc8   :  { %3981 = vmatprep.subr.bf16.mxu1 %v6637_v8 }
  0xca   :  { %781 = vmatmul.mubr.bf16.gmra.mxu0 %v5142_v10 }
  0xcb   :  { %790 = vmatprep.mubr.bf16.mxu0 %v6635_v0  ;;  %3982 = vmatpush3.bf16.msra.mxu1 %v5265_v41 }
  0xcc   :  { %3983 = vmatprep.subr.bf16.mxu1 %v6637_v8 }
  0xcf   :  { %3984 = vmatpush3.bf16.msra.mxu1 %v5271_v42 }
  0xd0   :  { %3985 = vmatprep.subr.bf16.mxu1 %v6637_v8 }
  0xd2   :  { %791 = vmatmul.mubr.bf16.gmra.mxu0 %v5148_v11 }
  0xd3   :  { %1408 = vmatprep.mubr.bf16.mxu0 %v6635_v0  ;;  %3986 = vmatpush3.bf16.msra.mxu1 %v5275_v43 }
  0xd4   :  { %3987 = vmatprep.subr.bf16.mxu1 %v6637_v8 }
  0xd7   :  { %3988 = vmatpush3.bf16.msra.mxu1 %v5281_v45 }
  0xd8   :  { %3993 = vmatprep.subr.bf16.mxu1 %v6637_v8 }
  0xda   :  { %1409 = vmatmul.mubr.bf16.vlgmr.msra.gmra.mxu0 %v6635_v0  ;;  %3990 = vmatmul.mubr.bf16.vlgmr.msra.gmra.mxu1 %v6635_v0 }
  0xdb   :  { %1527 = vmatpush1.bf16.msra.mxu0 %v5060_v39  ;;  %3994 = vmatpush3.bf16.msra.mxu1 %v5154_v12  ;;  %v144_v39 = vlaneseq }
  0xdc   :  { %1528 = vmatprep.subr.bf16.mxu0 %v5063_v40  ;;  %3995 = vmatprep.subr.bf16.mxu1 %v6637_v8 }
  0xdd   :  { %1558 = vmatprep.mubr.bf16.mxu0 %v6635_v0  ;;  %4009 = vmatprep.mubr.msk.bf16.mxu1 %vm4998_vm0, %v6637_v8  ;;  %v5323_v40 = vshrl.u32 %v144_v39, 7 }
  0xdf   :  { %1529 = vmatpush1.bf16.msra.mxu0 %v5071_v44  ;;  %3996 = vmatpush3.bf16.msra.mxu1 %v5164_v15  ;;  %v158_v44 = vsub.s32 3, %v5323_v40  ;;  %v146_v52 = vsub.s32 0, %v5323_v40  ;;  %v150_v57 = vsub.s32 1, %v5323_v40 }
  0xe0   :  { %1530 = vmatprep.subr.bf16.mxu0 %v5073_v46  ;;  %3997 = vmatprep.subr.bf16.mxu1 %v6637_v8  ;;  %v5326_v46 = vld [vmem:[#allocation9] sm:$0x3f] }
  0xe1   :  { %v5329_v47 = vrot.slane %v5326_v46, %v158_v44  ;;  %v5359_v2 = vrot.slane %v5326_v46, %v150_v57 }
  0xe3   :  { %1531 = vmatpush1.bf16.msra.mxu0 %v5080_v49  ;;  %3998 = vmatpush3.bf16.msra.mxu1 %v5176_v18 }
  0xe4   :  { %1532 = vmatprep.subr.bf16.mxu0 %v5083_v50  ;;  %3999 = vmatprep.subr.bf16.mxu1 %v6637_v8 }
  0xe7   :  { %1533 = vmatpush1.bf16.msra.mxu0 %v5088_v53  ;;  %4000 = vmatpush3.bf16.msra.mxu1 %v5187_v21  ;;  %v154_v53 = vsub.s32 2, %v5323_v40 }
  0xe8   :  { %1534 = vmatprep.subr.bf16.mxu0 %v5091_v55  ;;  %4001 = vmatprep.subr.bf16.mxu1 %v6637_v8 }
  0xe9   :  { %v5353_v61 = vrot.slane %v5326_v46, %v154_v53 }
  0xeb   :  { %1535 = vmatpush1.bf16.msra.mxu0 %v5100_v59  ;;  %4002 = vmatpush3.bf16.msra.mxu1 %v5198_v24 }
  0xec   :  { %1536 = vmatprep.subr.bf16.mxu0 %v5103_v60  ;;  %4003 = vmatprep.subr.bf16.mxu1 %v6637_v8  ;;  %v5350_v60 = vrot.slane %v5326_v46, %v146_v52 }
  0xef   :  { %1537 = vmatpush1.bf16.msra.mxu0 %v5105_v62  ;;  %4004 = vmatpush3.bf16.msra.mxu1 %v5209_v27 }
  0xf0   :  { %1538 = vmatprep.subr.bf16.mxu0 %v5109_v1  ;;  %4005 = vmatprep.subr.bf16.mxu1 %v6637_v8 }
  0xf3   :  { %1539 = vmatpush1.bf16.msra.mxu0 %v5116_v3  ;;  %4006 = vmatpush3.bf16.msra.mxu1 %v5220_v30 }
  0xf4   :  { %1540 = vmatprep.subr.bf16.mxu0 %v5119_v4  ;;  %4007 = vmatprep.subr.bf16.mxu1 %v6637_v8 }
  0xf7   :  { %1541 = vmatpush1.bf16.msra.mxu0 %v5126_v7  ;;  %4008 = vmatpush3.bf16.msra.mxu1 %v5231_v33 }
  0xf8   :  { %1670 = vmatprep.subr.bf16.mxu0 %v5121_v5  ;;  %4013 = vmatprep.subr.bf16.mxu1 %v6637_v8 }
 0x11a   :  { %v5331_v48 = vpop.f32.mrf.mxu0  ;;  %v5333_v49 = vpop.f32.mrf.mxu1 }
 0x11c   :  { %v5335_v50 = vpop.f32.mrf.mxu0  ;;  %v611_v51 = vpop.f32.mrf.mxu1 }
 0x11d   :  { %v5340_v54 = vadd.f32 %v611_v51, %v5329_v47 }
 0x11e   :  { %v5342_v55 = vpop.f32.mrf.mxu0  ;;  %v5344_v56 = vpop.f32.mrf.mxu1 }
 0x11f   :  { %6672 = vst [vmem:[#allocation19_spill] sm:$0xff] %v5340_v54 }
 0x120   :  { %v5347_v58 = vpop.f32.mrf.mxu0  ;;  %v615_v59 = vpop.f32.mrf.mxu1 }
 0x121   :  { %v5356_v62 = vadd.f32 %v615_v59, %v5329_v47 }
 0x122   :  { %v506_v63 = vpop.f32.mrf.mxu0  ;;  %v619_v1 = vpop.f32.mrf.mxu1 }
 0x123   :  { %6673 = vst [vmem:[#allocation20_spill] sm:$0xff] %v5356_v62  ;;  %v5362_v3 = vadd.f32 %v506_v63, %v5350_v60  ;;  %v5365_v4 = vadd.f32 %v619_v1, %v5353_v61 }
 0x124   :  { %v508_v5 = vpop.f32.mrf.mxu0  ;;  %v621_v6 = vpop.f32.mrf.mxu1 }
 0x125   :  { %v5368_v7 = vadd.f32 %v508_v5, %v5359_v2  ;;  %v5371_v9 = vadd.f32 %v621_v6, %v5329_v47 }
 0x126   :  { %v510_v10 = vpop.f32.mrf.mxu0  ;;  %v623_v11 = vpop.f32.mrf.mxu1 }
 0x127   :  { %6674 = vst [vmem:[#allocation21_spill] sm:$0xff] %v5371_v9  ;;  %v5374_v39 = vadd.f32 %v510_v10, %v5350_v60  ;;  %v5377_v44 = vadd.f32 %v623_v11, %v5353_v61 }
 0x128   :  { %v5379_v51 = vpop.f32.mrf.mxu0  ;;  %v625_v52 = vpop.f32.mrf.mxu1 }
 0x129   :  { %6675 = vst [vmem:[#allocation22_spill] sm:$0xff] %v5377_v44  ;;  %v5382_v53 = vadd.f32 %v625_v52, %v5329_v47 }
 0x12a   :  { %v516_v57 = vpop.f32.mrf.mxu0  ;;  %v629_v59 = vpop.f32.mrf.mxu1 }
 0x12b   :  { %6676 = vst [vmem:[#allocation23_spill] sm:$0xff] %v5382_v53  ;;  %v5385_v63 = vadd.f32 %v516_v57, %v5350_v60  ;;  %v5388_v1 = vadd.f32 %v629_v59, %v5353_v61 }
 0x12c   :  { %v518_v5 = vpop.f32.mrf.mxu0  ;;  %v631_v6 = vpop.f32.mrf.mxu1 }
 0x12d   :  { %6677 = vst [vmem:[#allocation24_spill] sm:$0xff] %v5385_v63  ;;  %6678 = vst [vmem:[#allocation25_spill] sm:$0xff] %v5388_v1  ;;  %v5391_v10 = vadd.f32 %v518_v5, %v5359_v2  ;;  %v5394_v11 = vadd.f32 %v631_v6, %v5329_v47 }
 0x12e   :  { %v520_v0 = vpop.f32.mrf.mxu0  ;;  %v633_v8 = vpop.f32.mrf.mxu1 }
 0x12f   :  { %6679 = vst [vmem:[#allocation26_spill] sm:$0xff] %v5391_v10  ;;  %6680 = vst [vmem:[#allocation27_spill] sm:$0xff] %v5394_v11  ;;  %v5397_v52 = vadd.f32 %v520_v0, %v5350_v60  ;;  %v5400_v62 = vadd.f32 %v633_v8, %v5353_v61 }
 0x130   :  { %v5402_v57 = vpop.f32.mrf.mxu0  ;;  %v635_v59 = vpop.f32.mrf.mxu1 }
 0x131   :  { %6681 = vst [vmem:[#allocation28_spill] sm:$0xff] %v5397_v52  ;;  %6682 = vst [vmem:[#allocation29_spill] sm:$0xff] %v5400_v62  ;;  %v5405_v54 = vadd.f32 %v635_v59, %v5329_v47 }
 0x132   :  { %6683 = vst [vmem:[#allocation30_spill] sm:$0xff] %v5402_v57  ;;  %v526_v53 = vpop.f32.mrf.mxu0  ;;  %v639_v5 = vpop.f32.mrf.mxu1 }
 0x133   :  { %6684 = vst [vmem:[#allocation31_spill] sm:$0xff] %v5405_v54  ;;  %v5408_v9 = vadd.f32 %v526_v53, %v5350_v60  ;;  %v5411_v6 = vadd.f32 %v639_v5, %v5353_v61 }
 0x134   :  { %v528_v11 = vpop.f32.mrf.mxu0  ;;  %v641_v0 = vpop.f32.mrf.mxu1 }
 0x135   :  { %6685 = vst [vmem:[#allocation32_spill] sm:$0xff] %v5408_v9  ;;  %6686 = vst [vmem:[#allocation33_spill] sm:$0xff] %v5411_v6  ;;  %v5414_v1 = vadd.f32 %v528_v11, %v5359_v2  ;;  %v5417_v8 = vadd.f32 %v641_v0, %v5329_v47 }
 0x136   :  { %v530_v62 = vpop.f32.mrf.mxu0  ;;  %v643_v57 = vpop.f32.mrf.mxu1 }
 0x137   :  { %6687 = vst [vmem:[#allocation34_spill] sm:$0xff] %v5414_v1  ;;  %6688 = vst [vmem:[#allocation35_spill] sm:$0xff] %v5417_v8  ;;  %v5420_v59 = vadd.f32 %v530_v62, %v5350_v60  ;;  %v5423_v54 = vadd.f32 %v643_v57, %v5353_v61 }
 0x138   :  { %v532_v53 = vpop.f32.mrf.mxu0  ;;  %v645_v9 = vpop.f32.mrf.mxu1 }
 0x139   :  { %6689 = vst [vmem:[#allocation36_spill] sm:$0xff] %v5420_v59  ;;  %6690 = vst [vmem:[#allocation37_spill] sm:$0xff] %v5423_v54  ;;  %v5426_v5 = vadd.f32 %v532_v53, %v5359_v2  ;;  %v5429_v6 = vadd.f32 %v645_v9, %v5329_v47 }
 0x13a   :  { %v536_v11 = vpop.f32.mrf.mxu0  ;;  %v649_v1 = vpop.f32.mrf.mxu1 }
 0x13b   :  { %6691 = vst [vmem:[#allocation38_spill] sm:$0xff] %v5426_v5  ;;  %6692 = vst [vmem:[#allocation39_spill] sm:$0xff] %v5429_v6  ;;  %v5432_v0 = vadd.f32 %v536_v11, %v5350_v60  ;;  %v5435_v8 = vadd.f32 %v649_v1, %v5353_v61 }
 0x13c   :  { %v538_v62 = vpop.f32.mrf.mxu0  ;;  %v651_v59 = vpop.f32.mrf.mxu1 }
 0x13d   :  { %6693 = vst [vmem:[#allocation40_spill] sm:$0xff] %v5432_v0  ;;  %6694 = vst [vmem:[#allocation41_spill] sm:$0xff] %v5435_v8  ;;  %v5438_v57 = vadd.f32 %v538_v62, %v5359_v2  ;;  %v5441_v54 = vadd.f32 %v651_v59, %v5329_v47 }
 0x13e   :  { %v540_v53 = vpop.f32.mrf.mxu0  ;;  %v653_v5 = vpop.f32.mrf.mxu1 }
 0x13f   :  { %6695 = vst [vmem:[#allocation42_spill] sm:$0xff] %v5438_v57  ;;  %6696 = vst [vmem:[#allocation43_spill] sm:$0xff] %v5441_v54  ;;  %v5444_v9 = vadd.f32 %v540_v53, %v5350_v60  ;;  %v5447_v6 = vadd.f32 %v653_v5, %v5353_v61 }
 0x140   :  { %v542_v11 = vpop.f32.mrf.mxu0  ;;  %v655_v0 = vpop.f32.mrf.mxu1 }
 0x141   :  { %6697 = vst [vmem:[#allocation44_spill] sm:$0xff] %v5444_v9  ;;  %6698 = vst [vmem:[#allocation45_spill] sm:$0xff] %v5447_v6  ;;  %v5450_v1 = vadd.f32 %v542_v11, %v5359_v2  ;;  %v5453_v8 = vadd.f32 %v655_v0, %v5329_v47 }
 0x142   :  { %v546_v62 = vpop.f32.mrf.mxu0  ;;  %v659_v57 = vpop.f32.mrf.mxu1 }
 0x143   :  { %6699 = vst [vmem:[#allocation46_spill] sm:$0xff] %v5450_v1  ;;  %6700 = vst [vmem:[#allocation47_spill] sm:$0xff] %v5453_v8  ;;  %v5456_v59 = vadd.f32 %v546_v62, %v5350_v60  ;;  %v5459_v54 = vadd.f32 %v659_v57, %v5353_v61 }
 0x144   :  { %v548_v53 = vpop.f32.mrf.mxu0  ;;  %v661_v9 = vpop.f32.mrf.mxu1 }
 0x145   :  { %6701 = vst [vmem:[#allocation48_spill] sm:$0xff] %v5456_v59  ;;  %6702 = vst [vmem:[#allocation49_spill] sm:$0xff] %v5459_v54  ;;  %v5462_v5 = vadd.f32 %v548_v53, %v5359_v2  ;;  %v5465_v6 = vadd.f32 %v661_v9, %v5329_v47 }
 0x146   :  { %v550_v11 = vpop.f32.mrf.mxu0  ;;  %v663_v1 = vpop.f32.mrf.mxu1 }
 0x147   :  { %6703 = vst [vmem:[#allocation50_spill] sm:$0xff] %v5462_v5  ;;  %6704 = vst [vmem:[#allocation51_spill] sm:$0xff] %v5465_v6  ;;  %v5468_v0 = vadd.f32 %v550_v11, %v5350_v60  ;;  %v5471_v8 = vadd.f32 %v663_v1, %v5353_v61 }
 0x148   :  { %v552_v62 = vpop.f32.mrf.mxu0  ;;  %v665_v59 = vpop.f32.mrf.mxu1 }
 0x149   :  { %6705 = vst [vmem:[#allocation52_spill] sm:$0xff] %v5468_v0  ;;  %6706 = vst [vmem:[#allocation53_spill] sm:$0xff] %v5471_v8  ;;  %v5474_v57 = vadd.f32 %v552_v62, %v5359_v2  ;;  %v5477_v54 = vadd.f32 %v665_v59, %v5329_v47 }
 0x14a   :  { %v556_v53 = vpop.f32.mrf.mxu0  ;;  %v669_v5 = vpop.f32.mrf.mxu1 }
 0x14b   :  { %6707 = vst [vmem:[#allocation54_spill] sm:$0xff] %v5474_v57  ;;  %6708 = vst [vmem:[#allocation55_spill] sm:$0xff] %v5477_v54  ;;  %v5480_v9 = vadd.f32 %v556_v53, %v5350_v60  ;;  %v5483_v6 = vadd.f32 %v669_v5, %v5353_v61 }
 0x14c   :  { %v558_v11 = vpop.f32.mrf.mxu0  ;;  %v671_v0 = vpop.f32.mrf.mxu1 }
 0x14d   :  { %6709 = vst [vmem:[#allocation56_spill] sm:$0xff] %v5480_v9  ;;  %6710 = vst [vmem:[#allocation57_spill] sm:$0xff] %v5483_v6  ;;  %v5486_v1 = vadd.f32 %v558_v11, %v5359_v2  ;;  %v5489_v8 = vadd.f32 %v671_v0, %v5329_v47 }
 0x14e   :  { %v560_v62 = vpop.f32.mrf.mxu0  ;;  %v673_v57 = vpop.f32.mrf.mxu1 }
 0x14f   :  { %6711 = vst [vmem:[#allocation58_spill] sm:$0xff] %v5486_v1  ;;  %6712 = vst [vmem:[#allocation59_spill] sm:$0xff] %v5489_v8  ;;  %v5492_v59 = vadd.f32 %v560_v62, %v5350_v60  ;;  %v5495_v54 = vadd.f32 %v673_v57, %v5353_v61  ;;  %v162_v62 = vsub.s32 4, %v5323_v40 }
 0x150   :  { %v562_v53 = vpop.f32.mrf.mxu0  ;;  %v675_v9 = vpop.f32.mrf.mxu1 }
 0x151   :  { %6713 = vst [vmem:[#allocation60_spill] sm:$0xff] %v5492_v59  ;;  %6714 = vst [vmem:[#allocation61_spill] sm:$0xff] %v5495_v54  ;;  %v5498_v5 = vadd.f32 %v562_v53, %v5359_v2  ;;  %v5501_v6 = vadd.f32 %v675_v9, %v5329_v47  ;;  %v166_v53 = vsub.s32 5, %v5323_v40 }
 0x152   :  { %v566_v11 = vpop.f32.mrf.mxu0  ;;  %v679_v1 = vpop.f32.mrf.mxu1 }
 0x153   :  { %6715 = vst [vmem:[#allocation62_spill] sm:$0xff] %v5498_v5  ;;  %6716 = vst [vmem:[#allocation63_spill] sm:$0xff] %v5501_v6  ;;  %v5504_v0 = vadd.f32 %v566_v11, %v5350_v60  ;;  %v5507_v10 = vadd.f32 %v679_v1, %v5353_v61  ;;  %v5523_v1 = vrot.slane %v5326_v46, %v162_v62 }
 0x154   :  { %v568_v57 = vpop.f32.mrf.mxu0  ;;  %v5510_v54 = vpop.f32.mrf.mxu1  ;;  %v5533_v40 = vrot.slane %v5326_v46, %v166_v53  ;;  %v501_v6 = vadd.f32 %v5342_v55, %v5350_v60  ;;  %v499_v46 = vadd.f32 %v5335_v50, %v5359_v2 }
 0x155   :  { %6717 = vst [vmem:[#allocation64_spill] sm:$0xff] %v5504_v0  ;;  %6718 = vst [vmem:[#allocation65_spill] sm:$0xff] %v5507_v10  ;;  %v5513_v59 = vadd.f32 %v568_v57, %v5359_v2  ;;  %v497_v57 = vadd.f32 %v5331_v48, %v5350_v60 }
 0x156   :  { %v570_v9 = vpop.f32.mrf.mxu0  ;;  %v683_v5 = vpop.f32.mrf.mxu1 }
 0x157   :  { %6719 = vst [vmem:[#allocation66_spill] sm:$0xff] %v5513_v59  ;;  %v5517_v52 = vadd.f32 %v570_v9, %v5350_v60  ;;  %v5520_v11 = vadd.f32 %v683_v5, %v5353_v61  ;;  %v503_v60 = vadd.f32 %v5347_v58, %v5359_v2 }
 0x158   :  { %v572_v10 = vpop.f32.mrf.mxu0  ;;  %v5525_v0 = vpop.f32.mrf.mxu1 }
 0x159   :  { %6720 = vst [vmem:[#allocation67_spill] sm:$0xff] %v5517_v52  ;;  %6721 = vst [vmem:[#allocation68_spill] sm:$0xff] %v5520_v11  ;;  %v5530_v59 = vadd.f32 %v572_v10, %v5359_v2 }
 0x15a   :  { %v722_v9 = vpop.f32.mrf.mxu0  ;;  %v1132_v52 = vpop.f32.mrf.mxu1 }
 0x15b   :  { %6722 = vst [vmem:[#allocation69_spill] sm:$0xff] %v5530_v59  ;;  %v5536_v5 = vadd.f32 %v722_v9, %v5523_v1  ;;  %v1182_v11 = vadd.f32 %v1132_v52, %v497_v57 }
 0x15c   :  { %v724_v62 = vpop.f32.mrf.mxu0  ;;  %v1134_v63 = vpop.f32.mrf.mxu1 }
 0x15d   :  { %6723 = vst [vmem:[#allocation70_spill] sm:$0xff] %v5536_v5  ;;  %v3655_v8 = vmul.f32 -1.442695, %v1182_v11  ;;  %v5541_v48 = vadd.f32 %v724_v62, %v5533_v40  ;;  %v1196_v57 = vadd.f32 %v1134_v63, %v499_v46 }
 0x15e   :  { %v726_v10 = vpop.f32.mrf.mxu0  ;;  %v1136_v59 = vpop.f32.mrf.mxu1 }
 0x15f   :  { %6724 = vst [vmem:[#allocation71_spill] sm:$0xff] %v5541_v48  ;;  %4436 = vpow2.f32 %v3655_v8  ;;  %v5546_v53 = vadd.f32 %v726_v10, %v5523_v1  ;;  %v1183_v9 = vadd.f32 %v1136_v59, %v501_v6  ;;  %v3657_v10 = vmul.f32 -1.442695, %v1196_v57 }
 0x160   :  { %v728_v52 = vpop.f32.mrf.mxu0  ;;  %v1138_v55 = vpop.f32.mrf.mxu1 }
 0x161   :  { %6725 = vst [vmem:[#allocation72_spill] sm:$0xff] %v5546_v53  ;;  %v3656_v5 = vmul.f32 -1.442695, %v1183_v9  ;;  %v5549_v44 = vadd.f32 %v728_v52, %v5533_v40  ;;  %v1197_v50 = vadd.f32 %v1138_v55, %v503_v60 }
 0x162   :  { %v732_v11 = vpop.f32.mrf.mxu0 }
 0x163   :  { %6726 = vst [vmem:[#allocation73_spill] sm:$0xff] %v5549_v44  ;;  %4438 = vpow2.f32 %v3656_v5  ;;  %v5554_v62 = vadd.f32 %v732_v11, %v5523_v1  ;;  %v3658_v46 = vmul.f32 -1.442695, %v1197_v50 }
 0x164   :  { %v734_v8 = vpop.f32.mrf.mxu0  ;;  %4440 = vpow2.f32 %v3657_v10 }
 0x165   :  { %6727 = vst [vmem:[#allocation74_spill] sm:$0xff] %v5554_v62  ;;  %v5557_v6 = vadd.f32 %v734_v8, %v5533_v40  ;;  %4442 = vpow2.f32 %v3658_v46 }
 0x166   :  { %v736_v63 = vpop.f32.mrf.mxu0 }
 0x167   :  { %6728 = vst [vmem:[#allocation75_spill] sm:$0xff] %v5557_v6  ;;  %v5560_v59 = vadd.f32 %v736_v63, %v5523_v1 }
 0x168   :  { %v738_v9 = vpop.f32.mrf.mxu0 }
 0x169   :  { %6729 = vst [vmem:[#allocation76_spill] sm:$0xff] %v5560_v59  ;;  %v5563_v58 = vadd.f32 %v738_v9, %v5533_v40 }
 0x16a   :  { %v742_v5 = vpop.f32.mrf.mxu0 }
 0x16b   :  { %6730 = vst [vmem:[#allocation77_spill] sm:$0xff] %v5563_v58  ;;  %v5566_v52 = vadd.f32 %v742_v5, %v5523_v1 }
 0x16c   :  { %v4437_v55 = vpop.eup %4436  ;;  %v744_v57 = vpop.f32.mrf.mxu0 }
 0x16d   :  { %6731 = vst [vmem:[#allocation78_spill] sm:$0xff] %v5566_v52  ;;  %v1190_v60 = vadd.f32 1.0, %v4437_v55  ;;  %v5569_v11 = vadd.f32 %v744_v57, %v5533_v40 }
 0x16e   :  { %v746_v8 = vpop.f32.mrf.mxu0 }
 0x16f   :  { %6732 = vst [vmem:[#allocation79_spill] sm:$0xff] %v5569_v11  ;;  %4444 = vrcp.f32 %v1190_v60  ;;  %v5572_v50 = vadd.f32 %v746_v8, %v5523_v1 }
 0x170   :  { %v4439_v10 = vpop.eup %4438  ;;  %v748_v63 = vpop.f32.mrf.mxu0 }
 0x171   :  { %6733 = vst [vmem:[#allocation80_spill] sm:$0xff] %v5572_v50  ;;  %v1191_v9 = vadd.f32 1.0, %v4439_v10  ;;  %v5575_v44 = vadd.f32 %v748_v63, %v5533_v40  ;;  %v4441_v48 = vpop.eup %4440  ;;  %v5589_v10 = vld [vmem:[%s6632_s4] ss:$0 sm:$0xff]  ;;  %v610_v50 = vadd.f32 %v5333_v49, %v5353_v61  ;;  %v614_v49 = vadd.f32 %v5344_v56, %v5353_v61 }
 0x172   :  { %v752_v5 = vpop.f32.mrf.mxu0  ;;  %v4443_v63 = vpop.eup %4442 }
 0x173   :  { %6734 = vst [vmem:[#allocation81_spill] sm:$0xff] %v5575_v44  ;;  %4446 = vrcp.f32 %v1191_v9  ;;  %v5578_v46 = vadd.f32 %v752_v5, %v5523_v1  ;;  %v1204_v9 = vadd.f32 1.0, %v4441_v48  ;;  %v1205_v62 = vadd.f32 1.0, %v4443_v63 }
 0x174   :  { %v754_v55 = vpop.f32.mrf.mxu0 }
 0x175   :  { %6735 = vst [vmem:[#allocation82_spill] sm:$0xff] %v5578_v46  ;;  %v5581_v57 = vadd.f32 %v754_v55, %v5533_v40  ;;  %4448 = vrcp.f32 %v1204_v9 }
 0x176   :  { %v756_v60 = vpop.f32.mrf.mxu0  ;;  %4450 = vrcp.f32 %v1205_v62 }
 0x177   :  { %6736 = vst [vmem:[#allocation83_spill] sm:$0xff] %v5581_v57  ;;  %v5584_v8 = vadd.f32 %v756_v60, %v5523_v1 }
 0x178   :  { %v758_v53 = vpop.f32.mrf.mxu0 }
 0x179   :  { %6737 = vst [vmem:[#allocation84_spill] sm:$0xff] %v5584_v8  ;;  %v5592_v5 = vadd.f32 %v758_v53, %v5533_v40 }
 0x17a   :  { %v762_v58 = vpop.f32.mrf.mxu0  ;;  %v1175_v6 = vpop.f32.mrf.mxu1 }
 0x17b   :  { %6738 = vst [vmem:[#allocation85_spill] sm:$0xff] %v5592_v5  ;;  %v5595_v55 = vadd.f32 %v762_v58, %v5523_v1  ;;  %v1216_v59 = vadd.f32 %v5589_v10, %v1175_v6 }
 0x17c   :  { %v4445_v60 = vpop.eup %4444  ;;  %v764_v44 = vpop.f32.mrf.mxu0 }
 0x17d   :  { %6739 = vst [vmem:[#allocation86_spill] sm:$0xff] %v5595_v55  ;;  %v3971_v11 = vpop.f32.mrf.mxu1  ;;  %v1218_v52 = vmul.f32 %v4445_v60, %v1216_v59  ;;  %v5601_v48 = vadd.f32 %v764_v44, %v5533_v40 }
 0x17e   :  { %v766_v53 = vpop.f32.mrf.mxu0 }
 0x17f   :  { %6740 = vst [vmem:[#allocation87_spill] sm:$0xff] %v5601_v48  ;;  %v1178_v5 = vpop.f32.mrf.mxu1  ;;  %v1220_v57 = vadd.f32 %v1218_v52, %v610_v50  ;;  %v5604_v58 = vadd.f32 %v766_v53, %v5523_v1 }
 0x180   :  { %v1217_v6 = vadd.f32 %v5589_v10, %v1178_v5  ;;  %v4447_v8 = vpop.eup %4446  ;;  %v768_v63 = vpop.f32.mrf.mxu0 }
 0x181   :  { %6741 = vst [vmem:[#allocation88_spill] sm:$0xff] %v5604_v58  ;;  %v3972_v11 = vpop.f32.mrf.mxu1  ;;  %4452 = vtanh.f32 %v1220_v57  ;;  %v5610_v44 = vadd.f32 %v768_v63, %v5533_v40 }
 0x182   :  { %v1219_v59 = vmul.f32 %v4447_v8, %v1217_v6  ;;  %v772_v9 = vpop.f32.mrf.mxu0  ;;  %v4449_v57 = vpop.eup %4448 }
 0x183   :  { %6742 = vst [vmem:[#allocation89_spill] sm:$0xff] %v5610_v44  ;;  %v5613_v52 = vadd.f32 %v772_v9, %v5523_v1  ;;  %v4451_v11 = vpop.eup %4450  ;;  %v1228_v46 = vmul.f32 0.0, %v4449_v57 }
 0x184   :  { %v1221_v60 = vadd.f32 %v1219_v59, %v614_v49  ;;  %v774_v50 = vpop.f32.mrf.mxu0  ;;  %v1224_v59 = vsub.f32 1.0, %v4449_v57  ;;  %v1225_v48 = vsub.f32 1.0, %v4451_v11 }
 0x185   :  { %6743 = vst [vmem:[#allocation90_spill] sm:$0xff] %v5613_v52  ;;  %v5616_v5 = vadd.f32 %v774_v50, %v5533_v40 }
 0x186   :  { %4454 = vtanh.f32 %v1221_v60  ;;  %v776_v62 = vpop.f32.mrf.mxu0 }
 0x187   :  { %6744 = vst [vmem:[#allocation91_spill] sm:$0xff] %v5616_v5  ;;  %v5619_v53 = vadd.f32 %v776_v62, %v5523_v1 }
 0x188   :  { %v778_v56 = vpop.f32.mrf.mxu0 }
 0x189   :  { %6745 = vst [vmem:[#allocation92_spill] sm:$0xff] %v5619_v53  ;;  %v5622_v61 = vadd.f32 %v778_v56, %v5533_v40 }
 0x18a   :  { %v782_v8 = vpop.f32.mrf.mxu0 }
 0x18b   :  { %6746 = vst [vmem:[#allocation93_spill] sm:$0xff] %v5622_v61  ;;  %v5625_v6 = vadd.f32 %v782_v8, %v5523_v1 }
 0x18c   :  { %v784_v63 = vpop.f32.mrf.mxu0 }
 0x18d   :  { %v5628_v49 = vadd.f32 %v784_v63, %v5533_v40  ;;  %v1229_v63 = vmul.f32 0.0, %v4451_v11 }
 0x18e   :  { %v4453_v9 = vpop.eup %4452  ;;  %v786_v60 = vpop.f32.mrf.mxu0 }
 0x18f   :  { %v5631_v50 = vadd.f32 %v786_v60, %v5523_v1  ;;  %v1226_v62 = vmul.f32 %v4453_v9, %v1224_v59 }
 0x190   :  { %v788_v56 = vpop.f32.mrf.mxu0 }
 0x191   :  { %v5634_v44 = vadd.f32 %v788_v56, %v5533_v40  ;;  %v5636_v8 = vadd.f32 %v1228_v46, %v1226_v62 }
 0x192   :  { %v792_v55 = vpop.f32.mrf.mxu0 }
 0x193   :  { %v4455_v58 = vpop.eup %4454  ;;  %v3777_v5 = vpack.c.bf16 %v5636_v8, %v5636_v8 }
 0x194   :  { %v1227_v61 = vmul.f32 %v4455_v58, %v1225_v48  ;;  %v5640_v53 = vpop.f32.mrf.mxu0  ;;  %v682_v48 = vadd.f32 %v5510_v54, %v5329_v47  ;;  %v686_v54 = vadd.f32 %v5525_v0, %v5329_v47 }
 0x195   :  { %1240 = vst [vmem:[#allocation11] sm:$0xf] %v3777_v5 }
 0x196   :  { %v5642_v60 = vadd.f32 %v1229_v63, %v1227_v61  ;;  %v796_v57 = vpop.f32.mrf.mxu0  ;;  %v6747_v61 = vmov 0.0   ;;  %v6748_v63 = vmov 0  }
 0x197   :  { %v797_v47 = vadd.f32 %v796_v57, %v5523_v1 }
 0x198   :  { %v1232_v59 = vpack.c.bf16 %v5642_v60, %v5636_v8  ;;  %v3778_v46 = vpack.c.bf16 %v5642_v60, %v5642_v60  ;;  %v5648_v9 = vpop.f32.mrf.mxu0 }
 0x199   :  { %v799_v0 = vadd.f32 %v5648_v9, %v5533_v40 }
 0x19a   :  { %1241 = vst [vmem:[#allocation11 + $0x8] sm:$0xf] %v3778_v46  ;;  %1559 = vmatmul.mubr.bf16.vlgmr.msra.gmra.mxu0 %v1232_v59  ;;  %4010 = vmatmul.mubr.bf16.vlgmr.msra.gmra.mxu1 %v1232_v59  ;;  %v1410_v58 = vpop.f32.mrf.mxu0  ;;  %v5652_v11 = vpop.f32.mrf.mxu1 }
 0x19b   :  { %1671 = vmatpush1.bf16.msra.mxu0 %v5156_v13  ;;  %4014 = vmatpush3.bf16.msra.mxu1 %v5240_v35  ;;  %v1460_v5 = vadd.f32 %v1410_v58, %v682_v48 }
 0x19c   :  { %1672 = vmatprep.subr.bf16.mxu0 %v5158_v14  ;;  %4015 = vmatprep.subr.bf16.mxu1 %v6747_v61  ;;  %v1412_v62 = vpop.f32.mrf.mxu0  ;;  %v3991_v56 = vpop.f32.mrf.mxu1  ;;  %v793_v14 = vadd.f32 %v792_v55, %v5523_v1 }
 0x19d   :  { %1702 = vmatprep.mubr.bf16.mxu0 %v6748_v63  ;;  %4029 = vmatprep.mubr.msk.bf16.mxu1 %vm4998_vm0, %v6747_v61  ;;  %v3686_v59 = vmul.f32 -1.442695, %v1460_v5 }
 0x19e   :  { %v1414_v46 = vpop.f32.mrf.mxu0  ;;  %v1456_v13 = vpop.f32.mrf.mxu1  ;;  %v1474_v58 = vadd.f32 %v1412_v62, %v793_v14 }
 0x19f   :  { %1673 = vmatpush1.bf16.msra.mxu0 %v5166_v16  ;;  %4016 = vmatpush3.bf16.msra.mxu1 %v5249_v36  ;;  %4456 = vpow2.f32 %v3686_v59  ;;  %v1461_v35 = vadd.f32 %v1414_v46, %v686_v54 }
 0x1a0   :  { %1674 = vmatprep.subr.bf16.mxu0 %v5170_v17  ;;  %4017 = vmatprep.subr.bf16.mxu1 %v6747_v61  ;;  %v3992_v48 = vpop.f32.mrf.mxu1  ;;  %v1416_v52 = vpop.f32.mrf.mxu0  ;;  %v3688_v36 = vmul.f32 -1.442695, %v1474_v58  ;;  %v5717_v58 = vld [vmem:[#allocation8 + $0xa8] ss:$12 sps:$4 sm:$0xff]  }
 0x1a1   :  { %v3687_v56 = vmul.f32 -1.442695, %v1461_v35  ;;  %v1475_v16 = vadd.f32 %v1416_v52, %v797_v47  ;;  %v5728_v47 = vld [vmem:[#allocation8 + $0x90] ss:$12 sps:$4 sm:$0xff]  }
 0x1a3   :  { %1675 = vmatpush1.bf16.msra.mxu0 %v5181_v19  ;;  %4018 = vmatpush3.bf16.msra.mxu1 %v5255_v38  ;;  %4458 = vpow2.f32 %v3687_v56  ;;  %v3689_v17 = vmul.f32 -1.442695, %v1475_v16  ;;  %v5721_v56 = vld [vmem:[#allocation8 + $0x94] ss:$12 sps:$4 sm:$0xff]   ;;  %v5732_v16 = vld [vmem:[#allocation8 + $0x7c] ss:$12 sps:$4 sm:$0xff]  }
 0x1a4   :  { %1676 = vmatprep.subr.bf16.mxu0 %v5183_v20  ;;  %4019 = vmatprep.subr.bf16.mxu1 %v6747_v61  ;;  %4460 = vpow2.f32 %v3688_v36  ;;  %v5740_v36 = vld [vmem:[#allocation8 + $0x64] ss:$12 sps:$4 sm:$0xff]  }
 0x1a5   :  { %4462 = vpow2.f32 %v3689_v17  ;;  %v5744_v17 = vld [vmem:[#allocation8 + $0x60] ss:$12 sps:$4 sm:$0xff]  }
 0x1a7   :  { %1677 = vmatpush1.bf16.msra.mxu0 %v5192_v22  ;;  %4020 = vmatpush3.bf16.msra.mxu1 %v5261_v37 }
 0x1a8   :  { %1678 = vmatprep.subr.bf16.mxu0 %v5195_v23  ;;  %4021 = vmatprep.subr.bf16.mxu1 %v6747_v61 }
 0x1ab   :  { %1679 = vmatpush1.bf16.msra.mxu0 %v5202_v25  ;;  %4022 = vmatpush3.bf16.msra.mxu1 %v5265_v41  ;;  %v795_v41 = vadd.f32 %v5640_v53, %v5533_v40 }
 0x1ac   :  { %1680 = vmatprep.subr.bf16.mxu0 %v5205_v26  ;;  %4023 = vmatprep.subr.bf16.mxu1 %v6747_v61  ;;  %v4457_v19 = vpop.eup %4456  ;;  %v5692_v26 = vld [vmem:[%s6632_s4 + $0x1] ss:$0 sm:$0xff] }
 0x1ad   :  { %v1468_v20 = vadd.f32 1.0, %v4457_v19  ;;  %v5752_v19 = vld [vmem:[#allocation8 + $0x48] ss:$12 sps:$4 sm:$0xff]  }
 0x1af   :  { %1681 = vmatpush1.bf16.msra.mxu0 %v5214_v28  ;;  %4024 = vmatpush3.bf16.msra.mxu1 %v5271_v42  ;;  %4464 = vrcp.f32 %v1468_v20  ;;  %v5696_v28 = vld [vmem:[#allocation8 + $0xac] ss:$12 sps:$4 sm:$0xff]   ;;  %v5760_v20 = vld [vmem:[#allocation8 + $0x30] ss:$12 sps:$4 sm:$0xff]  }
 0x1b0   :  { %1682 = vmatprep.subr.bf16.mxu0 %v5217_v29  ;;  %4025 = vmatprep.subr.bf16.mxu1 %v6747_v61  ;;  %v4459_v22 = vpop.eup %4458  ;;  %6749 = vst [vmem:[#allocation94_spill] sm:$0xff] %v5696_v28  ;;  %6750 = vst [vmem:[#allocation95_spill] sm:$0xff] %v5760_v20 }
 0x1b1   :  { %v1469_v23 = vadd.f32 1.0, %v4459_v22  ;;  %v4461_v25 = vpop.eup %4460  ;;  %v5768_v22 = vld [vmem:[#allocation8 + $0x18] ss:$12 sps:$4 sm:$0xff]  }
 0x1b2   :  { %v4463_v29 = vpop.eup %4462  ;;  %6752 = vst [vmem:[#allocation97_spill] sm:$0xff] %v5768_v22 }
 0x1b3   :  { %1683 = vmatpush1.bf16.msra.mxu0 %v5224_v31  ;;  %4026 = vmatpush3.bf16.msra.mxu1 %v5275_v43  ;;  %4466 = vrcp.f32 %v1469_v23  ;;  %v1482_v31 = vadd.f32 1.0, %v4461_v25  ;;  %v1483_v37 = vadd.f32 1.0, %v4463_v29  ;;  %v1495_v43 = vadd.f32 %v5692_v26, %v1456_v13  ;;  %v5776_v23 = vld [vmem:[#allocation8] ss:$12 sps:$4 sm:$0xff]  }
 0x1b4   :  { %1684 = vmatprep.subr.bf16.mxu0 %v5227_v32  ;;  %4027 = vmatprep.subr.bf16.mxu1 %v6747_v61  ;;  %v1494_v32 = vadd.f32 %v5692_v26, %v5652_v11  ;;  %6754 = vst [vmem:[#allocation99_spill] sm:$0xff] %v5776_v23 }
 0x1b5   :  { %4468 = vrcp.f32 %v1482_v31 }
 0x1b6   :  { %4470 = vrcp.f32 %v1483_v37 }
 0x1b7   :  { %1685 = vmatpush1.bf16.msra.mxu0 %v5236_v34  ;;  %4028 = vmatpush3.bf16.msra.mxu1 %v5281_v45 }
 0x1b8   :  { %1814 = vmatprep.subr.bf16.mxu0 %v5696_v28  ;;  %4033 = vmatprep.subr.bf16.mxu1 %v6747_v61 }
 0x1bc   :  { %v4465_v38 = vpop.eup %4464 }
 0x1bd   :  { %v1496_v34 = vmul.f32 %v4465_v38, %v1494_v32 }
 0x1bf   :  { %v1498_v42 = vadd.f32 %v1496_v34, %v795_v41 }
 0x1c0   :  { %v4467_v45 = vpop.eup %4466 }
 0x1c1   :  { %4472 = vtanh.f32 %v1498_v42  ;;  %v1497_v1 = vmul.f32 %v4467_v45, %v1495_v43 }
 0x1c2   :  { %v4469_v52 = vpop.eup %4468 }
 0x1c3   :  { %v1499_v55 = vadd.f32 %v1497_v1, %v799_v0  ;;  %v4471_v57 = vpop.eup %4470  ;;  %v1502_v11 = vsub.f32 1.0, %v4469_v52  ;;  %v1506_v53 = vmul.f32 0.0, %v4469_v52  ;;  %v513_v0 = vadd.f32 %v5379_v51, %v5359_v2 }
 0x1c4   :  { %v1503_v54 = vsub.f32 1.0, %v4471_v57  ;;  %v1507_v14 = vmul.f32 0.0, %v4471_v57 }
 0x1c5   :  { %4474 = vtanh.f32 %v1499_v55 }
 0x1ce   :  { %v4473_v5 = vpop.eup %4472 }
 0x1cf   :  { %v1504_v62 = vmul.f32 %v4473_v5, %v1502_v11 }
 0x1d1   :  { %v5707_v59 = vadd.f32 %v1506_v53, %v1504_v62 }
 0x1d2   :  { %v4475_v46 = vpop.eup %4474 }
 0x1d3   :  { %v1505_v13 = vmul.f32 %v4475_v46, %v1503_v54  ;;  %v3779_v35 = vpack.c.bf16 %v5707_v59, %v5707_v59 }
 0x1d5   :  { %v5711_v40 = vadd.f32 %v1507_v14, %v1505_v13  ;;  %1518 = vst [vmem:[#allocation11 + $0x74] sm:$0xf] %v3779_v35 }
 0x1d7   :  { %v1510_v9 = vpack.c.bf16 %v5711_v40, %v5707_v59  ;;  %v3780_v48 = vpack.c.bf16 %v5711_v40, %v5711_v40 }
 0x1d9   :  { %1519 = vst [vmem:[#allocation11 + $0x7c] sm:$0xf] %v3780_v48  ;;  %1703 = vmatmul.mubr.bf16.vlgmr.msra.gmra.mxu0 %v1510_v9  ;;  %4030 = vmatmul.mubr.bf16.vlgmr.msra.gmra.mxu1 %v1510_v9  ;;  %v6756_v48 = vld [vmem:[#allocation22_spill] sm:$0xff] }
 0x1da   :  { %1815 = vmatpush1.bf16.msra.mxu0 %v5717_v58  ;;  %4034 = vmatpush3.bf16.msra.mxu1 %v5154_v12  ;;  %v5736_v12 = vld [vmem:[#allocation8 + $0x78] ss:$12 sps:$4 sm:$0xff]  }
 0x1db   :  { %1816 = vmatprep.subr.bf16.mxu0 %v5721_v56  ;;  %4035 = vmatprep.subr.bf16.mxu1 %v6747_v61 }
 0x1dc   :  { %1846 = vmatprep.mubr.bf16.mxu0 %v6748_v63  ;;  %4049 = vmatprep.mubr.msk.bf16.mxu1 %vm4998_vm0, %v6747_v61 }
 0x1de   :  { %1817 = vmatpush1.bf16.msra.mxu0 %v5728_v47  ;;  %4036 = vmatpush3.bf16.msra.mxu1 %v5164_v15  ;;  %v5748_v15 = vld [vmem:[#allocation8 + $0x4c] ss:$12 sps:$4 sm:$0xff]  }
 0x1df   :  { %1818 = vmatprep.subr.bf16.mxu0 %v5732_v16  ;;  %4037 = vmatprep.subr.bf16.mxu1 %v6747_v61 }
 0x1e2   :  { %1819 = vmatpush1.bf16.msra.mxu0 %v5736_v12  ;;  %4038 = vmatpush3.bf16.msra.mxu1 %v5176_v18  ;;  %v5756_v18 = vld [vmem:[#allocation8 + $0x34] ss:$12 sps:$4 sm:$0xff]  }
 0x1e3   :  { %1820 = vmatprep.subr.bf16.mxu0 %v5740_v36  ;;  %4039 = vmatprep.subr.bf16.mxu1 %v6747_v61 }
 0x1e6   :  { %1821 = vmatpush1.bf16.msra.mxu0 %v5744_v17  ;;  %4040 = vmatpush3.bf16.msra.mxu1 %v5187_v21  ;;  %v5764_v21 = vld [vmem:[#allocation8 + $0x1c] ss:$12 sps:$4 sm:$0xff]  }
 0x1e7   :  { %1822 = vmatprep.subr.bf16.mxu0 %v5748_v15  ;;  %4041 = vmatprep.subr.bf16.mxu1 %v6747_v61  ;;  %6751 = vst [vmem:[#allocation96_spill] sm:$0xff] %v5764_v21 }
 0x1ea   :  { %1823 = vmatpush1.bf16.msra.mxu0 %v5752_v19  ;;  %4042 = vmatpush3.bf16.msra.mxu1 %v5198_v24  ;;  %v5772_v24 = vld [vmem:[#allocation8 + $0x4] ss:$12 sps:$4 sm:$0xff]  }
 0x1eb   :  { %1824 = vmatprep.subr.bf16.mxu0 %v5756_v18  ;;  %4043 = vmatprep.subr.bf16.mxu1 %v6747_v61  ;;  %6753 = vst [vmem:[#allocation98_spill] sm:$0xff] %v5772_v24 }
 0x1ee   :  { %1825 = vmatpush1.bf16.msra.mxu0 %v5760_v20  ;;  %4044 = vmatpush3.bf16.msra.mxu1 %v5209_v27  ;;  %v5780_v27 = vld [vmem:[#allocation8 + $0x16c] ss:$12 sps:$4 sm:$0xff]  }
 0x1ef   :  { %1826 = vmatprep.subr.bf16.mxu0 %v5764_v21  ;;  %4045 = vmatprep.subr.bf16.mxu1 %v6747_v61  ;;  %6755 = vst [vmem:[#allocation100_spill] sm:$0xff] %v5780_v27 }
 0x1f2   :  { %1827 = vmatpush1.bf16.msra.mxu0 %v5768_v22  ;;  %4046 = vmatpush3.bf16.msra.mxu1 %v5220_v30 }
 0x1f3   :  { %1828 = vmatprep.subr.bf16.mxu0 %v5772_v24  ;;  %4047 = vmatprep.subr.bf16.mxu1 %v6747_v61 }
 0x1f6   :  { %1829 = vmatpush1.bf16.msra.mxu0 %v5776_v23  ;;  %4048 = vmatpush3.bf16.msra.mxu1 %v5231_v33 }
 0x1f7   :  { %1958 = vmatprep.subr.bf16.mxu0 %v5780_v27  ;;  %4053 = vmatprep.subr.bf16.mxu1 %v6747_v61 }
 0x25a   :  { %v1560_v25 = vpop.f32.mrf.mxu0  ;;  %v1603_v30 = vpop.f32.mrf.mxu1 }
 0x25b   :  { %v1610_v29 = vadd.f32 %v1560_v25, %v5362_v3  ;;  %v1638_v53 = vadd.f32 %v5589_v10, %v1603_v30 }
 0x25c   :  { %v1562_v31 = vpop.f32.mrf.mxu0  ;;  %v4011_v32 = vpop.f32.mrf.mxu1 }
 0x25d   :  { %v3693_v38 = vmul.f32 -1.442695, %v1610_v29  ;;  %v1624_v33 = vadd.f32 %v1562_v31, %v5368_v7 }
 0x25e   :  { %v1564_v37 = vpop.f32.mrf.mxu0  ;;  %v1606_v41 = vpop.f32.mrf.mxu1 }
 0x25f   :  { %4476 = vpow2.f32 %v3693_v38  ;;  %v1611_v34 = vadd.f32 %v1564_v37, %v5374_v39  ;;  %v3695_v55 = vmul.f32 -1.442695, %v1624_v33  ;;  %v1639_v14 = vadd.f32 %v5589_v10, %v1606_v41 }
 0x260   :  { %v4012_v42 = vpop.f32.mrf.mxu1  ;;  %v1566_v45 = vpop.f32.mrf.mxu0 }
 0x261   :  { %v3694_v43 = vmul.f32 -1.442695, %v1611_v34  ;;  %v1625_v1 = vadd.f32 %v1566_v45, %v513_v0 }
 0x263   :  { %4478 = vpow2.f32 %v3694_v43  ;;  %v3696_v3 = vmul.f32 -1.442695, %v1625_v1 }
 0x264   :  { %4480 = vpow2.f32 %v3695_v55 }
 0x265   :  { %4482 = vpow2.f32 %v3696_v3  ;;  %v5807_v3 = vld [vmem:[#allocation8 + $0x168] ss:$12 sps:$4 sm:$0xff]  }
 0x26c   :  { %v4477_v52 = vpop.eup %4476 }
 0x26d   :  { %v1618_v57 = vadd.f32 1.0, %v4477_v52  ;;  %v6757_v52 = vld [vmem:[#allocation59_spill] sm:$0xff] }
 0x26f   :  { %4484 = vrcp.f32 %v1618_v57 }
 0x270   :  { %v4479_v11 = vpop.eup %4478 }
 0x271   :  { %v1619_v5 = vadd.f32 1.0, %v4479_v11  ;;  %v4481_v39 = vpop.eup %4480  ;;  %v5814_v11 = vld [vmem:[#allocation8 + $0x154] ss:$12 sps:$4 sm:$0xff]  }
 0x272   :  { %v4483_v62 = vpop.eup %4482  ;;  %v1632_v7 = vadd.f32 1.0, %v4481_v39 }
 0x273   :  { %4486 = vrcp.f32 %v1619_v5  ;;  %v1633_v46 = vadd.f32 1.0, %v4483_v62 }
 0x274   :  { %4488 = vrcp.f32 %v1632_v7 }
 0x275   :  { %4490 = vrcp.f32 %v1633_v46  ;;  %v5826_v46 = vld [vmem:[#allocation8 + $0x158] ss:$12 sps:$4 sm:$0xff]  }
 0x27c   :  { %v4485_v54 = vpop.eup %4484 }
 0x27d   :  { %v1640_v51 = vmul.f32 %v4485_v54, %v1638_v53  ;;  %v5823_v54 = vld [vmem:[#allocation8 + $0x150] ss:$12 sps:$4 sm:$0xff]  }
 0x27f   :  { %v1642_v13 = vadd.f32 %v1640_v51, %v5365_v4  ;;  %v6758_v51 = vld [vmem:[#allocation63_spill] sm:$0xff] }
 0x280   :  { %v4487_v35 = vpop.eup %4486 }
 0x281   :  { %4492 = vtanh.f32 %v1642_v13  ;;  %v1641_v9 = vmul.f32 %v4487_v35, %v1639_v14  ;;  %v4489_v29 = vpop.eup %4488  ;;  %v5830_v14 = vld [vmem:[#allocation8 + $0x13c] ss:$12 sps:$4 sm:$0xff]  }
 0x282   :  { %v4491_v31 = vpop.eup %4490  ;;  %v1646_v32 = vsub.f32 1.0, %v4489_v29  ;;  %v1650_v37 = vmul.f32 %v4489_v29, %v5636_v8  ;;  %v5835_v29 = vld [vmem:[#allocation8 + $0x138] ss:$12 sps:$4 sm:$0xff]  }
 0x283   :  { %v1643_v25 = vadd.f32 %v1641_v9, %v6756_v48  ;;  %v1647_v34 = vsub.f32 1.0, %v4491_v31  ;;  %v1651_v41 = vmul.f32 %v4491_v31, %v5642_v60  ;;  %v5810_v60 = vld [vmem:[#allocation8 + $0x170] ss:$12 sps:$4 sm:$0xff]   ;;  %v5838_v31 = vld [vmem:[#allocation8 + $0x140] ss:$12 sps:$4 sm:$0xff]  }
 0x285   :  { %4494 = vtanh.f32 %v1643_v25 }
 0x28e   :  { %v4493_v38 = vpop.eup %4492 }
 0x28f   :  { %v1648_v30 = vmul.f32 %v4493_v38, %v1646_v32  ;;  %v5841_v32 = vld [vmem:[#allocation8 + $0x124] ss:$12 sps:$4 sm:$0xff]  }
 0x291   :  { %v5794_v42 = vadd.f32 %v1650_v37, %v1648_v30  ;;  %v5846_v30 = vld [vmem:[#allocation8 + $0x120] ss:$12 sps:$4 sm:$0xff]   ;;  %v5849_v37 = vld [vmem:[#allocation8 + $0x128] ss:$12 sps:$4 sm:$0xff]  }
 0x292   :  { %v4495_v4 = vpop.eup %4494 }
 0x293   :  { %v1649_v33 = vmul.f32 %v4495_v4, %v1647_v34  ;;  %v3781_v43 = vpack.c.bf16 %v5794_v42, %v5794_v42  ;;  %v5852_v34 = vld [vmem:[#allocation8 + $0x10c] ss:$12 sps:$4 sm:$0xff]  }
 0x295   :  { %v5799_v45 = vadd.f32 %v1651_v41, %v1649_v33  ;;  %1662 = vst [vmem:[#allocation11 + $0x10] sm:$0xf] %v3781_v43  ;;  %v5856_v33 = vld [vmem:[#allocation8 + $0x108] ss:$12 sps:$4 sm:$0xff]  }
 0x296   :  { %v5862_v41 = vld [vmem:[#allocation8 + $0xf4] ss:$12 sps:$4 sm:$0xff]  }
 0x297   :  { %v1654_v0 = vpack.c.bf16 %v5799_v45, %v5794_v42  ;;  %v3782_v1 = vpack.c.bf16 %v5799_v45, %v5799_v45 }
 0x299   :  { %1663 = vst [vmem:[#allocation11 + $0x18] sm:$0xf] %v3782_v1  ;;  %1847 = vmatmul.mubr.bf16.vlgmr.msra.gmra.mxu0 %v1654_v0  ;;  %4050 = vmatmul.mubr.bf16.vlgmr.msra.gmra.mxu1 %v1654_v0  ;;  %v1704_v8 = vpop.f32.mrf.mxu0  ;;  %v5805_v55 = vpop.f32.mrf.mxu1  ;;  %v5866_v1 = vld [vmem:[#allocation8 + $0xf0] ss:$12 sps:$4 sm:$0xff]  }
 0x29a   :  { %1959 = vmatpush1.bf16.msra.mxu0 %v5807_v3  ;;  %4054 = vmatpush3.bf16.msra.mxu1 %v5810_v60  ;;  %v1754_v57 = vadd.f32 %v1704_v8, %v6757_v52  ;;  %v5869_v8 = vld [vmem:[#allocation8 + $0xf8] ss:$12 sps:$4 sm:$0xff]   ;;  %v5872_v52 = vld [vmem:[#allocation8 + $0xdc] ss:$12 sps:$4 sm:$0xff]  }
 0x29b   :  { %1960 = vmatprep.subr.bf16.mxu0 %v5814_v11  ;;  %4055 = vmatprep.subr.bf16.mxu1 %v6747_v61  ;;  %v1706_v5 = vpop.f32.mrf.mxu0  ;;  %v4031_v39 = vpop.f32.mrf.mxu1 }
 0x29c   :  { %1990 = vmatprep.mubr.bf16.mxu0 %v6748_v63  ;;  %4069 = vmatprep.mubr.msk.bf16.mxu1 %vm4998_vm0, %v6747_v61  ;;  %v3699_v62 = vmul.f32 -1.442695, %v1754_v57  ;;  %v1768_v9 = vadd.f32 %v1706_v5, %v5625_v6  ;;  %v5876_v39 = vld [vmem:[#allocation8 + $0xd8] ss:$12 sps:$4 sm:$0xff]  }
 0x29d   :  { %v1708_v7 = vpop.f32.mrf.mxu0  ;;  %v5821_v53 = vpop.f32.mrf.mxu1 }
 0x29e   :  { %1961 = vmatpush1.bf16.msra.mxu0 %v5823_v54  ;;  %4056 = vmatpush3.bf16.msra.mxu1 %v5826_v46  ;;  %4496 = vpow2.f32 %v3699_v62  ;;  %v1755_v13 = vadd.f32 %v1708_v7, %v6758_v51  ;;  %v3701_v6 = vmul.f32 -1.442695, %v1768_v9  ;;  %v5879_v62 = vld [vmem:[#allocation8 + $0xe0] ss:$12 sps:$4 sm:$0xff]   ;;  %v5882_v7 = vld [vmem:[#allocation8 + $0xc4] ss:$12 sps:$4 sm:$0xff]  }
 0x29f   :  { %1962 = vmatprep.subr.bf16.mxu0 %v5830_v14  ;;  %4057 = vmatprep.subr.bf16.mxu1 %v6747_v61  ;;  %v4032_v35 = vpop.f32.mrf.mxu1  ;;  %v1710_v25 = vpop.f32.mrf.mxu0  ;;  %6759 = vst [vmem:[#allocation22_spill] sm:$0xff] %v5882_v7 }
 0x2a0   :  { %v3700_v48 = vmul.f32 -1.442695, %v1755_v13  ;;  %v1769_v38 = vadd.f32 %v1710_v25, %v5631_v50  ;;  %v5859_v50 = vld [vmem:[#allocation8 + $0x110] ss:$12 sps:$4 sm:$0xff]   ;;  %v5886_v13 = vld [vmem:[#allocation8 + $0xc0] ss:$12 sps:$4 sm:$0xff]   ;;  %v1782_v25 = vadd.f32 %v5692_v26, %v5805_v55 }
 0x2a1   :  { %6760 = vst [vmem:[#allocation59_spill] sm:$0xff] %v5886_v13  ;;  %v5889_v35 = vld [vmem:[#allocation8 + $0xc8] ss:$12 sps:$4 sm:$0xff]  }
 0x2a2   :  { %1963 = vmatpush1.bf16.msra.mxu0 %v5835_v29  ;;  %4058 = vmatpush3.bf16.msra.mxu1 %v5838_v31  ;;  %4498 = vpow2.f32 %v3700_v48  ;;  %v3702_v4 = vmul.f32 -1.442695, %v1769_v38  ;;  %6761 = vst [vmem:[#allocation63_spill] sm:$0xff] %v5889_v35 }
 0x2a3   :  { %1964 = vmatprep.subr.bf16.mxu0 %v5841_v32  ;;  %4059 = vmatprep.subr.bf16.mxu1 %v6747_v61  ;;  %4500 = vpow2.f32 %v3701_v6 }
 0x2a4   :  { %4502 = vpow2.f32 %v3702_v4 }
 0x2a6   :  { %1965 = vmatpush1.bf16.msra.mxu0 %v5846_v30  ;;  %4060 = vmatpush3.bf16.msra.mxu1 %v5849_v37 }
 0x2a7   :  { %1966 = vmatprep.subr.bf16.mxu0 %v5852_v34  ;;  %4061 = vmatprep.subr.bf16.mxu1 %v6747_v61 }
 0x2aa   :  { %1967 = vmatpush1.bf16.msra.mxu0 %v5856_v33  ;;  %4062 = vmatpush3.bf16.msra.mxu1 %v5859_v50 }
 0x2ab   :  { %1968 = vmatprep.subr.bf16.mxu0 %v5862_v41  ;;  %4063 = vmatprep.subr.bf16.mxu1 %v6747_v61  ;;  %v4497_v43 = vpop.eup %4496 }
 0x2ac   :  { %v1762_v0 = vadd.f32 1.0, %v4497_v43 }
 0x2ae   :  { %1969 = vmatpush1.bf16.msra.mxu0 %v5866_v1  ;;  %4064 = vmatpush3.bf16.msra.mxu1 %v5869_v8  ;;  %4504 = vrcp.f32 %v1762_v0  ;;  %v1783_v0 = vadd.f32 %v5692_v26, %v5821_v53 }
 0x2af   :  { %1970 = vmatprep.subr.bf16.mxu0 %v5872_v52  ;;  %4065 = vmatprep.subr.bf16.mxu1 %v6747_v61  ;;  %v4499_v57 = vpop.eup %4498 }
 0x2b0   :  { %v1763_v5 = vadd.f32 1.0, %v4499_v57  ;;  %v4501_v51 = vpop.eup %4500 }
 0x2b1   :  { %v4503_v9 = vpop.eup %4502  ;;  %v1776_v48 = vadd.f32 1.0, %v4501_v51 }
 0x2b2   :  { %1971 = vmatpush1.bf16.msra.mxu0 %v5876_v39  ;;  %4066 = vmatpush3.bf16.msra.mxu1 %v5879_v62  ;;  %4506 = vrcp.f32 %v1763_v5  ;;  %v1777_v6 = vadd.f32 1.0, %v4503_v9 }
 0x2b3   :  { %1972 = vmatprep.subr.bf16.mxu0 %v5882_v7  ;;  %4067 = vmatprep.subr.bf16.mxu1 %v6747_v61  ;;  %4508 = vrcp.f32 %v1776_v48 }
 0x2b4   :  { %4510 = vrcp.f32 %v1777_v6 }
 0x2b6   :  { %1973 = vmatpush1.bf16.msra.mxu0 %v5886_v13  ;;  %4068 = vmatpush3.bf16.msra.mxu1 %v5889_v35 }
 0x2b7   :  { %2102 = vmatprep.subr.bf16.mxu0 %v5696_v28  ;;  %4073 = vmatprep.subr.bf16.mxu1 %v6747_v61 }
 0x2bb   :  { %v4505_v38 = vpop.eup %4504 }
 0x2bc   :  { %v1784_v4 = vmul.f32 %v4505_v38, %v1782_v25 }
 0x2be   :  { %v1786_v43 = vadd.f32 %v1784_v4, %v5628_v49 }
 0x2bf   :  { %v4507_v57 = vpop.eup %4506 }
 0x2c0   :  { %4512 = vtanh.f32 %v1786_v43  ;;  %v1785_v5 = vmul.f32 %v4507_v57, %v1783_v0  ;;  %v4509_v51 = vpop.eup %4508  ;;  %v5946_v43 = vld [vmem:[#allocation8 + $0x38] ss:$12 sps:$4 sm:$0xff]   ;;  %v5952_v0 = vld [vmem:[#allocation8 + $0x20] ss:$12 sps:$4 sm:$0xff]   ;;  %v5958_v57 = vld [vmem:[#allocation8 + $0x8] ss:$12 sps:$4 sm:$0xff]  }
 0x2c1   :  { %v4511_v35 = vpop.eup %4510  ;;  %v1790_v13 = vsub.f32 1.0, %v4509_v51  ;;  %v1794_v9 = vmul.f32 %v4509_v51, %v5707_v59  ;;  %v5913_v59 = vld [vmem:[#allocation8 + $0xb0] ss:$12 sps:$4 sm:$0xff]   ;;  %6762 = vst [vmem:[#allocation101_spill] sm:$0xff] %v5946_v43  ;;  %6763 = vst [vmem:[#allocation102_spill] sm:$0xff] %v5952_v0 }
 0x2c2   :  { %v1787_v28 = vadd.f32 %v1785_v5, %v5634_v44  ;;  %v1791_v48 = vsub.f32 1.0, %v4511_v35  ;;  %v1795_v53 = vmul.f32 %v4511_v35, %v5711_v40  ;;  %v5922_v40 = vld [vmem:[#allocation8 + $0x98] ss:$12 sps:$4 sm:$0xff]   ;;  %v5940_v35 = vld [vmem:[#allocation8 + $0x50] ss:$12 sps:$4 sm:$0xff]   ;;  %6764 = vst [vmem:[#allocation103_spill] sm:$0xff] %v5958_v57 }
 0x2c4   :  { %4514 = vtanh.f32 %v1787_v28 }
 0x2cd   :  { %v4513_v55 = vpop.eup %4512 }
 0x2ce   :  { %v1792_v7 = vmul.f32 %v4513_v55, %v1790_v13  ;;  %v5934_v13 = vld [vmem:[#allocation8 + $0x68] ss:$12 sps:$4 sm:$0xff]  }
 0x2cf   :  { %v6765_v55 = vld [vmem:[#allocation24_spill] sm:$0xff] }
 0x2d0   :  { %v5901_v25 = vadd.f32 %v1794_v9, %v1792_v7  ;;  %v5928_v7 = vld [vmem:[#allocation8 + $0x80] ss:$12 sps:$4 sm:$0xff]  }
 0x2d1   :  { %v4515_v49 = vpop.eup %4514 }
 0x2d2   :  { %v1793_v38 = vmul.f32 %v4515_v49, %v1791_v48  ;;  %v3783_v6 = vpack.c.bf16 %v5901_v25, %v5901_v25 }
 0x2d4   :  { %v5906_v4 = vadd.f32 %v1795_v53, %v1793_v38  ;;  %1806 = vst [vmem:[#allocation11 + $0x64] sm:$0xf] %v3783_v6 }
 0x2d6   :  { %v1798_v44 = vpack.c.bf16 %v5906_v4, %v5901_v25  ;;  %v3784_v28 = vpack.c.bf16 %v5906_v4, %v5906_v4 }
 0x2d8   :  { %1807 = vst [vmem:[#allocation11 + $0x6c] sm:$0xf] %v3784_v28  ;;  %1991 = vmatmul.mubr.bf16.vlgmr.msra.gmra.mxu0 %v1798_v44  ;;  %4070 = vmatmul.mubr.bf16.vlgmr.msra.gmra.mxu1 %v1798_v44  ;;  %v6766_v44 = vld [vmem:[#allocation28_spill] sm:$0xff] }
 0x2d9   :  { %2103 = vmatpush1.bf16.msra.mxu0 %v5717_v58  ;;  %4074 = vmatpush3.bf16.msra.mxu1 %v5913_v59 }
 0x2da   :  { %2104 = vmatprep.subr.bf16.mxu0 %v5721_v56  ;;  %4075 = vmatprep.subr.bf16.mxu1 %v6747_v61 }
 0x2db   :  { %2134 = vmatprep.mubr.bf16.mxu0 %v6748_v63  ;;  %4089 = vmatprep.mubr.msk.bf16.mxu1 %vm4998_vm0, %v6747_v61 }
 0x2dd   :  { %2105 = vmatpush1.bf16.msra.mxu0 %v5728_v47  ;;  %4076 = vmatpush3.bf16.msra.mxu1 %v5922_v40 }
 0x2de   :  { %2106 = vmatprep.subr.bf16.mxu0 %v5732_v16  ;;  %4077 = vmatprep.subr.bf16.mxu1 %v6747_v61 }
 0x2e1   :  { %2107 = vmatpush1.bf16.msra.mxu0 %v5736_v12  ;;  %4078 = vmatpush3.bf16.msra.mxu1 %v5928_v7 }
 0x2e2   :  { %2108 = vmatprep.subr.bf16.mxu0 %v5740_v36  ;;  %4079 = vmatprep.subr.bf16.mxu1 %v6747_v61 }
 0x2e5   :  { %2109 = vmatpush1.bf16.msra.mxu0 %v5744_v17  ;;  %4080 = vmatpush3.bf16.msra.mxu1 %v5934_v13 }
 0x2e6   :  { %2110 = vmatprep.subr.bf16.mxu0 %v5748_v15  ;;  %4081 = vmatprep.subr.bf16.mxu1 %v6747_v61 }
 0x2e9   :  { %2111 = vmatpush1.bf16.msra.mxu0 %v5752_v19  ;;  %4082 = vmatpush3.bf16.msra.mxu1 %v5940_v35 }
 0x2ea   :  { %2112 = vmatprep.subr.bf16.mxu0 %v5756_v18  ;;  %4083 = vmatprep.subr.bf16.mxu1 %v6747_v61 }
 0x2ed   :  { %2113 = vmatpush1.bf16.msra.mxu0 %v5760_v20  ;;  %4084 = vmatpush3.bf16.msra.mxu1 %v5946_v43 }
 0x2ee   :  { %2114 = vmatprep.subr.bf16.mxu0 %v5764_v21  ;;  %4085 = vmatprep.subr.bf16.mxu1 %v6747_v61 }
 0x2f1   :  { %2115 = vmatpush1.bf16.msra.mxu0 %v5768_v22  ;;  %4086 = vmatpush3.bf16.msra.mxu1 %v5952_v0 }
 0x2f2   :  { %2116 = vmatprep.subr.bf16.mxu0 %v5772_v24  ;;  %4087 = vmatprep.subr.bf16.mxu1 %v6747_v61  ;;  %v6767_v24 = vld [vmem:[#allocation26_spill] sm:$0xff] }
 0x2f5   :  { %2117 = vmatpush1.bf16.msra.mxu0 %v5776_v23  ;;  %4088 = vmatpush3.bf16.msra.mxu1 %v5958_v57 }
 0x2f6   :  { %2246 = vmatprep.subr.bf16.mxu0 %v5780_v27  ;;  %4093 = vmatprep.subr.bf16.mxu1 %v6747_v61  ;;  %v6768_v27 = vld [vmem:[#allocation30_spill] sm:$0xff] }
 0x2f7   :  { %v523_v21 = vadd.f32 %v6768_v27, %v5359_v2 }
 0x359   :  { %v1848_v5 = vpop.f32.mrf.mxu0  ;;  %v1891_v51 = vpop.f32.mrf.mxu1 }
 0x35a   :  { %v1898_v9 = vadd.f32 %v1848_v5, %v6765_v55 }
 0x35b   :  { %v1850_v48 = vpop.f32.mrf.mxu0  ;;  %v4051_v49 = vpop.f32.mrf.mxu1 }
 0x35c   :  { %v3705_v38 = vmul.f32 -1.442695, %v1898_v9  ;;  %v1912_v0 = vadd.f32 %v1850_v48, %v6767_v24  ;;  %v1926_v48 = vadd.f32 %v5589_v10, %v1891_v51 }
 0x35d   :  { %v1852_v53 = vpop.f32.mrf.mxu0  ;;  %v1894_v6 = vpop.f32.mrf.mxu1 }
 0x35e   :  { %4516 = vpow2.f32 %v3705_v38  ;;  %v1899_v28 = vadd.f32 %v1852_v53, %v6766_v44  ;;  %v3707_v20 = vmul.f32 -1.442695, %v1912_v0  ;;  %v6770_v0 = vld [vmem:[#allocation29_spill] sm:$0xff] }
 0x35f   :  { %v4052_v23 = vpop.f32.mrf.mxu1  ;;  %v1854_v22 = vpop.f32.mrf.mxu0 }
 0x360   :  { %v3706_v57 = vmul.f32 -1.442695, %v1899_v28  ;;  %v1913_v43 = vadd.f32 %v1854_v22, %v523_v21  ;;  %v6769_v21 = vld [vmem:[#allocation25_spill] sm:$0xff] }
 0x362   :  { %4518 = vpow2.f32 %v3706_v57  ;;  %v3708_v5 = vmul.f32 -1.442695, %v1913_v43 }
 0x363   :  { %4520 = vpow2.f32 %v3707_v20  ;;  %v1927_v20 = vadd.f32 %v5589_v10, %v1894_v6 }
 0x364   :  { %4522 = vpow2.f32 %v3708_v5 }
 0x36b   :  { %v4517_v55 = vpop.eup %4516 }
 0x36c   :  { %v1906_v9 = vadd.f32 1.0, %v4517_v55 }
 0x36e   :  { %4524 = vrcp.f32 %v1906_v9 }
 0x36f   :  { %v4519_v49 = vpop.eup %4518 }
 0x370   :  { %v1907_v38 = vadd.f32 1.0, %v4519_v49  ;;  %v4521_v23 = vpop.eup %4520 }
 0x371   :  { %v4523_v53 = vpop.eup %4522  ;;  %v1920_v24 = vadd.f32 1.0, %v4521_v23 }
 0x372   :  { %4526 = vrcp.f32 %v1907_v38  ;;  %v1921_v28 = vadd.f32 1.0, %v4523_v53 }
 0x373   :  { %4528 = vrcp.f32 %v1920_v24 }
 0x374   :  { %4530 = vrcp.f32 %v1921_v28 }
 0x37b   :  { %v4525_v44 = vpop.eup %4524 }
 0x37c   :  { %v1928_v2 = vmul.f32 %v4525_v44, %v1926_v48 }
 0x37e   :  { %v1930_v22 = vadd.f32 %v1928_v2, %v6769_v21 }
 0x37f   :  { %v4527_v27 = vpop.eup %4526 }
 0x380   :  { %4532 = vtanh.f32 %v1930_v22  ;;  %v1929_v43 = vmul.f32 %v4527_v27, %v1927_v20  ;;  %v4529_v5 = vpop.eup %4528 }
 0x381   :  { %v4531_v55 = vpop.eup %4530  ;;  %v1934_v9 = vsub.f32 1.0, %v4529_v5  ;;  %v1938_v38 = vmul.f32 %v4529_v5, %v5794_v42  ;;  %v6772_v5 = vld [vmem:[#allocation55_spill] sm:$0xff] }
 0x382   :  { %v1931_v57 = vadd.f32 %v1929_v43, %v6770_v0  ;;  %v1935_v23 = vsub.f32 1.0, %v4531_v55  ;;  %v1939_v10 = vmul.f32 %v4531_v55, %v5799_v45  ;;  %v6771_v45 = vld [vmem:[#allocation51_spill] sm:$0xff] }
 0x384   :  { %4534 = vtanh.f32 %v1931_v57 }
 0x38d   :  { %v4533_v49 = vpop.eup %4532 }
 0x38e   :  { %v1936_v51 = vmul.f32 %v4533_v49, %v1934_v9  ;;  %v6773_v49 = vld [vmem:[#allocation90_spill] sm:$0xff] }
 0x390   :  { %v5973_v53 = vadd.f32 %v1938_v38, %v1936_v51 }
 0x391   :  { %v4535_v24 = vpop.eup %4534 }
 0x392   :  { %v1937_v48 = vmul.f32 %v4535_v24, %v1935_v23  ;;  %v3785_v6 = vpack.c.bf16 %v5973_v53, %v5973_v53  ;;  %v6774_v24 = vld [vmem:[#allocation92_spill] sm:$0xff] }
 0x394   :  { %v5978_v44 = vadd.f32 %v1939_v10, %v1937_v48  ;;  %1950 = vst [vmem:[#allocation11 + $0x20] sm:$0xf] %v3785_v6 }
 0x396   :  { %v1942_v28 = vpack.c.bf16 %v5978_v44, %v5973_v53  ;;  %v3786_v2 = vpack.c.bf16 %v5978_v44, %v5978_v44 }
 0x398   :  { %1951 = vst [vmem:[#allocation11 + $0x28] sm:$0xf] %v3786_v2  ;;  %2135 = vmatmul.mubr.bf16.vlgmr.msra.gmra.mxu0 %v1942_v28  ;;  %4090 = vmatmul.mubr.bf16.vlgmr.msra.gmra.mxu1 %v1942_v28  ;;  %v1992_v42 = vpop.f32.mrf.mxu0  ;;  %v2035_v21 = vpop.f32.mrf.mxu1 }
 0x399   :  { %2247 = vmatpush1.bf16.msra.mxu0 %v5807_v3  ;;  %4094 = vmatpush3.bf16.msra.mxu1 %v5810_v60  ;;  %v2042_v22 = vadd.f32 %v1992_v42, %v6771_v45 }
 0x39a   :  { %2248 = vmatprep.subr.bf16.mxu0 %v5814_v11  ;;  %4095 = vmatprep.subr.bf16.mxu1 %v6747_v61  ;;  %v1994_v20 = vpop.f32.mrf.mxu0  ;;  %v4071_v27 = vpop.f32.mrf.mxu1 }
 0x39b   :  { %2278 = vmatprep.mubr.bf16.mxu0 %v6748_v63  ;;  %4109 = vmatprep.mubr.msk.bf16.mxu1 %vm4998_vm0, %v6747_v61  ;;  %v3711_v43 = vmul.f32 -1.442695, %v2042_v22  ;;  %v2056_v51 = vadd.f32 %v1994_v20, %v6773_v49  ;;  %v6775_v22 = vld [vmem:[#allocation22_spill] sm:$0xff]  ;;  %v6776_v27 = vld [vmem:[#allocation59_spill] sm:$0xff] }
 0x39c   :  { %v1996_v0 = vpop.f32.mrf.mxu0  ;;  %v2038_v57 = vpop.f32.mrf.mxu1 }
 0x39d   :  { %2249 = vmatpush1.bf16.msra.mxu0 %v5823_v54  ;;  %4096 = vmatpush3.bf16.msra.mxu1 %v5826_v46  ;;  %4536 = vpow2.f32 %v3711_v43  ;;  %v2043_v55 = vadd.f32 %v1996_v0, %v6772_v5  ;;  %v3713_v10 = vmul.f32 -1.442695, %v2056_v51  ;;  %v6777_v43 = vld [vmem:[#allocation63_spill] sm:$0xff]  ;;  %v6778_v0 = vld [vmem:[#allocation94_spill] sm:$0xff] }
 0x39e   :  { %2250 = vmatprep.subr.bf16.mxu0 %v5830_v14  ;;  %4097 = vmatprep.subr.bf16.mxu1 %v6747_v61  ;;  %v4072_v9 = vpop.f32.mrf.mxu1  ;;  %v1998_v23 = vpop.f32.mrf.mxu0 }
 0x39f   :  { %v3712_v38 = vmul.f32 -1.442695, %v2043_v55  ;;  %v2057_v48 = vadd.f32 %v1998_v23, %v6774_v24  ;;  %v2070_v9 = vadd.f32 %v5692_v26, %v2035_v21  ;;  %v6779_v23 = vld [vmem:[#allocation91_spill] sm:$0xff] }
 0x3a1   :  { %2251 = vmatpush1.bf16.msra.mxu0 %v5835_v29  ;;  %4098 = vmatpush3.bf16.msra.mxu1 %v5838_v31  ;;  %4538 = vpow2.f32 %v3712_v38  ;;  %v3714_v6 = vmul.f32 -1.442695, %v2057_v48  ;;  %v2071_v48 = vadd.f32 %v5692_v26, %v2038_v57 }
 0x3a2   :  { %2252 = vmatprep.subr.bf16.mxu0 %v5841_v32  ;;  %4099 = vmatprep.subr.bf16.mxu1 %v6747_v61  ;;  %4540 = vpow2.f32 %v3713_v10 }
 0x3a3   :  { %4542 = vpow2.f32 %v3714_v6 }
 0x3a5   :  { %2253 = vmatpush1.bf16.msra.mxu0 %v5846_v30  ;;  %4100 = vmatpush3.bf16.msra.mxu1 %v5849_v37 }
 0x3a6   :  { %2254 = vmatprep.subr.bf16.mxu0 %v5852_v34  ;;  %4101 = vmatprep.subr.bf16.mxu1 %v6747_v61 }
 0x3a9   :  { %2255 = vmatpush1.bf16.msra.mxu0 %v5856_v33  ;;  %4102 = vmatpush3.bf16.msra.mxu1 %v5859_v50 }
 0x3aa   :  { %2256 = vmatprep.subr.bf16.mxu0 %v5862_v41  ;;  %4103 = vmatprep.subr.bf16.mxu1 %v6747_v61  ;;  %v4537_v28 = vpop.eup %4536 }
 0x3ab   :  { %v2050_v2 = vadd.f32 1.0, %v4537_v28  ;;  %v6780_v28 = vld [vmem:[#allocation93_spill] sm:$0xff] }
 0x3ad   :  { %2257 = vmatpush1.bf16.msra.mxu0 %v5866_v1  ;;  %4104 = vmatpush3.bf16.msra.mxu1 %v5869_v8  ;;  %4544 = vrcp.f32 %v2050_v2 }
 0x3ae   :  { %2258 = vmatprep.subr.bf16.mxu0 %v5872_v52  ;;  %4105 = vmatprep.subr.bf16.mxu1 %v6747_v61  ;;  %v4539_v42 = vpop.eup %4538 }
 0x3af   :  { %v2051_v45 = vadd.f32 1.0, %v4539_v42  ;;  %v4541_v20 = vpop.eup %4540 }
 0x3b0   :  { %v4543_v5 = vpop.eup %4542  ;;  %v2064_v55 = vadd.f32 1.0, %v4541_v20 }
 0x3b1   :  { %2259 = vmatpush1.bf16.msra.mxu0 %v5876_v39  ;;  %4106 = vmatpush3.bf16.msra.mxu1 %v5879_v62  ;;  %4546 = vrcp.f32 %v2051_v45  ;;  %v2065_v51 = vadd.f32 1.0, %v4543_v5 }
 0x3b2   :  { %2260 = vmatprep.subr.bf16.mxu0 %v6775_v22  ;;  %4107 = vmatprep.subr.bf16.mxu1 %v6747_v61  ;;  %4548 = vrcp.f32 %v2064_v55 }
 0x3b3   :  { %4550 = vrcp.f32 %v2065_v51 }
 0x3b5   :  { %2261 = vmatpush1.bf16.msra.mxu0 %v6776_v27  ;;  %4108 = vmatpush3.bf16.msra.mxu1 %v6777_v43 }
 0x3b6   :  { %2390 = vmatprep.subr.bf16.mxu0 %v6778_v0  ;;  %4113 = vmatprep.subr.bf16.mxu1 %v6747_v61 }
 0x3ba   :  { %v4545_v49 = vpop.eup %4544 }
 0x3bb   :  { %v2072_v38 = vmul.f32 %v4545_v49, %v2070_v9 }
 0x3bd   :  { %v2074_v24 = vadd.f32 %v2072_v38, %v6779_v23 }
 0x3be   :  { %v4547_v10 = vpop.eup %4546 }
 0x3bf   :  { %4552 = vtanh.f32 %v2074_v24  ;;  %v2073_v6 = vmul.f32 %v4547_v10, %v2071_v48  ;;  %v4549_v42 = vpop.eup %4548 }
 0x3c0   :  { %v4551_v45 = vpop.eup %4550  ;;  %v2078_v20 = vsub.f32 1.0, %v4549_v42  ;;  %v2082_v5 = vmul.f32 %v4549_v42, %v5901_v25 }
 0x3c1   :  { %v2075_v2 = vadd.f32 %v2073_v6, %v6780_v28  ;;  %v2079_v9 = vsub.f32 1.0, %v4551_v45  ;;  %v2083_v26 = vmul.f32 %v4551_v45, %v5906_v4  ;;  %v6790_v4 = vld [vmem:[#allocation32_spill] sm:$0xff] }
 0x3c2   :  { %v6791_v45 = vld [vmem:[#allocation36_spill] sm:$0xff] }
 0x3c3   :  { %4554 = vtanh.f32 %v2075_v2 }
 0x3cc   :  { %v4553_v0 = vpop.eup %4552 }
 0x3cd   :  { %v2080_v21 = vmul.f32 %v4553_v0, %v2078_v20 }
 0x3cf   :  { %v6028_v55 = vadd.f32 %v2082_v5, %v2080_v21  ;;  %v6792_v21 = vld [vmem:[#allocation34_spill] sm:$0xff] }
 0x3d0   :  { %v4555_v49 = vpop.eup %4554 }
 0x3d1   :  { %v2081_v38 = vmul.f32 %v4555_v49, %v2079_v9  ;;  %v3787_v57 = vpack.c.bf16 %v6028_v55, %v6028_v55 }
 0x3d3   :  { %v6033_v51 = vadd.f32 %v2083_v26, %v2081_v38  ;;  %2094 = vst [vmem:[#allocation11 + $0x54] sm:$0xf] %v3787_v57  ;;  %v6793_v38 = vld [vmem:[#allocation38_spill] sm:$0xff] }
 0x3d5   :  { %v2086_v23 = vpack.c.bf16 %v6033_v51, %v6028_v55  ;;  %v3788_v24 = vpack.c.bf16 %v6033_v51, %v6033_v51 }
 0x3d7   :  { %2095 = vst [vmem:[#allocation11 + $0x5c] sm:$0xf] %v3788_v24  ;;  %2279 = vmatmul.mubr.bf16.vlgmr.msra.gmra.mxu0 %v2086_v23  ;;  %4110 = vmatmul.mubr.bf16.vlgmr.msra.gmra.mxu1 %v2086_v23 }
 0x3d8   :  { %2391 = vmatpush1.bf16.msra.mxu0 %v5717_v58  ;;  %4114 = vmatpush3.bf16.msra.mxu1 %v5913_v59  ;;  %v6781_v58 = vld [vmem:[#allocation95_spill] sm:$0xff] }
 0x3d9   :  { %2392 = vmatprep.subr.bf16.mxu0 %v5721_v56  ;;  %4115 = vmatprep.subr.bf16.mxu1 %v6747_v61  ;;  %v6782_v56 = vld [vmem:[#allocation101_spill] sm:$0xff] }
 0x3da   :  { %2422 = vmatprep.mubr.bf16.mxu0 %v6748_v63  ;;  %4129 = vmatprep.mubr.msk.bf16.mxu1 %vm4998_vm0, %v6747_v61 }
 0x3dc   :  { %2393 = vmatpush1.bf16.msra.mxu0 %v5728_v47  ;;  %4116 = vmatpush3.bf16.msra.mxu1 %v5922_v40  ;;  %v6783_v47 = vld [vmem:[#allocation96_spill] sm:$0xff] }
 0x3dd   :  { %2394 = vmatprep.subr.bf16.mxu0 %v5732_v16  ;;  %4117 = vmatprep.subr.bf16.mxu1 %v6747_v61  ;;  %v6784_v16 = vld [vmem:[#allocation97_spill] sm:$0xff] }
 0x3e0   :  { %2395 = vmatpush1.bf16.msra.mxu0 %v5736_v12  ;;  %4118 = vmatpush3.bf16.msra.mxu1 %v5928_v7  ;;  %v6785_v12 = vld [vmem:[#allocation102_spill] sm:$0xff] }
 0x3e1   :  { %2396 = vmatprep.subr.bf16.mxu0 %v5740_v36  ;;  %4119 = vmatprep.subr.bf16.mxu1 %v6747_v61  ;;  %v6786_v36 = vld [vmem:[#allocation98_spill] sm:$0xff] }
 0x3e4   :  { %2397 = vmatpush1.bf16.msra.mxu0 %v5744_v17  ;;  %4120 = vmatpush3.bf16.msra.mxu1 %v5934_v13  ;;  %v6787_v17 = vld [vmem:[#allocation99_spill] sm:$0xff] }
 0x3e5   :  { %2398 = vmatprep.subr.bf16.mxu0 %v5748_v15  ;;  %4121 = vmatprep.subr.bf16.mxu1 %v6747_v61  ;;  %v6788_v15 = vld [vmem:[#allocation103_spill] sm:$0xff] }
 0x3e8   :  { %2399 = vmatpush1.bf16.msra.mxu0 %v5752_v19  ;;  %4122 = vmatpush3.bf16.msra.mxu1 %v5940_v35  ;;  %v6789_v19 = vld [vmem:[#allocation100_spill] sm:$0xff] }
 0x3e9   :  { %2400 = vmatprep.subr.bf16.mxu0 %v5756_v18  ;;  %4123 = vmatprep.subr.bf16.mxu1 %v6747_v61 }
 0x3ec   :  { %2401 = vmatpush1.bf16.msra.mxu0 %v6781_v58  ;;  %4124 = vmatpush3.bf16.msra.mxu1 %v6782_v56 }
 0x3ed   :  { %2402 = vmatprep.subr.bf16.mxu0 %v6783_v47  ;;  %4125 = vmatprep.subr.bf16.mxu1 %v6747_v61 }
 0x3f0   :  { %2403 = vmatpush1.bf16.msra.mxu0 %v6784_v16  ;;  %4126 = vmatpush3.bf16.msra.mxu1 %v6785_v12 }
 0x3f1   :  { %2404 = vmatprep.subr.bf16.mxu0 %v6786_v36  ;;  %4127 = vmatprep.subr.bf16.mxu1 %v6747_v61 }
 0x3f4   :  { %2405 = vmatpush1.bf16.msra.mxu0 %v6787_v17  ;;  %4128 = vmatpush3.bf16.msra.mxu1 %v6788_v15 }
 0x3f5   :  { %2534 = vmatprep.subr.bf16.mxu0 %v6789_v19  ;;  %4133 = vmatprep.subr.bf16.mxu1 %v6747_v61 }
 0x458   :  { %v2136_v18 = vpop.f32.mrf.mxu0  ;;  %v2179_v25 = vpop.f32.mrf.mxu1 }
 0x459   :  { %v2186_v48 = vadd.f32 %v2136_v18, %v6790_v4  ;;  %v6081_v18 = vld [vmem:[%s6632_s4] ss:$0 sm:$0xff] }
 0x45a   :  { %v2138_v10 = vpop.f32.mrf.mxu0  ;;  %v4091_v6 = vpop.f32.mrf.mxu1  ;;  %v2214_v4 = vadd.f32 %v6081_v18, %v2179_v25 }
 0x45b   :  { %v3717_v28 = vmul.f32 -1.442695, %v2186_v48  ;;  %v2200_v5 = vadd.f32 %v2138_v10, %v6792_v21  ;;  %v6795_v21 = vld [vmem:[#allocation37_spill] sm:$0xff] }
 0x45c   :  { %v2140_v2 = vpop.f32.mrf.mxu0  ;;  %v2182_v42 = vpop.f32.mrf.mxu1 }
 0x45d   :  { %4556 = vpow2.f32 %v3717_v28  ;;  %v2187_v20 = vadd.f32 %v2140_v2, %v6791_v45  ;;  %v3719_v57 = vmul.f32 -1.442695, %v2200_v5  ;;  %v6794_v28 = vld [vmem:[#allocation33_spill] sm:$0xff]  ;;  %v2215_v45 = vadd.f32 %v6081_v18, %v2182_v42 }
 0x45e   :  { %v4092_v0 = vpop.f32.mrf.mxu1  ;;  %v2142_v49 = vpop.f32.mrf.mxu0 }
 0x45f   :  { %v3718_v9 = vmul.f32 -1.442695, %v2187_v20  ;;  %v2201_v26 = vadd.f32 %v2142_v49, %v6793_v38 }
 0x461   :  { %4558 = vpow2.f32 %v3718_v9  ;;  %v3720_v23 = vmul.f32 -1.442695, %v2201_v26 }
 0x462   :  { %4560 = vpow2.f32 %v3719_v57 }
 0x463   :  { %4562 = vpow2.f32 %v3720_v23 }
 0x46a   :  { %v4557_v24 = vpop.eup %4556 }
 0x46b   :  { %v2194_v58 = vadd.f32 1.0, %v4557_v24 }
 0x46d   :  { %4564 = vrcp.f32 %v2194_v58 }
 0x46e   :  { %v4559_v47 = vpop.eup %4558 }
 0x46f   :  { %v2195_v16 = vadd.f32 1.0, %v4559_v47  ;;  %v4561_v36 = vpop.eup %4560 }
 0x470   :  { %v4563_v17 = vpop.eup %4562  ;;  %v2208_v19 = vadd.f32 1.0, %v4561_v36 }
 0x471   :  { %4566 = vrcp.f32 %v2195_v16  ;;  %v2209_v10 = vadd.f32 1.0, %v4563_v17 }
 0x472   :  { %4568 = vrcp.f32 %v2208_v19 }
 0x473   :  { %4570 = vrcp.f32 %v2209_v10 }
 0x47a   :  { %v4565_v48 = vpop.eup %4564 }
 0x47b   :  { %v2216_v6 = vmul.f32 %v4565_v48, %v2214_v4 }
 0x47d   :  { %v2218_v2 = vadd.f32 %v2216_v6, %v6794_v28 }
 0x47e   :  { %v4567_v20 = vpop.eup %4566 }
 0x47f   :  { %4572 = vtanh.f32 %v2218_v2  ;;  %v2217_v0 = vmul.f32 %v4567_v20, %v2215_v45  ;;  %v4569_v9 = vpop.eup %4568  ;;  %v6798_v20 = vld [vmem:[#allocation86_spill] sm:$0xff] }
 0x480   :  { %v4571_v49 = vpop.eup %4570  ;;  %v2222_v38 = vsub.f32 1.0, %v4569_v9  ;;  %v2226_v57 = vmul.f32 %v4569_v9, %v5973_v53 }
 0x481   :  { %v2219_v5 = vadd.f32 %v2217_v0, %v6795_v21  ;;  %v2223_v23 = vsub.f32 1.0, %v4571_v49  ;;  %v2227_v42 = vmul.f32 %v4571_v49, %v5978_v44  ;;  %v6796_v44 = vld [vmem:[#allocation43_spill] sm:$0xff] }
 0x483   :  { %4574 = vtanh.f32 %v2219_v5 }
 0x48c   :  { %v4573_v26 = vpop.eup %4572 }
 0x48d   :  { %v2224_v25 = vmul.f32 %v4573_v26, %v2222_v38  ;;  %v6802_v38 = vld [vmem:[#allocation89_spill] sm:$0xff] }
 0x48f   :  { %v6088_v24 = vadd.f32 %v2226_v57, %v2224_v25 }
 0x490   :  { %v4575_v58 = vpop.eup %4574 }
 0x491   :  { %v2225_v47 = vmul.f32 %v4575_v58, %v2223_v23  ;;  %v3789_v16 = vpack.c.bf16 %v6088_v24, %v6088_v24 }
 0x493   :  { %v6093_v36 = vadd.f32 %v2227_v42, %v2225_v47  ;;  %2238 = vst [vmem:[#allocation11 + $0x30] sm:$0xf] %v3789_v16 }
 0x495   :  { %v2230_v17 = vpack.c.bf16 %v6093_v36, %v6088_v24  ;;  %v3790_v19 = vpack.c.bf16 %v6093_v36, %v6093_v36 }
 0x497   :  { %2239 = vst [vmem:[#allocation11 + $0x38] sm:$0xf] %v3790_v19  ;;  %2423 = vmatmul.mubr.bf16.vlgmr.msra.gmra.mxu0 %v2230_v17  ;;  %4130 = vmatmul.mubr.bf16.vlgmr.msra.gmra.mxu1 %v2230_v17  ;;  %v2280_v53 = vpop.f32.mrf.mxu0  ;;  %v6099_v4 = vpop.f32.mrf.mxu1 }
 0x498   :  { %2535 = vmatpush1.bf16.msra.mxu0 %v5807_v3  ;;  %4134 = vmatpush3.bf16.msra.mxu1 %v5810_v60  ;;  %v2330_v48 = vadd.f32 %v2280_v53, %v6796_v44  ;;  %v6797_v3 = vld [vmem:[#allocation47_spill] sm:$0xff] }
 0x499   :  { %2536 = vmatprep.subr.bf16.mxu0 %v5814_v11  ;;  %4135 = vmatprep.subr.bf16.mxu1 %v6747_v61  ;;  %v2282_v10 = vpop.f32.mrf.mxu0  ;;  %v4111_v6 = vpop.f32.mrf.mxu1 }
 0x49a   :  { %2566 = vmatprep.mubr.bf16.mxu0 %v6748_v63  ;;  %4149 = vmatprep.mubr.msk.bf16.mxu1 %vm4998_vm0, %v6747_v61  ;;  %v3723_v28 = vmul.f32 -1.442695, %v2330_v48  ;;  %v2344_v0 = vadd.f32 %v2282_v10, %v6798_v20  ;;  %v6215_v20 = vld [vmem:[#allocation8 + $0x18] ss:$12 sps:$4 sm:$0xff]  }
 0x49b   :  { %v2284_v2 = vpop.f32.mrf.mxu0  ;;  %v2326_v45 = vpop.f32.mrf.mxu1  ;;  %6805 = vst [vmem:[#allocation30_spill] sm:$0xff] %v6215_v20 }
 0x49c   :  { %2537 = vmatpush1.bf16.msra.mxu0 %v5823_v54  ;;  %4136 = vmatpush3.bf16.msra.mxu1 %v5826_v46  ;;  %4576 = vpow2.f32 %v3723_v28  ;;  %v2331_v60 = vadd.f32 %v2284_v2, %v6797_v3  ;;  %v6799_v54 = vld [vmem:[#allocation88_spill] sm:$0xff]  ;;  %v3725_v9 = vmul.f32 -1.442695, %v2344_v0  ;;  %v6179_v2 = vld [vmem:[#allocation8 + $0x7c] ss:$12 sps:$4 sm:$0xff]  }
 0x49d   :  { %2538 = vmatprep.subr.bf16.mxu0 %v5830_v14  ;;  %4137 = vmatprep.subr.bf16.mxu1 %v6747_v61  ;;  %v4112_v11 = vpop.f32.mrf.mxu1  ;;  %v2286_v5 = vpop.f32.mrf.mxu0  ;;  %v6175_v28 = vld [vmem:[#allocation8 + $0x90] ss:$12 sps:$4 sm:$0xff]   ;;  %v6191_v3 = vld [vmem:[#allocation8 + $0x60] ss:$12 sps:$4 sm:$0xff]  }
 0x49e   :  { %v3724_v21 = vmul.f32 -1.442695, %v2331_v60  ;;  %v2345_v46 = vadd.f32 %v2286_v5, %v6799_v54  ;;  %v6199_v60 = vld [vmem:[#allocation8 + $0x48] ss:$12 sps:$4 sm:$0xff]   ;;  %v6207_v11 = vld [vmem:[#allocation8 + $0x30] ss:$12 sps:$4 sm:$0xff]  }
 0x49f   :  { %6803 = vst [vmem:[#allocation28_spill] sm:$0xff] %v6207_v11  ;;  %v6223_v0 = vld [vmem:[#allocation8] ss:$12 sps:$4 sm:$0xff]  }
 0x4a0   :  { %2539 = vmatpush1.bf16.msra.mxu0 %v5835_v29  ;;  %4138 = vmatpush3.bf16.msra.mxu1 %v5838_v31  ;;  %4578 = vpow2.f32 %v3724_v21  ;;  %v3726_v14 = vmul.f32 -1.442695, %v2345_v46  ;;  %6807 = vst [vmem:[#allocation29_spill] sm:$0xff] %v6223_v0  ;;  %v6809_v5 = vld [vmem:[#allocation40_spill] sm:$0xff] }
 0x4a1   :  { %2540 = vmatprep.subr.bf16.mxu0 %v5841_v32  ;;  %4139 = vmatprep.subr.bf16.mxu1 %v6747_v61  ;;  %4580 = vpow2.f32 %v3725_v9 }
 0x4a2   :  { %4582 = vpow2.f32 %v3726_v14 }
 0x4a4   :  { %2541 = vmatpush1.bf16.msra.mxu0 %v5846_v30  ;;  %4140 = vmatpush3.bf16.msra.mxu1 %v5849_v37 }
 0x4a5   :  { %2542 = vmatprep.subr.bf16.mxu0 %v5852_v34  ;;  %4141 = vmatprep.subr.bf16.mxu1 %v6747_v61  ;;  %v6138_v34 = vld [vmem:[#allocation8 + $0xac] ss:$12 sps:$4 sm:$0xff]  }
 0x4a6   :  { %6800 = vst [vmem:[#allocation24_spill] sm:$0xff] %v6138_v34 }
 0x4a8   :  { %2543 = vmatpush1.bf16.msra.mxu0 %v5856_v33  ;;  %4142 = vmatpush3.bf16.msra.mxu1 %v5859_v50 }
 0x4a9   :  { %2544 = vmatprep.subr.bf16.mxu0 %v5862_v41  ;;  %4143 = vmatprep.subr.bf16.mxu1 %v6747_v61  ;;  %v4577_v29 = vpop.eup %4576  ;;  %v6145_v41 = vld [vmem:[%s6632_s4 + $0x1] ss:$0 sm:$0xff] }
 0x4aa   :  { %v2338_v31 = vadd.f32 1.0, %v4577_v29 }
 0x4ac   :  { %2545 = vmatpush1.bf16.msra.mxu0 %v5866_v1  ;;  %4144 = vmatpush3.bf16.msra.mxu1 %v5869_v8  ;;  %4584 = vrcp.f32 %v2338_v31  ;;  %v2358_v1 = vadd.f32 %v6145_v41, %v6099_v4 }
 0x4ad   :  { %2546 = vmatprep.subr.bf16.mxu0 %v5872_v52  ;;  %4145 = vmatprep.subr.bf16.mxu1 %v6747_v61  ;;  %v4579_v32 = vpop.eup %4578 }
 0x4ae   :  { %v2339_v30 = vadd.f32 1.0, %v4579_v32  ;;  %v4581_v37 = vpop.eup %4580  ;;  %v6810_v32 = vld [vmem:[#allocation44_spill] sm:$0xff] }
 0x4af   :  { %v4583_v33 = vpop.eup %4582  ;;  %v2352_v50 = vadd.f32 1.0, %v4581_v37 }
 0x4b0   :  { %2547 = vmatpush1.bf16.msra.mxu0 %v5876_v39  ;;  %4146 = vmatpush3.bf16.msra.mxu1 %v5879_v62  ;;  %4586 = vrcp.f32 %v2339_v30  ;;  %v2353_v52 = vadd.f32 1.0, %v4583_v33  ;;  %v6801_v62 = vld [vmem:[#allocation87_spill] sm:$0xff] }
 0x4b1   :  { %2548 = vmatprep.subr.bf16.mxu0 %v6775_v22  ;;  %4147 = vmatprep.subr.bf16.mxu1 %v6747_v61  ;;  %4588 = vrcp.f32 %v2352_v50 }
 0x4b2   :  { %4590 = vrcp.f32 %v2353_v52 }
 0x4b4   :  { %2549 = vmatpush1.bf16.msra.mxu0 %v6776_v27  ;;  %4148 = vmatpush3.bf16.msra.mxu1 %v6777_v43  ;;  %v2359_v27 = vadd.f32 %v6145_v41, %v2326_v45  ;;  %v6187_v45 = vld [vmem:[#allocation8 + $0x64] ss:$12 sps:$4 sm:$0xff]  }
 0x4b5   :  { %2678 = vmatprep.subr.bf16.mxu0 %v6138_v34  ;;  %4153 = vmatprep.subr.bf16.mxu1 %v6747_v61 }
 0x4b9   :  { %v4585_v8 = vpop.eup %4584 }
 0x4ba   :  { %v2360_v39 = vmul.f32 %v4585_v8, %v2358_v1  ;;  %v6812_v8 = vld [vmem:[#allocation46_spill] sm:$0xff] }
 0x4bc   :  { %v2362_v22 = vadd.f32 %v2360_v39, %v6801_v62 }
 0x4bd   :  { %v4587_v43 = vpop.eup %4586 }
 0x4be   :  { %4592 = vtanh.f32 %v2362_v22  ;;  %v2361_v49 = vmul.f32 %v4587_v43, %v2359_v27  ;;  %v4589_v25 = vpop.eup %4588 }
 0x4bf   :  { %v4591_v57 = vpop.eup %4590  ;;  %v2366_v23 = vsub.f32 1.0, %v4589_v25  ;;  %v2370_v42 = vmul.f32 %v4589_v25, %v6028_v55  ;;  %v6164_v55 = vld [vmem:[#allocation8 + $0xa8] ss:$12 sps:$4 sm:$0xff]  }
 0x4c0   :  { %v2363_v26 = vadd.f32 %v2361_v49, %v6802_v38  ;;  %v2367_v16 = vsub.f32 1.0, %v4591_v57  ;;  %v2371_v4 = vmul.f32 %v4591_v57, %v6033_v51  ;;  %v6168_v51 = vld [vmem:[#allocation8 + $0x94] ss:$12 sps:$4 sm:$0xff]  }
 0x4c2   :  { %4594 = vtanh.f32 %v2363_v26 }
 0x4cb   :  { %v4593_v58 = vpop.eup %4592 }
 0x4cc   :  { %v2368_v47 = vmul.f32 %v4593_v58, %v2366_v23 }
 0x4ce   :  { %v6153_v17 = vadd.f32 %v2370_v42, %v2368_v47  ;;  %v6813_v42 = vld [vmem:[#allocation41_spill] sm:$0xff] }
 0x4cf   :  { %v4595_v19 = vpop.eup %4594 }
 0x4d0   :  { %v2369_v53 = vmul.f32 %v4595_v19, %v2367_v16  ;;  %v3791_v44 = vpack.c.bf16 %v6153_v17, %v6153_v17 }
 0x4d2   :  { %v6158_v48 = vadd.f32 %v2371_v4, %v2369_v53  ;;  %2382 = vst [vmem:[#allocation11 + $0x44] sm:$0xf] %v3791_v44  ;;  %v6814_v44 = vld [vmem:[#allocation45_spill] sm:$0xff] }
 0x4d4   :  { %v2374_v10 = vpack.c.bf16 %v6158_v48, %v6153_v17  ;;  %v3792_v6 = vpack.c.bf16 %v6158_v48, %v6158_v48 }
 0x4d6   :  { %2383 = vst [vmem:[#allocation11 + $0x4c] sm:$0xf] %v3792_v6  ;;  %2567 = vmatmul.mubr.bf16.vlgmr.msra.gmra.mxu0 %v2374_v10  ;;  %4150 = vmatmul.mubr.bf16.vlgmr.msra.gmra.mxu1 %v2374_v10 }
 0x4d7   :  { %2679 = vmatpush1.bf16.msra.mxu0 %v6164_v55  ;;  %4154 = vmatpush3.bf16.msra.mxu1 %v5913_v59  ;;  %v6183_v59 = vld [vmem:[#allocation8 + $0x78] ss:$12 sps:$4 sm:$0xff]  }
 0x4d8   :  { %2680 = vmatprep.subr.bf16.mxu0 %v6168_v51  ;;  %4155 = vmatprep.subr.bf16.mxu1 %v6747_v61 }
 0x4d9   :  { %2710 = vmatprep.mubr.bf16.mxu0 %v6748_v63  ;;  %4169 = vmatprep.mubr.msk.bf16.mxu1 %vm4998_vm0, %v6747_v61 }
 0x4db   :  { %2681 = vmatpush1.bf16.msra.mxu0 %v6175_v28  ;;  %4156 = vmatpush3.bf16.msra.mxu1 %v5922_v40  ;;  %v6195_v40 = vld [vmem:[#allocation8 + $0x4c] ss:$12 sps:$4 sm:$0xff]  }
 0x4dc   :  { %2682 = vmatprep.subr.bf16.mxu0 %v6179_v2  ;;  %4157 = vmatprep.subr.bf16.mxu1 %v6747_v61 }
 0x4df   :  { %2683 = vmatpush1.bf16.msra.mxu0 %v6183_v59  ;;  %4158 = vmatpush3.bf16.msra.mxu1 %v5928_v7  ;;  %v6203_v7 = vld [vmem:[#allocation8 + $0x34] ss:$12 sps:$4 sm:$0xff]  }
 0x4e0   :  { %2684 = vmatprep.subr.bf16.mxu0 %v6187_v45  ;;  %4159 = vmatprep.subr.bf16.mxu1 %v6747_v61 }
 0x4e3   :  { %2685 = vmatpush1.bf16.msra.mxu0 %v6191_v3  ;;  %4160 = vmatpush3.bf16.msra.mxu1 %v5934_v13  ;;  %v6211_v13 = vld [vmem:[#allocation8 + $0x1c] ss:$12 sps:$4 sm:$0xff]  }
 0x4e4   :  { %2686 = vmatprep.subr.bf16.mxu0 %v6195_v40  ;;  %4161 = vmatprep.subr.bf16.mxu1 %v6747_v61  ;;  %6804 = vst [vmem:[#allocation26_spill] sm:$0xff] %v6211_v13 }
 0x4e7   :  { %2687 = vmatpush1.bf16.msra.mxu0 %v6199_v60  ;;  %4162 = vmatpush3.bf16.msra.mxu1 %v5940_v35  ;;  %v6219_v35 = vld [vmem:[#allocation8 + $0x4] ss:$12 sps:$4 sm:$0xff]  }
 0x4e8   :  { %2688 = vmatprep.subr.bf16.mxu0 %v6203_v7  ;;  %4163 = vmatprep.subr.bf16.mxu1 %v6747_v61  ;;  %6806 = vst [vmem:[#allocation25_spill] sm:$0xff] %v6219_v35 }
 0x4eb   :  { %2689 = vmatpush1.bf16.msra.mxu0 %v6207_v11  ;;  %4164 = vmatpush3.bf16.msra.mxu1 %v6782_v56  ;;  %v6227_v56 = vld [vmem:[#allocation8 + $0x16c] ss:$12 sps:$4 sm:$0xff]  }
 0x4ec   :  { %2690 = vmatprep.subr.bf16.mxu0 %v6211_v13  ;;  %4165 = vmatprep.subr.bf16.mxu1 %v6747_v61  ;;  %6808 = vst [vmem:[#allocation51_spill] sm:$0xff] %v6227_v56 }
 0x4ef   :  { %2691 = vmatpush1.bf16.msra.mxu0 %v6215_v20  ;;  %4166 = vmatpush3.bf16.msra.mxu1 %v6785_v12 }
 0x4f0   :  { %2692 = vmatprep.subr.bf16.mxu0 %v6219_v35  ;;  %4167 = vmatprep.subr.bf16.mxu1 %v6747_v61 }
 0x4f3   :  { %2693 = vmatpush1.bf16.msra.mxu0 %v6223_v0  ;;  %4168 = vmatpush3.bf16.msra.mxu1 %v6788_v15  ;;  %v6811_v15 = vld [vmem:[#allocation42_spill] sm:$0xff] }
 0x4f4   :  { %2822 = vmatprep.subr.bf16.mxu0 %v6227_v56  ;;  %4173 = vmatprep.subr.bf16.mxu1 %v6747_v61 }
 0x557   :  { %v2424_v21 = vpop.f32.mrf.mxu0  ;;  %v2467_v12 = vpop.f32.mrf.mxu1 }
 0x558   :  { %v2474_v54 = vadd.f32 %v2424_v21, %v6809_v5  ;;  %v2502_v57 = vadd.f32 %v6081_v18, %v2467_v12 }
 0x559   :  { %v2426_v46 = vpop.f32.mrf.mxu0  ;;  %v4131_v9 = vpop.f32.mrf.mxu1 }
 0x55a   :  { %v3729_v14 = vmul.f32 -1.442695, %v2474_v54  ;;  %v2488_v33 = vadd.f32 %v2426_v46, %v6811_v15 }
 0x55b   :  { %v2428_v29 = vpop.f32.mrf.mxu0  ;;  %v2470_v31 = vpop.f32.mrf.mxu1 }
 0x55c   :  { %4596 = vpow2.f32 %v3729_v14  ;;  %v2475_v30 = vadd.f32 %v2428_v29, %v6810_v32  ;;  %v3731_v39 = vmul.f32 -1.442695, %v2488_v33  ;;  %v2503_v19 = vadd.f32 %v6081_v18, %v2470_v31 }
 0x55d   :  { %v4132_v37 = vpop.f32.mrf.mxu1  ;;  %v2430_v1 = vpop.f32.mrf.mxu0 }
 0x55e   :  { %v3730_v50 = vmul.f32 -1.442695, %v2475_v30  ;;  %v2489_v52 = vadd.f32 %v2430_v1, %v6812_v8  ;;  %v6253_v1 = vld [vmem:[#allocation8 + $0x168] ss:$12 sps:$4 sm:$0xff]  }
 0x55f   :  { %v6815_v8 = vld [vmem:[#allocation35_spill] sm:$0xff] }
 0x560   :  { %4598 = vpow2.f32 %v3730_v50  ;;  %v3732_v62 = vmul.f32 -1.442695, %v2489_v52 }
 0x561   :  { %4600 = vpow2.f32 %v3731_v39  ;;  %v6260_v39 = vld [vmem:[#allocation8 + $0x154] ss:$12 sps:$4 sm:$0xff]  }
 0x562   :  { %4602 = vpow2.f32 %v3732_v62 }
 0x569   :  { %v4597_v22 = vpop.eup %4596 }
 0x56a   :  { %v2482_v27 = vadd.f32 1.0, %v4597_v22 }
 0x56c   :  { %4604 = vrcp.f32 %v2482_v27 }
 0x56d   :  { %v4599_v43 = vpop.eup %4598 }
 0x56e   :  { %v2483_v49 = vadd.f32 1.0, %v4599_v43  ;;  %v4601_v38 = vpop.eup %4600 }
 0x56f   :  { %v4603_v26 = vpop.eup %4602  ;;  %v2496_v25 = vadd.f32 1.0, %v4601_v38  ;;  %v6269_v38 = vld [vmem:[#allocation8 + $0x150] ss:$12 sps:$4 sm:$0xff]  }
 0x570   :  { %4606 = vrcp.f32 %v2483_v49  ;;  %v2497_v58 = vadd.f32 1.0, %v4603_v26  ;;  %v6272_v26 = vld [vmem:[#allocation8 + $0x158] ss:$12 sps:$4 sm:$0xff]  }
 0x571   :  { %4608 = vrcp.f32 %v2496_v25  ;;  %v6816_v25 = vld [vmem:[#allocation39_spill] sm:$0xff] }
 0x572   :  { %4610 = vrcp.f32 %v2497_v58 }
 0x579   :  { %v4605_v23 = vpop.eup %4604 }
 0x57a   :  { %v2504_v47 = vmul.f32 %v4605_v23, %v2502_v57  ;;  %v6276_v23 = vld [vmem:[#allocation8 + $0x13c] ss:$12 sps:$4 sm:$0xff]  }
 0x57c   :  { %v2506_v16 = vadd.f32 %v2504_v47, %v6813_v42  ;;  %v6817_v47 = vld [vmem:[#allocation82_spill] sm:$0xff] }
 0x57d   :  { %v4607_v53 = vpop.eup %4606 }
 0x57e   :  { %4612 = vtanh.f32 %v2506_v16  ;;  %v2505_v4 = vmul.f32 %v4607_v53, %v2503_v19  ;;  %v4609_v6 = vpop.eup %4608  ;;  %v6281_v53 = vld [vmem:[#allocation8 + $0x138] ss:$12 sps:$4 sm:$0xff]  }
 0x57f   :  { %v4611_v21 = vpop.eup %4610  ;;  %v2510_v5 = vsub.f32 1.0, %v4609_v6  ;;  %v2514_v46 = vmul.f32 %v4609_v6, %v6088_v24 }
 0x580   :  { %v2507_v10 = vadd.f32 %v2505_v4, %v6814_v44  ;;  %v2511_v9 = vsub.f32 1.0, %v4611_v21  ;;  %v2515_v31 = vmul.f32 %v4611_v21, %v6093_v36  ;;  %v6256_v36 = vld [vmem:[#allocation8 + $0x170] ss:$12 sps:$4 sm:$0xff]   ;;  %v6284_v4 = vld [vmem:[#allocation8 + $0x140] ss:$12 sps:$4 sm:$0xff]  }
 0x581   :  { %v6287_v44 = vld [vmem:[#allocation8 + $0x124] ss:$12 sps:$4 sm:$0xff]  }
 0x582   :  { %4614 = vtanh.f32 %v2507_v10  ;;  %v6818_v10 = vld [vmem:[#allocation84_spill] sm:$0xff] }
 0x58b   :  { %v4613_v54 = vpop.eup %4612 }
 0x58c   :  { %v2512_v12 = vmul.f32 %v4613_v54, %v2510_v5  ;;  %v6292_v5 = vld [vmem:[#allocation8 + $0x120] ss:$12 sps:$4 sm:$0xff]   ;;  %v6295_v54 = vld [vmem:[#allocation8 + $0x128] ss:$12 sps:$4 sm:$0xff]  }
 0x58e   :  { %v6240_v14 = vadd.f32 %v2514_v46, %v2512_v12  ;;  %v6298_v12 = vld [vmem:[#allocation8 + $0x10c] ss:$12 sps:$4 sm:$0xff]  }
 0x58f   :  { %v4615_v29 = vpop.eup %4614 }
 0x590   :  { %v2513_v32 = vmul.f32 %v4615_v29, %v2511_v9  ;;  %v3793_v30 = vpack.c.bf16 %v6240_v14, %v6240_v14  ;;  %v6302_v9 = vld [vmem:[#allocation8 + $0x108] ss:$12 sps:$4 sm:$0xff]   ;;  %v6305_v29 = vld [vmem:[#allocation8 + $0x110] ss:$12 sps:$4 sm:$0xff]  }
 0x592   :  { %v6245_v37 = vadd.f32 %v2515_v31, %v2513_v32  ;;  %2526 = vst [vmem:[#allocation11 + $0x40] sm:$0xf] %v3793_v30  ;;  %v6308_v32 = vld [vmem:[#allocation8 + $0xf4] ss:$12 sps:$4 sm:$0xff]  }
 0x594   :  { %v2518_v15 = vpack.c.bf16 %v6245_v37, %v6240_v14  ;;  %v3794_v33 = vpack.c.bf16 %v6245_v37, %v6245_v37 }
 0x596   :  { %2527 = vst [vmem:[#allocation11 + $0x48] sm:$0xf] %v3794_v33  ;;  %2711 = vmatmul.mubr.bf16.vlgmr.msra.gmra.mxu0 %v2518_v15  ;;  %4170 = vmatmul.mubr.bf16.vlgmr.msra.gmra.mxu1 %v2518_v15  ;;  %v2568_v24 = vpop.f32.mrf.mxu0  ;;  %v6251_v50 = vpop.f32.mrf.mxu1  ;;  %v6312_v15 = vld [vmem:[#allocation8 + $0xf0] ss:$12 sps:$4 sm:$0xff]   ;;  %v6315_v33 = vld [vmem:[#allocation8 + $0xf8] ss:$12 sps:$4 sm:$0xff]  }
 0x597   :  { %2823 = vmatpush1.bf16.msra.mxu0 %v6253_v1  ;;  %4174 = vmatpush3.bf16.msra.mxu1 %v6256_v36  ;;  %v2618_v52 = vadd.f32 %v2568_v24, %v6815_v8  ;;  %v6318_v24 = vld [vmem:[#allocation8 + $0xdc] ss:$12 sps:$4 sm:$0xff]  }
 0x598   :  { %2824 = vmatprep.subr.bf16.mxu0 %v6260_v39  ;;  %4175 = vmatprep.subr.bf16.mxu1 %v6747_v61  ;;  %v2570_v62 = vpop.f32.mrf.mxu0  ;;  %v4151_v22 = vpop.f32.mrf.mxu1 }
 0x599   :  { %2854 = vmatprep.mubr.bf16.mxu0 %v6748_v63  ;;  %4189 = vmatprep.mubr.msk.bf16.mxu1 %vm4998_vm0, %v6747_v61  ;;  %v3735_v27 = vmul.f32 -1.442695, %v2618_v52  ;;  %v2632_v42 = vadd.f32 %v2570_v62, %v6817_v47  ;;  %v6322_v62 = vld [vmem:[#allocation8 + $0xd8] ss:$12 sps:$4 sm:$0xff]   ;;  %v6325_v22 = vld [vmem:[#allocation8 + $0xe0] ss:$12 sps:$4 sm:$0xff]  }
 0x59a   :  { %v2572_v43 = vpop.f32.mrf.mxu0  ;;  %v6267_v49 = vpop.f32.mrf.mxu1 }
 0x59b   :  { %2825 = vmatpush1.bf16.msra.mxu0 %v6269_v38  ;;  %4176 = vmatpush3.bf16.msra.mxu1 %v6272_v26  ;;  %4616 = vpow2.f32 %v3735_v27  ;;  %v2619_v57 = vadd.f32 %v2572_v43, %v6816_v25  ;;  %v3737_v21 = vmul.f32 -1.442695, %v2632_v42  ;;  %v6328_v27 = vld [vmem:[#allocation8 + $0xc4] ss:$12 sps:$4 sm:$0xff]   ;;  %v6332_v25 = vld [vmem:[#allocation8 + $0xc0] ss:$12 sps:$4 sm:$0xff]   ;;  %v2646_v42 = vadd.f32 %v6145_v41, %v6251_v50 }
 0x59c   :  { %2826 = vmatprep.subr.bf16.mxu0 %v6276_v23  ;;  %4177 = vmatprep.subr.bf16.mxu1 %v6747_v61  ;;  %v4152_v58 = vpop.f32.mrf.mxu1  ;;  %v2574_v19 = vpop.f32.mrf.mxu0  ;;  %6819 = vst [vmem:[#allocation55_spill] sm:$0xff] %v6332_v25 }
 0x59d   :  { %v3736_v16 = vmul.f32 -1.442695, %v2619_v57  ;;  %v2633_v6 = vadd.f32 %v2574_v19, %v6818_v10  ;;  %v6335_v57 = vld [vmem:[#allocation8 + $0xc8] ss:$12 sps:$4 sm:$0xff]  }
 0x59e   :  { %6820 = vst [vmem:[#allocation90_spill] sm:$0xff] %v6335_v57 }
 0x59f   :  { %2827 = vmatpush1.bf16.msra.mxu0 %v6281_v53  ;;  %4178 = vmatpush3.bf16.msra.mxu1 %v6284_v4  ;;  %4618 = vpow2.f32 %v3736_v16  ;;  %v3738_v46 = vmul.f32 -1.442695, %v2633_v6  ;;  %v6821_v6 = vld [vmem:[#allocation83_spill] sm:$0xff] }
 0x5a0   :  { %2828 = vmatprep.subr.bf16.mxu0 %v6287_v44  ;;  %4179 = vmatprep.subr.bf16.mxu1 %v6747_v61  ;;  %4620 = vpow2.f32 %v3737_v21 }
 0x5a1   :  { %4622 = vpow2.f32 %v3738_v46  ;;  %v2647_v46 = vadd.f32 %v6145_v41, %v6267_v49 }
 0x5a3   :  { %2829 = vmatpush1.bf16.msra.mxu0 %v6292_v5  ;;  %4180 = vmatpush3.bf16.msra.mxu1 %v6295_v54 }
 0x5a4   :  { %2830 = vmatprep.subr.bf16.mxu0 %v6298_v12  ;;  %4181 = vmatprep.subr.bf16.mxu1 %v6747_v61 }
 0x5a7   :  { %2831 = vmatpush1.bf16.msra.mxu0 %v6302_v9  ;;  %4182 = vmatpush3.bf16.msra.mxu1 %v6305_v29 }
 0x5a8   :  { %2832 = vmatprep.subr.bf16.mxu0 %v6308_v32  ;;  %4183 = vmatprep.subr.bf16.mxu1 %v6747_v61  ;;  %v4617_v31 = vpop.eup %4616 }
 0x5a9   :  { %v2626_v30 = vadd.f32 1.0, %v4617_v31 }
 0x5ab   :  { %2833 = vmatpush1.bf16.msra.mxu0 %v6312_v15  ;;  %4184 = vmatpush3.bf16.msra.mxu1 %v6315_v33  ;;  %4624 = vrcp.f32 %v2626_v30 }
 0x5ac   :  { %2834 = vmatprep.subr.bf16.mxu0 %v6318_v24  ;;  %4185 = vmatprep.subr.bf16.mxu1 %v6747_v61  ;;  %v4619_v8 = vpop.eup %4618 }
 0x5ad   :  { %v2627_v52 = vadd.f32 1.0, %v4619_v8  ;;  %v4621_v43 = vpop.eup %4620  ;;  %v6822_v8 = vld [vmem:[#allocation85_spill] sm:$0xff] }
 0x5ae   :  { %v4623_v58 = vpop.eup %4622  ;;  %v2640_v47 = vadd.f32 1.0, %v4621_v43 }
 0x5af   :  { %2835 = vmatpush1.bf16.msra.mxu0 %v6322_v62  ;;  %4186 = vmatpush3.bf16.msra.mxu1 %v6325_v22  ;;  %4626 = vrcp.f32 %v2627_v52  ;;  %v2641_v19 = vadd.f32 1.0, %v4623_v58 }
 0x5b0   :  { %2836 = vmatprep.subr.bf16.mxu0 %v6328_v27  ;;  %4187 = vmatprep.subr.bf16.mxu1 %v6747_v61  ;;  %4628 = vrcp.f32 %v2640_v47 }
 0x5b1   :  { %4630 = vrcp.f32 %v2641_v19 }
 0x5b3   :  { %2837 = vmatpush1.bf16.msra.mxu0 %v6332_v25  ;;  %4188 = vmatpush3.bf16.msra.mxu1 %v6335_v57 }
 0x5b4   :  { %2966 = vmatprep.subr.bf16.mxu0 %v6138_v34  ;;  %4193 = vmatprep.subr.bf16.mxu1 %v6747_v61 }
 0x5b8   :  { %v4625_v16 = vpop.eup %4624 }
 0x5b9   :  { %v2648_v10 = vmul.f32 %v4625_v16, %v2646_v42 }
 0x5bb   :  { %v2650_v21 = vadd.f32 %v2648_v10, %v6821_v6 }
 0x5bc   :  { %v4627_v31 = vpop.eup %4626 }
 0x5bd   :  { %4632 = vtanh.f32 %v2650_v21  ;;  %v2649_v30 = vmul.f32 %v4627_v31, %v2647_v46  ;;  %v4629_v43 = vpop.eup %4628  ;;  %v6386_v46 = vld [vmem:[#allocation8 + $0x50] ss:$12 sps:$4 sm:$0xff]   ;;  %v6392_v31 = vld [vmem:[#allocation8 + $0x38] ss:$12 sps:$4 sm:$0xff]  }
 0x5be   :  { %v4631_v34 = vpop.eup %4630  ;;  %v2654_v57 = vsub.f32 1.0, %v4629_v43  ;;  %v2658_v58 = vmul.f32 %v4629_v43, %v6153_v17  ;;  %v6359_v17 = vld [vmem:[#allocation8 + $0xb0] ss:$12 sps:$4 sm:$0xff]   ;;  %6823 = vst [vmem:[#allocation92_spill] sm:$0xff] %v6392_v31 }
 0x5bf   :  { %v2651_v52 = vadd.f32 %v2649_v30, %v6822_v8  ;;  %v2655_v47 = vsub.f32 1.0, %v4631_v34  ;;  %v2659_v49 = vmul.f32 %v4631_v34, %v6158_v48  ;;  %v6368_v34 = vld [vmem:[#allocation8 + $0x98] ss:$12 sps:$4 sm:$0xff]   ;;  %v6374_v48 = vld [vmem:[#allocation8 + $0x80] ss:$12 sps:$4 sm:$0xff]  }
 0x5c0   :  { %v6398_v30 = vld [vmem:[#allocation8 + $0x20] ss:$12 sps:$4 sm:$0xff]   ;;  %v6404_v8 = vld [vmem:[#allocation8 + $0x8] ss:$12 sps:$4 sm:$0xff]  }
 0x5c1   :  { %4634 = vtanh.f32 %v2651_v52  ;;  %6824 = vst [vmem:[#allocation22_spill] sm:$0xff] %v6398_v30  ;;  %6825 = vst [vmem:[#allocation59_spill] sm:$0xff] %v6404_v8 }
 0x5ca   :  { %v4633_v50 = vpop.eup %4632 }
 0x5cb   :  { %v2656_v25 = vmul.f32 %v4633_v50, %v2654_v57  ;;  %v6826_v50 = vld [vmem:[#allocation48_spill] sm:$0xff] }
 0x5cd   :  { %v6347_v42 = vadd.f32 %v2658_v58, %v2656_v25  ;;  %v6380_v25 = vld [vmem:[#allocation8 + $0x68] ss:$12 sps:$4 sm:$0xff]  }
 0x5ce   :  { %v4635_v16 = vpop.eup %4634 }
 0x5cf   :  { %v2657_v10 = vmul.f32 %v4635_v16, %v2655_v47  ;;  %v3795_v19 = vpack.c.bf16 %v6347_v42, %v6347_v42 }
 0x5d1   :  { %v6352_v6 = vadd.f32 %v2659_v49, %v2657_v10  ;;  %2670 = vst [vmem:[#allocation11 + $0x34] sm:$0xf] %v3795_v19 }
 0x5d3   :  { %v2662_v21 = vpack.c.bf16 %v6352_v6, %v6347_v42  ;;  %v3796_v57 = vpack.c.bf16 %v6352_v6, %v6352_v6 }
 0x5d5   :  { %2671 = vst [vmem:[#allocation11 + $0x3c] sm:$0xf] %v3796_v57  ;;  %2855 = vmatmul.mubr.bf16.vlgmr.msra.gmra.mxu0 %v2662_v21  ;;  %4190 = vmatmul.mubr.bf16.vlgmr.msra.gmra.mxu1 %v2662_v21  ;;  %v6827_v21 = vld [vmem:[#allocation52_spill] sm:$0xff] }
 0x5d6   :  { %2967 = vmatpush1.bf16.msra.mxu0 %v6164_v55  ;;  %4194 = vmatpush3.bf16.msra.mxu1 %v6359_v17 }
 0x5d7   :  { %2968 = vmatprep.subr.bf16.mxu0 %v6168_v51  ;;  %4195 = vmatprep.subr.bf16.mxu1 %v6747_v61 }
 0x5d8   :  { %2998 = vmatprep.mubr.bf16.mxu0 %v6748_v63  ;;  %4209 = vmatprep.mubr.msk.bf16.mxu1 %vm4998_vm0, %v6747_v61 }
 0x5da   :  { %2969 = vmatpush1.bf16.msra.mxu0 %v6175_v28  ;;  %4196 = vmatpush3.bf16.msra.mxu1 %v6368_v34 }
 0x5db   :  { %2970 = vmatprep.subr.bf16.mxu0 %v6179_v2  ;;  %4197 = vmatprep.subr.bf16.mxu1 %v6747_v61 }
 0x5de   :  { %2971 = vmatpush1.bf16.msra.mxu0 %v6183_v59  ;;  %4198 = vmatpush3.bf16.msra.mxu1 %v6374_v48 }
 0x5df   :  { %2972 = vmatprep.subr.bf16.mxu0 %v6187_v45  ;;  %4199 = vmatprep.subr.bf16.mxu1 %v6747_v61 }
 0x5e2   :  { %2973 = vmatpush1.bf16.msra.mxu0 %v6191_v3  ;;  %4200 = vmatpush3.bf16.msra.mxu1 %v6380_v25 }
 0x5e3   :  { %2974 = vmatprep.subr.bf16.mxu0 %v6195_v40  ;;  %4201 = vmatprep.subr.bf16.mxu1 %v6747_v61 }
 0x5e6   :  { %2975 = vmatpush1.bf16.msra.mxu0 %v6199_v60  ;;  %4202 = vmatpush3.bf16.msra.mxu1 %v6386_v46 }
 0x5e7   :  { %2976 = vmatprep.subr.bf16.mxu0 %v6203_v7  ;;  %4203 = vmatprep.subr.bf16.mxu1 %v6747_v61 }
 0x5ea   :  { %2977 = vmatpush1.bf16.msra.mxu0 %v6207_v11  ;;  %4204 = vmatpush3.bf16.msra.mxu1 %v6392_v31 }
 0x5eb   :  { %2978 = vmatprep.subr.bf16.mxu0 %v6211_v13  ;;  %4205 = vmatprep.subr.bf16.mxu1 %v6747_v61 }
 0x5ee   :  { %2979 = vmatpush1.bf16.msra.mxu0 %v6215_v20  ;;  %4206 = vmatpush3.bf16.msra.mxu1 %v6398_v30 }
 0x5ef   :  { %2980 = vmatprep.subr.bf16.mxu0 %v6219_v35  ;;  %4207 = vmatprep.subr.bf16.mxu1 %v6747_v61  ;;  %v6828_v35 = vld [vmem:[#allocation50_spill] sm:$0xff] }
 0x5f2   :  { %2981 = vmatpush1.bf16.msra.mxu0 %v6223_v0  ;;  %4208 = vmatpush3.bf16.msra.mxu1 %v6404_v8 }
 0x5f3   :  { %3110 = vmatprep.subr.bf16.mxu0 %v6227_v56  ;;  %4213 = vmatprep.subr.bf16.mxu1 %v6747_v61  ;;  %v6829_v56 = vld [vmem:[#allocation54_spill] sm:$0xff] }
 0x656   :  { %v2712_v52 = vpop.f32.mrf.mxu0  ;;  %v2755_v43 = vpop.f32.mrf.mxu1 }
 0x657   :  { %v2762_v58 = vadd.f32 %v2712_v52, %v6826_v50 }
 0x658   :  { %v2714_v47 = vpop.f32.mrf.mxu0  ;;  %v4171_v16 = vpop.f32.mrf.mxu1 }
 0x659   :  { %v3741_v10 = vmul.f32 -1.442695, %v2762_v58  ;;  %v2776_v30 = vadd.f32 %v2714_v47, %v6828_v35  ;;  %v2790_v35 = vadd.f32 %v6081_v18, %v2755_v43 }
 0x65a   :  { %v2716_v49 = vpop.f32.mrf.mxu0  ;;  %v2758_v19 = vpop.f32.mrf.mxu1 }
 0x65b   :  { %4636 = vpow2.f32 %v3741_v10  ;;  %v2763_v57 = vadd.f32 %v2716_v49, %v6827_v21  ;;  %v3743_v31 = vmul.f32 -1.442695, %v2776_v30  ;;  %v6831_v30 = vld [vmem:[#allocation53_spill] sm:$0xff] }
 0x65c   :  { %v4172_v0 = vpop.f32.mrf.mxu1  ;;  %v2718_v20 = vpop.f32.mrf.mxu0 }
 0x65d   :  { %v3742_v8 = vmul.f32 -1.442695, %v2763_v57  ;;  %v2777_v13 = vadd.f32 %v2718_v20, %v6829_v56  ;;  %v6830_v20 = vld [vmem:[#allocation49_spill] sm:$0xff] }
 0x65f   :  { %4638 = vpow2.f32 %v3742_v8  ;;  %v3744_v11 = vmul.f32 -1.442695, %v2777_v13  ;;  %v2791_v13 = vadd.f32 %v6081_v18, %v2758_v19 }
 0x660   :  { %4640 = vpow2.f32 %v3743_v31 }
 0x661   :  { %4642 = vpow2.f32 %v3744_v11 }
 0x668   :  { %v4637_v52 = vpop.eup %4636 }
 0x669   :  { %v2770_v50 = vadd.f32 1.0, %v4637_v52 }
 0x66b   :  { %4644 = vrcp.f32 %v2770_v50 }
 0x66c   :  { %v4639_v58 = vpop.eup %4638 }
 0x66d   :  { %v2771_v16 = vadd.f32 1.0, %v4639_v58  ;;  %v4641_v10 = vpop.eup %4640 }
 0x66e   :  { %v4643_v49 = vpop.eup %4642  ;;  %v2784_v0 = vadd.f32 1.0, %v4641_v10 }
 0x66f   :  { %4646 = vrcp.f32 %v2771_v16  ;;  %v2785_v21 = vadd.f32 1.0, %v4643_v49 }
 0x670   :  { %4648 = vrcp.f32 %v2784_v0 }
 0x671   :  { %4650 = vrcp.f32 %v2785_v21 }
 0x678   :  { %v4645_v47 = vpop.eup %4644 }
 0x679   :  { %v2792_v8 = vmul.f32 %v4645_v47, %v2790_v35 }
 0x67b   :  { %v2794_v56 = vadd.f32 %v2792_v8, %v6830_v20 }
 0x67c   :  { %v4647_v31 = vpop.eup %4646 }
 0x67d   :  { %4652 = vtanh.f32 %v2794_v56  ;;  %v2793_v11 = vmul.f32 %v4647_v31, %v2791_v13  ;;  %v4649_v52 = vpop.eup %4648 }
 0x67e   :  { %v4651_v50 = vpop.eup %4650  ;;  %v2798_v58 = vsub.f32 1.0, %v4649_v52  ;;  %v2802_v10 = vmul.f32 %v4649_v52, %v6240_v14 }
 0x67f   :  { %v2795_v57 = vadd.f32 %v2793_v11, %v6831_v30  ;;  %v2799_v49 = vsub.f32 1.0, %v4651_v50  ;;  %v2803_v18 = vmul.f32 %v4651_v50, %v6245_v37  ;;  %v6832_v37 = vld [vmem:[#allocation27_spill] sm:$0xff] }
 0x680   :  { %v6833_v50 = vld [vmem:[#allocation31_spill] sm:$0xff] }
 0x681   :  { %4654 = vtanh.f32 %v2795_v57 }
 0x68a   :  { %v4653_v16 = vpop.eup %4652 }
 0x68b   :  { %v2800_v43 = vmul.f32 %v4653_v16, %v2798_v58 }
 0x68d   :  { %v6418_v0 = vadd.f32 %v2802_v10, %v2800_v43  ;;  %v6834_v43 = vld [vmem:[#allocation78_spill] sm:$0xff] }
 0x68e   :  { %v4655_v35 = vpop.eup %4654 }
 0x68f   :  { %v2801_v47 = vmul.f32 %v4655_v35, %v2799_v49  ;;  %v3797_v19 = vpack.c.bf16 %v6418_v0, %v6418_v0 }
 0x691   :  { %v6423_v21 = vadd.f32 %v2803_v18, %v2801_v47  ;;  %2814 = vst [vmem:[#allocation11 + $0x50] sm:$0xf] %v3797_v19  ;;  %v6835_v47 = vld [vmem:[#allocation80_spill] sm:$0xff] }
 0x693   :  { %v2806_v8 = vpack.c.bf16 %v6423_v21, %v6418_v0  ;;  %v3798_v20 = vpack.c.bf16 %v6423_v21, %v6423_v21 }
 0x695   :  { %2815 = vst [vmem:[#allocation11 + $0x58] sm:$0xf] %v3798_v20  ;;  %2999 = vmatmul.mubr.bf16.vlgmr.msra.gmra.mxu0 %v2806_v8  ;;  %4210 = vmatmul.mubr.bf16.vlgmr.msra.gmra.mxu1 %v2806_v8  ;;  %v2856_v14 = vpop.f32.mrf.mxu0  ;;  %v2899_v56 = vpop.f32.mrf.mxu1 }
 0x696   :  { %3111 = vmatpush1.bf16.msra.mxu0 %v6253_v1  ;;  %4214 = vmatpush3.bf16.msra.mxu1 %v6256_v36  ;;  %v2906_v13 = vadd.f32 %v2856_v14, %v6832_v37 }
 0x697   :  { %3112 = vmatprep.subr.bf16.mxu0 %v6260_v39  ;;  %4215 = vmatprep.subr.bf16.mxu1 %v6747_v61  ;;  %v2858_v31 = vpop.f32.mrf.mxu0  ;;  %v4191_v11 = vpop.f32.mrf.mxu1 }
 0x698   :  { %3142 = vmatprep.mubr.bf16.mxu0 %v6748_v63  ;;  %4229 = vmatprep.mubr.msk.bf16.mxu1 %vm4998_vm0, %v6747_v61  ;;  %v3747_v30 = vmul.f32 -1.442695, %v2906_v13  ;;  %v2920_v10 = vadd.f32 %v2858_v31, %v6834_v43  ;;  %v6836_v11 = vld [vmem:[#allocation55_spill] sm:$0xff] }
 0x699   :  { %v2860_v57 = vpop.f32.mrf.mxu0  ;;  %v2902_v52 = vpop.f32.mrf.mxu1 }
 0x69a   :  { %3113 = vmatpush1.bf16.msra.mxu0 %v6269_v38  ;;  %4216 = vmatpush3.bf16.msra.mxu1 %v6272_v26  ;;  %4656 = vpow2.f32 %v3747_v30  ;;  %v2907_v58 = vadd.f32 %v2860_v57, %v6833_v50  ;;  %v3749_v19 = vmul.f32 -1.442695, %v2920_v10  ;;  %v6837_v30 = vld [vmem:[#allocation90_spill] sm:$0xff]  ;;  %v6838_v57 = vld [vmem:[#allocation24_spill] sm:$0xff] }
 0x69b   :  { %3114 = vmatprep.subr.bf16.mxu0 %v6276_v23  ;;  %4217 = vmatprep.subr.bf16.mxu1 %v6747_v61  ;;  %v4192_v16 = vpop.f32.mrf.mxu1  ;;  %v2862_v35 = vpop.f32.mrf.mxu0 }
 0x69c   :  { %v3748_v49 = vmul.f32 -1.442695, %v2907_v58  ;;  %v2921_v18 = vadd.f32 %v2862_v35, %v6835_v47  ;;  %v2934_v16 = vadd.f32 %v6145_v41, %v2899_v56  ;;  %v6839_v35 = vld [vmem:[#allocation79_spill] sm:$0xff] }
 0x69e   :  { %3115 = vmatpush1.bf16.msra.mxu0 %v6281_v53  ;;  %4218 = vmatpush3.bf16.msra.mxu1 %v6284_v4  ;;  %4658 = vpow2.f32 %v3748_v49  ;;  %v3750_v8 = vmul.f32 -1.442695, %v2921_v18  ;;  %v2935_v18 = vadd.f32 %v6145_v41, %v2902_v52 }
 0x69f   :  { %3116 = vmatprep.subr.bf16.mxu0 %v6287_v44  ;;  %4219 = vmatprep.subr.bf16.mxu1 %v6747_v61  ;;  %4660 = vpow2.f32 %v3749_v19 }
 0x6a0   :  { %4662 = vpow2.f32 %v3750_v8 }
 0x6a2   :  { %3117 = vmatpush1.bf16.msra.mxu0 %v6292_v5  ;;  %4220 = vmatpush3.bf16.msra.mxu1 %v6295_v54 }
 0x6a3   :  { %3118 = vmatprep.subr.bf16.mxu0 %v6298_v12  ;;  %4221 = vmatprep.subr.bf16.mxu1 %v6747_v61 }
 0x6a6   :  { %3119 = vmatpush1.bf16.msra.mxu0 %v6302_v9  ;;  %4222 = vmatpush3.bf16.msra.mxu1 %v6305_v29 }
 0x6a7   :  { %3120 = vmatprep.subr.bf16.mxu0 %v6308_v32  ;;  %4223 = vmatprep.subr.bf16.mxu1 %v6747_v61  ;;  %v4657_v20 = vpop.eup %4656 }
 0x6a8   :  { %v2914_v14 = vadd.f32 1.0, %v4657_v20  ;;  %v6840_v20 = vld [vmem:[#allocation81_spill] sm:$0xff] }
 0x6aa   :  { %3121 = vmatpush1.bf16.msra.mxu0 %v6312_v15  ;;  %4224 = vmatpush3.bf16.msra.mxu1 %v6315_v33  ;;  %4664 = vrcp.f32 %v2914_v14 }
 0x6ab   :  { %3122 = vmatprep.subr.bf16.mxu0 %v6318_v24  ;;  %4225 = vmatprep.subr.bf16.mxu1 %v6747_v61  ;;  %v4659_v37 = vpop.eup %4658 }
 0x6ac   :  { %v2915_v13 = vadd.f32 1.0, %v4659_v37  ;;  %v4661_v31 = vpop.eup %4660 }
 0x6ad   :  { %v4663_v50 = vpop.eup %4662  ;;  %v2928_v58 = vadd.f32 1.0, %v4661_v31 }
 0x6ae   :  { %3123 = vmatpush1.bf16.msra.mxu0 %v6322_v62  ;;  %4226 = vmatpush3.bf16.msra.mxu1 %v6325_v22  ;;  %4666 = vrcp.f32 %v2915_v13  ;;  %v2929_v10 = vadd.f32 1.0, %v4663_v50 }
 0x6af   :  { %3124 = vmatprep.subr.bf16.mxu0 %v6328_v27  ;;  %4227 = vmatprep.subr.bf16.mxu1 %v6747_v61  ;;  %4668 = vrcp.f32 %v2928_v58 }
 0x6b0   :  { %4670 = vrcp.f32 %v2929_v10 }
 0x6b2   :  { %3125 = vmatpush1.bf16.msra.mxu0 %v6836_v11  ;;  %4228 = vmatpush3.bf16.msra.mxu1 %v6837_v30 }
 0x6b3   :  { %3254 = vmatprep.subr.bf16.mxu0 %v6838_v57  ;;  %4233 = vmatprep.subr.bf16.mxu1 %v6747_v61 }
 0x6b7   :  { %v4665_v43 = vpop.eup %4664 }
 0x6b8   :  { %v2936_v49 = vmul.f32 %v4665_v43, %v2934_v16 }
 0x6ba   :  { %v2938_v47 = vadd.f32 %v2936_v49, %v6839_v35 }
 0x6bb   :  { %v4667_v19 = vpop.eup %4666 }
 0x6bc   :  { %4672 = vtanh.f32 %v2938_v47  ;;  %v2937_v8 = vmul.f32 %v4667_v19, %v2935_v18  ;;  %v4669_v37 = vpop.eup %4668  ;;  %v6851_v19 = vld [vmem:[#allocation60_spill] sm:$0xff] }
 0x6bd   :  { %v4671_v13 = vpop.eup %4670  ;;  %v2942_v31 = vsub.f32 1.0, %v4669_v37  ;;  %v2946_v50 = vmul.f32 %v4669_v37, %v6347_v42 }
 0x6be   :  { %v2939_v14 = vadd.f32 %v2937_v8, %v6840_v20  ;;  %v2943_v16 = vsub.f32 1.0, %v4671_v13  ;;  %v2947_v41 = vmul.f32 %v4671_v13, %v6352_v6  ;;  %v6850_v6 = vld [vmem:[#allocation56_spill] sm:$0xff] }
 0x6c0   :  { %4674 = vtanh.f32 %v2939_v14  ;;  %v6852_v14 = vld [vmem:[#allocation58_spill] sm:$0xff] }
 0x6c9   :  { %v4673_v57 = vpop.eup %4672 }
 0x6ca   :  { %v2944_v56 = vmul.f32 %v4673_v57, %v2942_v31  ;;  %v6853_v57 = vld [vmem:[#allocation62_spill] sm:$0xff] }
 0x6cc   :  { %v6473_v58 = vadd.f32 %v2946_v50, %v2944_v56 }
 0x6cd   :  { %v4675_v43 = vpop.eup %4674 }
 0x6ce   :  { %v2945_v49 = vmul.f32 %v4675_v43, %v2943_v16  ;;  %v3799_v52 = vpack.c.bf16 %v6473_v58, %v6473_v58 }
 0x6d0   :  { %v6478_v10 = vadd.f32 %v2947_v41, %v2945_v49  ;;  %2958 = vst [vmem:[#allocation11 + $0x24] sm:$0xf] %v3799_v52 }
 0x6d2   :  { %v2950_v35 = vpack.c.bf16 %v6478_v10, %v6473_v58  ;;  %v3800_v47 = vpack.c.bf16 %v6478_v10, %v6478_v10 }
 0x6d4   :  { %2959 = vst [vmem:[#allocation11 + $0x2c] sm:$0xf] %v3800_v47  ;;  %3143 = vmatmul.mubr.bf16.vlgmr.msra.gmra.mxu0 %v2950_v35  ;;  %4230 = vmatmul.mubr.bf16.vlgmr.msra.gmra.mxu1 %v2950_v35 }
 0x6d5   :  { %3255 = vmatpush1.bf16.msra.mxu0 %v6164_v55  ;;  %4234 = vmatpush3.bf16.msra.mxu1 %v6359_v17  ;;  %v6841_v55 = vld [vmem:[#allocation28_spill] sm:$0xff] }
 0x6d6   :  { %3256 = vmatprep.subr.bf16.mxu0 %v6168_v51  ;;  %4235 = vmatprep.subr.bf16.mxu1 %v6747_v61  ;;  %v6842_v51 = vld [vmem:[#allocation92_spill] sm:$0xff] }
 0x6d7   :  { %3286 = vmatprep.mubr.bf16.mxu0 %v6748_v63  ;;  %4249 = vmatprep.mubr.msk.bf16.mxu1 %vm4998_vm0, %v6747_v61 }
 0x6d9   :  { %3257 = vmatpush1.bf16.msra.mxu0 %v6175_v28  ;;  %4236 = vmatpush3.bf16.msra.mxu1 %v6368_v34  ;;  %v6843_v28 = vld [vmem:[#allocation26_spill] sm:$0xff] }
 0x6da   :  { %3258 = vmatprep.subr.bf16.mxu0 %v6179_v2  ;;  %4237 = vmatprep.subr.bf16.mxu1 %v6747_v61  ;;  %v6844_v2 = vld [vmem:[#allocation30_spill] sm:$0xff] }
 0x6dd   :  { %3259 = vmatpush1.bf16.msra.mxu0 %v6183_v59  ;;  %4238 = vmatpush3.bf16.msra.mxu1 %v6374_v48  ;;  %v6845_v59 = vld [vmem:[#allocation22_spill] sm:$0xff] }
 0x6de   :  { %3260 = vmatprep.subr.bf16.mxu0 %v6187_v45  ;;  %4239 = vmatprep.subr.bf16.mxu1 %v6747_v61  ;;  %v6846_v45 = vld [vmem:[#allocation25_spill] sm:$0xff] }
 0x6e1   :  { %3261 = vmatpush1.bf16.msra.mxu0 %v6191_v3  ;;  %4240 = vmatpush3.bf16.msra.mxu1 %v6380_v25  ;;  %v6847_v3 = vld [vmem:[#allocation29_spill] sm:$0xff] }
 0x6e2   :  { %3262 = vmatprep.subr.bf16.mxu0 %v6195_v40  ;;  %4241 = vmatprep.subr.bf16.mxu1 %v6747_v61  ;;  %v6848_v40 = vld [vmem:[#allocation59_spill] sm:$0xff] }
 0x6e5   :  { %3263 = vmatpush1.bf16.msra.mxu0 %v6199_v60  ;;  %4242 = vmatpush3.bf16.msra.mxu1 %v6386_v46  ;;  %v6849_v60 = vld [vmem:[#allocation51_spill] sm:$0xff] }
 0x6e6   :  { %3264 = vmatprep.subr.bf16.mxu0 %v6203_v7  ;;  %4243 = vmatprep.subr.bf16.mxu1 %v6747_v61 }
 0x6e9   :  { %3265 = vmatpush1.bf16.msra.mxu0 %v6841_v55  ;;  %4244 = vmatpush3.bf16.msra.mxu1 %v6842_v51  ;;  %v6526_v51 = vld [vmem:[%s6632_s4] ss:$0 sm:$0xff] }
 0x6ea   :  { %3266 = vmatprep.subr.bf16.mxu0 %v6843_v28  ;;  %4245 = vmatprep.subr.bf16.mxu1 %v6747_v61 }
 0x6ed   :  { %3267 = vmatpush1.bf16.msra.mxu0 %v6844_v2  ;;  %4246 = vmatpush3.bf16.msra.mxu1 %v6845_v59 }
 0x6ee   :  { %3268 = vmatprep.subr.bf16.mxu0 %v6846_v45  ;;  %4247 = vmatprep.subr.bf16.mxu1 %v6747_v61 }
 0x6f1   :  { %3269 = vmatpush1.bf16.msra.mxu0 %v6847_v3  ;;  %4248 = vmatpush3.bf16.msra.mxu1 %v6848_v40  ;;  %v6854_v3 = vld [vmem:[#allocation57_spill] sm:$0xff] }
 0x6f2   :  { %3398 = vmatprep.subr.bf16.mxu0 %v6849_v60  ;;  %4253 = vmatprep.subr.bf16.mxu1 %v6747_v61 }
 0x755   :  { %v3000_v7 = vpop.f32.mrf.mxu0  ;;  %v3043_v42 = vpop.f32.mrf.mxu1 }
 0x756   :  { %v3050_v17 = vadd.f32 %v3000_v7, %v6850_v6  ;;  %v3078_v28 = vadd.f32 %v6526_v51, %v3043_v42 }
 0x757   :  { %v3002_v34 = vpop.f32.mrf.mxu0  ;;  %v4211_v48 = vpop.f32.mrf.mxu1 }
 0x758   :  { %v3753_v25 = vmul.f32 -1.442695, %v3050_v17  ;;  %v3064_v37 = vadd.f32 %v3002_v34, %v6852_v14  ;;  %v6855_v17 = vld [vmem:[#allocation61_spill] sm:$0xff] }
 0x759   :  { %v3004_v46 = vpop.f32.mrf.mxu0  ;;  %v3046_v18 = vpop.f32.mrf.mxu1 }
 0x75a   :  { %4676 = vpow2.f32 %v3753_v25  ;;  %v3051_v8 = vadd.f32 %v3004_v46, %v6851_v19  ;;  %v3755_v50 = vmul.f32 -1.442695, %v3064_v37  ;;  %v3079_v60 = vadd.f32 %v6526_v51, %v3046_v18 }
 0x75b   :  { %v4212_v20 = vpop.f32.mrf.mxu1  ;;  %v3006_v31 = vpop.f32.mrf.mxu0 }
 0x75c   :  { %v3754_v13 = vmul.f32 -1.442695, %v3051_v8  ;;  %v3065_v56 = vadd.f32 %v3006_v31, %v6853_v57 }
 0x75e   :  { %4678 = vpow2.f32 %v3754_v13  ;;  %v3756_v16 = vmul.f32 -1.442695, %v3065_v56 }
 0x75f   :  { %4680 = vpow2.f32 %v3755_v50 }
 0x760   :  { %4682 = vpow2.f32 %v3756_v16 }
 0x767   :  { %v4677_v43 = vpop.eup %4676 }
 0x768   :  { %v3058_v49 = vadd.f32 1.0, %v4677_v43 }
 0x76a   :  { %4684 = vrcp.f32 %v3058_v49 }
 0x76b   :  { %v4679_v41 = vpop.eup %4678 }
 0x76c   :  { %v3059_v52 = vadd.f32 1.0, %v4679_v41  ;;  %v4681_v35 = vpop.eup %4680 }
 0x76d   :  { %v4683_v47 = vpop.eup %4682  ;;  %v3072_v55 = vadd.f32 1.0, %v4681_v35 }
 0x76e   :  { %4686 = vrcp.f32 %v3059_v52  ;;  %v3073_v59 = vadd.f32 1.0, %v4683_v47 }
 0x76f   :  { %4688 = vrcp.f32 %v3072_v55  ;;  %v6858_v55 = vld [vmem:[#allocation74_spill] sm:$0xff] }
 0x770   :  { %4690 = vrcp.f32 %v3073_v59 }
 0x777   :  { %v4685_v2 = vpop.eup %4684 }
 0x778   :  { %v3080_v45 = vmul.f32 %v4685_v2, %v3078_v28 }
 0x77a   :  { %v3082_v40 = vadd.f32 %v3080_v45, %v6854_v3 }
 0x77b   :  { %v4687_v7 = vpop.eup %4686 }
 0x77c   :  { %4692 = vtanh.f32 %v3082_v40  ;;  %v3081_v6 = vmul.f32 %v4687_v7, %v3079_v60  ;;  %v4689_v48 = vpop.eup %4688 }
 0x77d   :  { %v4691_v25 = vpop.eup %4690  ;;  %v3086_v46 = vsub.f32 1.0, %v4689_v48  ;;  %v3090_v8 = vmul.f32 %v4689_v48, %v6418_v0 }
 0x77e   :  { %v3083_v34 = vadd.f32 %v3081_v6, %v6855_v17  ;;  %v3087_v20 = vsub.f32 1.0, %v4691_v25  ;;  %v3091_v18 = vmul.f32 %v4691_v25, %v6423_v21  ;;  %v6856_v21 = vld [vmem:[#allocation21_spill] sm:$0xff] }
 0x780   :  { %4694 = vtanh.f32 %v3083_v34 }
 0x789   :  { %v4693_v19 = vpop.eup %4692 }
 0x78a   :  { %v3088_v42 = vmul.f32 %v4693_v19, %v3086_v46 }
 0x78c   :  { %v6533_v14 = vadd.f32 %v3090_v8, %v3088_v42 }
 0x78d   :  { %v4695_v37 = vpop.eup %4694 }
 0x78e   :  { %v3089_v13 = vmul.f32 %v4695_v37, %v3087_v20  ;;  %v3801_v31 = vpack.c.bf16 %v6533_v14, %v6533_v14 }
 0x790   :  { %v6538_v57 = vadd.f32 %v3091_v18, %v3089_v13  ;;  %3102 = vst [vmem:[#allocation11 + $0x60] sm:$0xf] %v3801_v31  ;;  %v6862_v18 = vld [vmem:[#allocation64_spill] sm:$0xff] }
 0x792   :  { %v3094_v56 = vpack.c.bf16 %v6538_v57, %v6533_v14  ;;  %v3802_v50 = vpack.c.bf16 %v6538_v57, %v6538_v57 }
 0x794   :  { %3103 = vst [vmem:[#allocation11 + $0x68] sm:$0xf] %v3802_v50  ;;  %3287 = vmatmul.mubr.bf16.vlgmr.msra.gmra.mxu0 %v3094_v56  ;;  %4250 = vmatmul.mubr.bf16.vlgmr.msra.gmra.mxu1 %v3094_v56  ;;  %v3144_v0 = vpop.f32.mrf.mxu0  ;;  %v3187_v16 = vpop.f32.mrf.mxu1 }
 0x795   :  { %3399 = vmatpush1.bf16.msra.mxu0 %v6253_v1  ;;  %4254 = vmatpush3.bf16.msra.mxu1 %v6256_v36  ;;  %v3194_v43 = vadd.f32 %v3144_v0, %v6856_v21  ;;  %v6857_v1 = vld [vmem:[#allocation23_spill] sm:$0xff] }
 0x796   :  { %3400 = vmatprep.subr.bf16.mxu0 %v6260_v39  ;;  %4255 = vmatprep.subr.bf16.mxu1 %v6747_v61  ;;  %v3146_v49 = vpop.f32.mrf.mxu0  ;;  %v4231_v41 = vpop.f32.mrf.mxu1  ;;  %v6863_v21 = vld [vmem:[#allocation67_spill] sm:$0xff] }
 0x797   :  { %3430 = vmatprep.mubr.bf16.mxu0 %v6748_v63  ;;  %4269 = vmatprep.mubr.msk.bf16.mxu1 %vm4998_vm0, %v6747_v61  ;;  %v3759_v52 = vmul.f32 -1.442695, %v3194_v43  ;;  %v3208_v63 = vadd.f32 %v3146_v49, %v6858_v55  ;;  %v6864_v41 = vld [vmem:[#allocation66_spill] sm:$0xff] }
 0x798   :  { %v3148_v35 = vpop.f32.mrf.mxu0  ;;  %v3190_v47 = vpop.f32.mrf.mxu1 }
 0x799   :  { %3401 = vmatpush1.bf16.msra.mxu0 %v6269_v38  ;;  %4256 = vmatpush3.bf16.msra.mxu1 %v6272_v26  ;;  %4696 = vpow2.f32 %v3759_v52  ;;  %v3195_v36 = vadd.f32 %v3148_v35, %v6857_v1  ;;  %v6859_v38 = vld [vmem:[#allocation76_spill] sm:$0xff]  ;;  %v3761_v59 = vmul.f32 -1.442695, %v3208_v63  ;;  %v6865_v1 = vld [vmem:[#allocation69_spill] sm:$0xff] }
 0x79a   :  { %3402 = vmatprep.subr.bf16.mxu0 %v6276_v23  ;;  %4257 = vmatprep.subr.bf16.mxu1 %v6747_v61  ;;  %v4232_v39 = vpop.f32.mrf.mxu1  ;;  %v3150_v2 = vpop.f32.mrf.mxu0 }
 0x79b   :  { %v3760_v28 = vmul.f32 -1.442695, %v3195_v36  ;;  %v3209_v26 = vadd.f32 %v3150_v2, %v6859_v38 }
 0x79d   :  { %3403 = vmatpush1.bf16.msra.mxu0 %v6281_v53  ;;  %4258 = vmatpush3.bf16.msra.mxu1 %v6284_v4  ;;  %4698 = vpow2.f32 %v3760_v28  ;;  %v3762_v23 = vmul.f32 -1.442695, %v3209_v26 }
 0x79e   :  { %3404 = vmatprep.subr.bf16.mxu0 %v6287_v44  ;;  %4259 = vmatprep.subr.bf16.mxu1 %v6747_v61  ;;  %4700 = vpow2.f32 %v3761_v59 }
 0x79f   :  { %4702 = vpow2.f32 %v3762_v23 }
 0x7a1   :  { %3405 = vmatpush1.bf16.msra.mxu0 %v6292_v5  ;;  %4260 = vmatpush3.bf16.msra.mxu1 %v6295_v54 }
 0x7a2   :  { %3406 = vmatprep.subr.bf16.mxu0 %v6298_v12  ;;  %4261 = vmatprep.subr.bf16.mxu1 %v6747_v61 }
 0x7a5   :  { %3407 = vmatpush1.bf16.msra.mxu0 %v6302_v9  ;;  %4262 = vmatpush3.bf16.msra.mxu1 %v6305_v29  ;;  %v6584_v29 = vld [vmem:[%s6632_s4 + $0x1] ss:$0 sm:$0xff]  ;;  %s4999_s4 = smov [#allocation12]  }
 0x7a6   :  { %3408 = vmatprep.subr.bf16.mxu0 %v6308_v32  ;;  %4263 = vmatprep.subr.bf16.mxu1 %v6747_v61  ;;  %v4697_v53 = vpop.eup %4696  ;;  %v3222_v32 = vadd.f32 %v6584_v29, %v3187_v16  ;;  %s3557_s7 = sshll.u32 %s4999_s4, 4  ;;  %s3558_s7 = int_to_ptr.vmem [resolvable:$true] %s3557_s7 }
 0x7a7   :  { %v3202_v4 = vadd.f32 1.0, %v4697_v53  ;;  %s4936_s10 = scalar_lea.vmem %s3558_s7, 512  ;;  %p4941_p7 = scmp.lt.s32.totalorder %s3558_s7, %s3558_s7 }
 0x7a8   :  { %p4937_p6 = scmp.ne.s32.totalorder %s3558_s7, %s4936_s10  ;;  %p4942_p8 = scmp.lt.s32.totalorder %s4936_s10, %s4936_s10 }
 0x7a9   :  { %3409 = vmatpush1.bf16.msra.mxu0 %v6312_v15  ;;  %4264 = vmatpush3.bf16.msra.mxu1 %v6315_v33  ;;  %4704 = vrcp.f32 %v3202_v4 }
 0x7aa   :  { %3410 = vmatprep.subr.bf16.mxu0 %v6318_v24  ;;  %4265 = vmatprep.subr.bf16.mxu1 %v6747_v61  ;;  %v4699_v44 = vpop.eup %4698  ;;  %p4943_p9 = por %p4942_p8, %p4941_p7 }
 0x7ab   :  { %v3203_v5 = vadd.f32 1.0, %v4699_v44  ;;  %v4701_v54 = vpop.eup %4700 }
 0x7ac   :  { %v4703_v12 = vpop.eup %4702  ;;  %v3216_v9 = vadd.f32 1.0, %v4701_v54  ;;  %v6866_v54 = vld [vmem:[#allocation65_spill] sm:$0xff]  ;;  %p4944_p10 = pnand %p4943_p9, %p4937_p6 }
 0x7ad   :  { %3411 = vmatpush1.bf16.msra.mxu0 %v6322_v62  ;;  %4266 = vmatpush3.bf16.msra.mxu1 %v6325_v22  ;;  %4706 = vrcp.f32 %v3203_v5  ;;  %v3217_v33 = vadd.f32 1.0, %v4703_v12  ;;  %v6860_v62 = vld [vmem:[#allocation75_spill] sm:$0xff]  ;;  %v3223_v22 = vadd.f32 %v6584_v29, %v3190_v47 }
 0x7ae   :  { %3412 = vmatprep.subr.bf16.mxu0 %v6328_v27  ;;  %4267 = vmatprep.subr.bf16.mxu1 %v6747_v61  ;;  %4708 = vrcp.f32 %v3216_v9 }
 0x7af   :  { %4710 = vrcp.f32 %v3217_v33  ;;  %v6867_v33 = vld [vmem:[#allocation68_spill] sm:$0xff] }
 0x7b1   :  { %3413 = vmatpush1.bf16.msra.mxu0 %v6836_v11  ;;  %4268 = vmatpush3.bf16.msra.mxu1 %v6837_v30  ;;  %v6861_v30 = vld [vmem:[#allocation77_spill] sm:$0xff] }
 0x7b6   :  { %v4705_v15 = vpop.eup %4704 }
 0x7b7   :  { %v3224_v24 = vmul.f32 %v4705_v15, %v3222_v32 }
 0x7b9   :  { %v3226_v61 = vadd.f32 %v3224_v24, %v6860_v62 }
 0x7ba   :  { %v4707_v27 = vpop.eup %4706 }
 0x7bb   :  { %4712 = vtanh.f32 %v3226_v61  ;;  %v3225_v11 = vmul.f32 %v4707_v27, %v3223_v22  ;;  %v4709_v3 = vpop.eup %4708 }
 0x7bc   :  { %v4711_v40 = vpop.eup %4710  ;;  %v3230_v60 = vsub.f32 1.0, %v4709_v3  ;;  %v3234_v17 = vmul.f32 %v4709_v3, %v6473_v58 }
 0x7bd   :  { %v3227_v45 = vadd.f32 %v3225_v11, %v6861_v30  ;;  %v3231_v34 = vsub.f32 1.0, %v4711_v40  ;;  %v3235_v19 = vmul.f32 %v4711_v40, %v6478_v10 }
 0x7bf   :  { %4714 = vtanh.f32 %v3227_v45 }
 0x7c8   :  { %v4713_v7 = vpop.eup %4712 }
 0x7c9   :  { %v3232_v6 = vmul.f32 %v4713_v7, %v3230_v60 }
 0x7cb   :  { %v6591_v48 = vadd.f32 %v3234_v17, %v3232_v6 }
 0x7cc   :  { %v4715_v25 = vpop.eup %4714 }
 0x7cd   :  { %v3233_v46 = vmul.f32 %v4715_v25, %v3231_v34  ;;  %v3803_v42 = vpack.c.bf16 %v6591_v48, %v6591_v48 }
 0x7cf   :  { %v6596_v8 = vadd.f32 %v3235_v19, %v3233_v46  ;;  %3246 = vst [vmem:[#allocation11 + $0x14] sm:$0xf] %v3803_v42  ;;  %v6868_v46 = vld [vmem:[#allocation19_spill] sm:$0xff] }
 0x7d1   :  { %v3238_v20 = vpack.c.bf16 %v6596_v8, %v6591_v48  ;;  %v3804_v37 = vpack.c.bf16 %v6596_v8, %v6596_v8 }
 0x7d3   :  { %3247 = vst [vmem:[#allocation11 + $0x1c] sm:$0xf] %v3804_v37  ;;  %3431 = vmatmul.mubr.bf16.vlgmr.msra.gmra.mxu0 %v3238_v20  ;;  %4270 = vmatmul.mubr.bf16.vlgmr.msra.gmra.mxu1 %v3238_v20 }
 0x854   :  { %v3288_v58 = vpop.f32.mrf.mxu0  ;;  %v3331_v13 = vpop.f32.mrf.mxu1 }
 0x855   :  { %v3338_v31 = vadd.f32 %v3288_v58, %v6862_v18  ;;  %v3366_v53 = vadd.f32 %v6526_v51, %v3331_v13  ;;  %v6869_v13 = vld [vmem:[#allocation20_spill] sm:$0xff] }
 0x856   :  { %v3290_v10 = vpop.f32.mrf.mxu0  ;;  %v4251_v56 = vpop.f32.mrf.mxu1 }
 0x857   :  { %v3765_v50 = vmul.f32 -1.442695, %v3338_v31  ;;  %v3352_v52 = vadd.f32 %v3290_v10, %v6864_v41  ;;  %v6870_v10 = vld [vmem:[#allocation70_spill] sm:$0xff] }
 0x858   :  { %v3292_v0 = vpop.f32.mrf.mxu0  ;;  %v3334_v16 = vpop.f32.mrf.mxu1 }
 0x859   :  { %4716 = vpow2.f32 %v3765_v50  ;;  %v3339_v43 = vadd.f32 %v3292_v0, %v6863_v21  ;;  %v3767_v39 = vmul.f32 -1.442695, %v3352_v52  ;;  %v3367_v9 = vadd.f32 %v6526_v51, %v3334_v16  ;;  %v6871_v0 = vld [vmem:[#allocation72_spill] sm:$0xff] }
 0x85a   :  { %v4252_v49 = vpop.f32.mrf.mxu1  ;;  %v3294_v47 = vpop.f32.mrf.mxu0 }
 0x85b   :  { %v3766_v35 = vmul.f32 -1.442695, %v3339_v43  ;;  %v3353_v36 = vadd.f32 %v3294_v47, %v6865_v1 }
 0x85d   :  { %4718 = vpow2.f32 %v3766_v35  ;;  %v3768_v55 = vmul.f32 -1.442695, %v3353_v36 }
 0x85e   :  { %4720 = vpow2.f32 %v3767_v39 }
 0x85f   :  { %4722 = vpow2.f32 %v3768_v55 }
 0x866   :  { %v4717_v63 = vpop.eup %4716 }
 0x867   :  { %v3346_v28 = vadd.f32 1.0, %v4717_v63 }
 0x869   :  { %4724 = vrcp.f32 %v3346_v28 }
 0x86a   :  { %v4719_v2 = vpop.eup %4718 }
 0x86b   :  { %v3347_v38 = vadd.f32 1.0, %v4719_v2  ;;  %v4721_v26 = vpop.eup %4720  ;;  %v6872_v2 = vld [vmem:[#allocation71_spill] sm:$0xff] }
 0x86c   :  { %v4723_v59 = vpop.eup %4722  ;;  %v3360_v23 = vadd.f32 1.0, %v4721_v26 }
 0x86d   :  { %4726 = vrcp.f32 %v3347_v38  ;;  %v3361_v44 = vadd.f32 1.0, %v4723_v59 }
 0x86e   :  { %4728 = vrcp.f32 %v3360_v23 }
 0x86f   :  { %4730 = vrcp.f32 %v3361_v44 }
 0x876   :  { %v4725_v4 = vpop.eup %4724 }
 0x877   :  { %v3368_v5 = vmul.f32 %v4725_v4, %v3366_v53  ;;  %v6873_v53 = vld [vmem:[#allocation73_spill] sm:$0xff] }
 0x879   :  { %v3370_v12 = vadd.f32 %v3368_v5, %v6866_v54 }
 0x87a   :  { %v4727_v32 = vpop.eup %4726 }
 0x87b   :  { %4732 = vtanh.f32 %v3370_v12  ;;  %v3369_v15 = vmul.f32 %v4727_v32, %v3367_v9  ;;  %v4729_v62 = vpop.eup %4728 }
 0x87c   :  { %v4731_v61 = vpop.eup %4730  ;;  %v3374_v22 = vsub.f32 1.0, %v4729_v62  ;;  %v3378_v30 = vmul.f32 %v4729_v62, %v6533_v14 }
 0x87d   :  { %v3371_v24 = vadd.f32 %v3369_v15, %v6867_v33  ;;  %v3375_v3 = vsub.f32 1.0, %v4731_v61  ;;  %v3379_v7 = vmul.f32 %v4731_v61, %v6538_v57 }
 0x87f   :  { %4734 = vtanh.f32 %v3371_v24 }
 0x888   :  { %v4733_v27 = vpop.eup %4732 }
 0x889   :  { %v3376_v11 = vmul.f32 %v4733_v27, %v3374_v22 }
 0x88b   :  { %v3380_v45 = vadd.f32 %v3378_v30, %v3376_v11 }
 0x88c   :  { %v4735_v40 = vpop.eup %4734 }
 0x88d   :  { %v3805_v60 = vpack.c.bf16 %v3380_v45, %v3380_v45  ;;  %3536 = vst [vmem:[#allocation12] sm:$0xff] %v3380_v45  ;;  %v3377_v51 = vmul.f32 %v4735_v40, %v3375_v3 }
 0x88f   :  { %3390 = vst [vmem:[#allocation11 + $0x70] sm:$0xf] %v3805_v60  ;;  %v3381_v6 = vadd.f32 %v3379_v7, %v3377_v51 }
 0x891   :  { %v3806_v17 = vpack.c.bf16 %v3381_v6, %v3381_v6  ;;  %3537 = vst [vmem:[#allocation12 + $0x10] sm:$0xff] %v3381_v6 }
 0x893   :  { %3391 = vst [vmem:[#allocation11 + $0x78] sm:$0xf] %v3806_v17  ;;  %v3432_v34 = vpop.f32.mrf.mxu0  ;;  %v3475_v25 = vpop.f32.mrf.mxu1 }
 0x894   :  { %v3482_v19 = vadd.f32 %v3432_v34, %v6868_v46  ;;  %v3510_v39 = vadd.f32 %v6584_v29, %v3475_v25 }
 0x895   :  { %v3434_v42 = vpop.f32.mrf.mxu0  ;;  %v4271_v20 = vpop.f32.mrf.mxu1 }
 0x896   :  { %v3771_v14 = vmul.f32 -1.442695, %v3482_v19  ;;  %v3496_v57 = vadd.f32 %v3434_v42, %v6870_v10 }
 0x897   :  { %v3436_v37 = vpop.f32.mrf.mxu0  ;;  %v3478_v58 = vpop.f32.mrf.mxu1 }
 0x898   :  { %4736 = vpow2.f32 %v3771_v14  ;;  %v3483_v18 = vadd.f32 %v3436_v37, %v6869_v13  ;;  %v3773_v21 = vmul.f32 -1.442695, %v3496_v57  ;;  %v3511_v26 = vadd.f32 %v6584_v29, %v3478_v58 }
 0x899   :  { %v4272_v31 = vpop.f32.mrf.mxu1  ;;  %v3438_v50 = vpop.f32.mrf.mxu0 }
 0x89a   :  { %v3772_v56 = vmul.f32 -1.442695, %v3483_v18  ;;  %v3497_v16 = vadd.f32 %v3438_v50, %v6871_v0 }
 0x89c   :  { %4738 = vpow2.f32 %v3772_v56  ;;  %v3774_v43 = vmul.f32 -1.442695, %v3497_v16 }
 0x89d   :  { %4740 = vpow2.f32 %v3773_v21 }
 0x89e   :  { %4742 = vpow2.f32 %v3774_v43 }
 0x8a5   :  { %v4737_v49 = vpop.eup %4736 }
 0x8a6   :  { %v3490_v41 = vadd.f32 1.0, %v4737_v49 }
 0x8a8   :  { %4744 = vrcp.f32 %v3490_v41 }
 0x8a9   :  { %v4739_v52 = vpop.eup %4738 }
 0x8aa   :  { %v3491_v35 = vadd.f32 1.0, %v4739_v52  ;;  %v4741_v47 = vpop.eup %4740 }
 0x8ab   :  { %v4743_v1 = vpop.eup %4742  ;;  %v3504_v36 = vadd.f32 1.0, %v4741_v47 }
 0x8ac   :  { %4746 = vrcp.f32 %v3491_v35  ;;  %v3505_v63 = vadd.f32 1.0, %v4743_v1 }
 0x8ad   :  { %4748 = vrcp.f32 %v3504_v36 }
 0x8ae   :  { %4750 = vrcp.f32 %v3505_v63 }
 0x8b5   :  { %v4745_v55 = vpop.eup %4744 }
 0x8b6   :  { %v3512_v28 = vmul.f32 %v4745_v55, %v3510_v39 }
 0x8b8   :  { %v3514_v38 = vadd.f32 %v3512_v28, %v6872_v2 }
 0x8b9   :  { %v4747_v59 = vpop.eup %4746 }
 0x8ba   :  { %4752 = vtanh.f32 %v3514_v38  ;;  %v3513_v23 = vmul.f32 %v4747_v59, %v3511_v26  ;;  %v4749_v44 = vpop.eup %4748 }
 0x8bb   :  { %v4751_v5 = vpop.eup %4750  ;;  %v3518_v54 = vsub.f32 1.0, %v4749_v44  ;;  %v3522_v32 = vmul.f32 %v4749_v44, %v6591_v48 }
 0x8bc   :  { %v3515_v4 = vadd.f32 %v3513_v23, %v6873_v53  ;;  %v3519_v33 = vsub.f32 1.0, %v4751_v5  ;;  %v3523_v61 = vmul.f32 %v4751_v5, %v6596_v8 }
 0x8be   :  { %4754 = vtanh.f32 %v3515_v4 }
 0x8c7   :  { %v4753_v12 = vpop.eup %4752 }
 0x8c8   :  { %v3520_v9 = vmul.f32 %v4753_v12, %v3518_v54 }
 0x8ca   :  { %v3524_v15 = vadd.f32 %v3522_v32, %v3520_v9 }
 0x8cb   :  { %v4755_v24 = vpop.eup %4754 }
 0x8cc   :  { %v3807_v29 = vpack.c.bf16 %v3524_v15, %v3524_v15  ;;  %3538 = vst [vmem:[#allocation12 + $0x8] sm:$0xff] %v3524_v15  ;;  %v3521_v62 = vmul.f32 %v4755_v24, %v3519_v33 }
 0x8ce   :  { %3534 = vst [vmem:[#allocation11 + $0x4] sm:$0xf] %v3807_v29  ;;  %v3525_v22 = vadd.f32 %v3523_v61, %v3521_v62 }
 0x8d0   :  { %v3808_v27 = vpack.c.bf16 %v3525_v22, %v3525_v22  ;;  %3539 = vst [vmem:[#allocation12 + $0x18] sm:$0xff] %v3525_v22 }
 0x8d1   :  { %4947 = shalt.err (!%p4944_p10)
}
 0x8d2   :  { %s5001_s11 = smov 256   ;;  %s5002_s12 = smov 16   ;;  %3535 = vst [vmem:[#allocation11 + $0xc] sm:$0xf] %v3808_v27 }
 0x8d3   :  { %3563 = dma.vmem_to_hbm [thread:$0]  %s3558_s7, 512, %s6634_s6, [#allocation13], %s5001_s11, %s5001_s11, %s5002_s12  }
 0x8d4   :  { %s4956_s14 = scalar_lea.vmem %s3546_s9, 2048  ;;  %p4961_p12 = scmp.lt.s32.totalorder %s3546_s9, %s3546_s9 }
 0x8d5   :  { %p4957_p11 = scmp.ne.s32.totalorder %s3546_s9, %s4956_s14  ;;  %p4962_p13 = scmp.lt.s32.totalorder %s4956_s14, %s4956_s14 }
 0x8d7   :  { %p4963_p0 = por %p4962_p13, %p4961_p12 }
 0x8d9   :  { %p4964_p1 = pnand %p4963_p0, %p4957_p11 }
 0x8db   :  { %4967 = shalt.err (!%p4964_p1)
}
 0x8dc   :  { %s5003_s15 = smov 128   ;;  %s5004_s16 = smov 8  }
 0x8dd   :  { %3551 = dma.vmem_to_hbm [thread:$0]  %s3546_s9, 2048, %s6633_s5, [#allocation5], %s5003_s15, %s5003_s15, %s5004_s16  }
 0x8de   :  { %4982 = dma.done.wait [#allocation5], 2048  }
 0x8df   :  { %4983 = vsyncadd [#allocation5], 4294965248 }
 0x8e0   :  { %4984 = dma.done.wait [#allocation13], 512  }
 0x8e1   :  { %4985 = vsyncadd [#allocation13], 4294966784 }
 0x8e2   :  { %3570 = vsyncpa [#allocation4], 1 }
 0x8e3   :  { %3571 = vsyncpa [#allocation7], 1 }
 0x8e4   :  { %3572 = vsyncpa [#allocation10], 1 }
 0x8e5   :  { %3573 = vsyncpa [#allocation5], 1 }
 0x8e6   :  { %3574 = vsyncpa [#allocation13], 1 }

</bundles_post_ra>
